<compile_context>
chip_gen: v7x
topology: tpu7x:2x2x1
jax: 0.10.0
libtpu: 0.0.40
codegen_flags: <defaults>
</compile_context>

<pallas_src>
import jax
import jax.numpy as jnp
from jax.experimental import pallas as pl
from jax.experimental.pallas import tpu as pltpu


_SUB = 16            # bf16 sublane packing unit (row-tile granularity)
_TILE_N_MAX = 512    # rows per grid step; >=512 reaches ~85% of HBM roofline
                     # and keeps the double-buffered working set small on all
                     # of v5e / v6e / v7x.


def _round_up(n, m):
    return ((n + m - 1) // m) * m


def _row_tiling(n_rows):
    """Row tile + padded extent such that the grid has >= 2 steps.

    >= 2 steps keeps both v7x TensorCores busy and preserves DMA/compute
    double-buffering even at small batch.
    """
    n_steps = max(2, -(-n_rows // _TILE_N_MAX))
    tile = _round_up(-(-n_rows // n_steps), _SUB)
    padded = _round_up(n_rows, tile)
    return tile, padded


# ----------------------------------------------------------------------------
# Pallas kernels
# ----------------------------------------------------------------------------
def conv_bn_relu_pool_kernel(p_ref, w_ref, bias_ref, o_ref):
    """Fused conv(im2col matmul) + folded BN + ReLU + 2x2 maxpool.

    p_ref    : (4, TN, K)  bf16  patches, one slab per pool-window position
               (K is the TRUE contraction size, unpadded in HBM)
    w_ref    : (K, Cout)   bf16  conv weight with BN scale folded in
    bias_ref : (1, Cout)   f32   beta + (conv_bias - mean) * scale
    o_ref    : (TN, Cout)  bf16  pooled output tile (unpadded channels)
    """
    w = w_ref[...]
    b = bias_ref[...]
    out = None
    # 4 separate dots with a running max: same MXU work as one tall dot, but
    # ~4x smaller live f32 working set and no reshapes.
    for pos in range(p_ref.shape[0]):
        y = jnp.dot(p_ref[pos], w, preferred_element_type=jnp.float32)
        y = jnp.maximum(y + b, 0.0)          # affine (scale already in w) + ReLU
        out = y if out is None else jnp.maximum(out, y)
    o_ref[...] = out.astype(o_ref.dtype)


def linear_kernel(x_ref, w_ref, b_ref, o_ref):
    """o = x @ w + b ; x: (TB, F) bf16, w: (F, O) bf16, b: (1, O) f32."""
    o_ref[...] = (jnp.dot(x_ref[...], w_ref[...],
                          preferred_element_type=jnp.float32) + b_ref[...])


# ----------------------------------------------------------------------------
# JAX glue (padding, im2col, parameter folding) + pallas_call wrappers
# ----------------------------------------------------------------------------
def _im2col(x_nhwc, ksize=5, pad=2):
    """(B, H, W, C) -> (B, H, W, ksize*ksize*C), feature order = (kh, kw, c)."""
    B, H, W, C = x_nhwc.shape
    xp = jnp.pad(x_nhwc, ((0, 0), (pad, pad), (pad, pad), (0, 0)))
    cols = [xp[:, kh:kh + H, kw:kw + W, :]
            for kh in range(ksize) for kw in range(ksize)]
    patches = jnp.stack(cols, axis=3)                  # (B, H, W, 25, C)
    return patches.reshape(B, H, W, ksize * ksize * C)


def conv_bn_relu_pool(x_nhwc, conv_w, conv_b, gamma, beta, mean, var, eps=1e-5):
    """One layer: Conv2d(5x5, pad=2) + BatchNorm(eval) + ReLU + MaxPool(2,2)."""
    B, H, W, Cin = x_nhwc.shape
    Cout = conv_w.shape[0]
    K = 5 * 5 * Cin                          # true contraction size (unpadded)
    Ho, Wo = H // 2, W // 2
    N = B * Ho * Wo

    tile_n, Np = _row_tiling(N)
    grid = (Np // tile_n,)

    # im2col in bf16 (halves the dominant HBM traffic); K stays unpadded in
    # HBM -- the BlockSpec's last dim equals the full array extent, which is
    # legal, and Mosaic pads the contraction inside VMEM for free.
    x_bf = x_nhwc.astype(jnp.bfloat16)
    patches = _im2col(x_bf)                              # (B, H, W, K) bf16
    pools = jnp.stack(
        [patches[:, ph::2, pw::2, :].reshape(N, K)
         for ph in (0, 1) for pw in (0, 1)], axis=0)     # (4, N, K)
    pools = jnp.pad(pools, ((0, 0), (0, Np - N), (0, 0)))

    # Fold BN: y = conv(x)*scale + (beta + (conv_b - mean)*scale).
    # The scale is baked into the weight columns so the kernel epilogue is
    # only relu(y + bias); negative gamma stays correct (ReLU/max come after).
    scale = gamma / jnp.sqrt(var + eps)                              # (Cout,)
    bias = (beta + (conv_b - mean) * scale).reshape(1, Cout).astype(jnp.float32)
    # PyTorch conv weight (O, I, kh, kw) -> (kh, kw, I, O) -> (K, O).
    w_mat = jnp.transpose(conv_w, (2, 3, 1, 0)).reshape(K, Cout)
    w_mat = (w_mat * scale[None, :]).astype(jnp.bfloat16)

    out = pl.pallas_call(
        conv_bn_relu_pool_kernel,
        grid=grid,
        out_shape=jax.ShapeDtypeStruct((Np, Cout), jnp.bfloat16),
        in_specs=[
            pl.BlockSpec((4, tile_n, K), lambda i: (0, i, 0)),  # patch tiles
            pl.BlockSpec((K, Cout), lambda i: (0, 0)),          # weight (invariant)
            pl.BlockSpec((1, Cout), lambda i: (0, 0)),          # folded BN bias
        ],
        out_specs=pl.BlockSpec((tile_n, Cout), lambda i: (i, 0)),
        compiler_params=pltpu.CompilerParams(
            dimension_semantics=("parallel",),
            vmem_limit_bytes=32 * 1024 * 1024),
    )(pools, w_mat, bias)

    # Padded rows hold relu(bias) garbage -- always slice them off here.
    return out[:N].reshape(B, Ho, Wo, Cout)


def linear(x, w, b):
    """x: (B, F) bf16/f32, w: (O, F) PyTorch layout, b: (O,) -> (B, O) f32."""
    B, F = x.shape
    O = w.shape[0]
    tile_b = min(256, _round_up(B, _SUB))
    Bp = _round_up(B, tile_b)

    xp = jnp.pad(x.astype(jnp.bfloat16), ((0, Bp - B), (0, 0)))   # (Bp, F)
    wp = w.T.astype(jnp.bfloat16)                                  # (F, O)
    bp = b.reshape(1, O).astype(jnp.float32)

    out = pl.pallas_call(
        linear_kernel,
        grid=(Bp // tile_b,),
        out_shape=jax.ShapeDtypeStruct((Bp, O), jnp.float32),
        in_specs=[
            pl.BlockSpec((tile_b, F), lambda i: (i, 0)),
            pl.BlockSpec((F, O), lambda i: (0, 0)),
            pl.BlockSpec((1, O), lambda i: (0, 0)),
        ],
        out_specs=pl.BlockSpec((tile_b, O), lambda i: (i, 0)),
        compiler_params=pltpu.CompilerParams(
            dimension_semantics=("parallel",),
            vmem_limit_bytes=32 * 1024 * 1024),
    )(xp, wp, bp)
    return out[:B]


def net_forward(x_nchw, p):
    B = x_nchw.shape[0]
    x = jnp.transpose(x_nchw, (0, 2, 3, 1))            # NCHW -> NHWC
    h1 = conv_bn_relu_pool(x, p["conv1_w"], p["conv1_b"],
                           p["bn1_g"], p["bn1_b"], p["bn1_m"], p["bn1_v"])
    h2 = conv_bn_relu_pool(h1, p["conv2_w"], p["conv2_b"],
                           p["bn2_g"], p["bn2_b"], p["bn2_m"], p["bn2_v"])
    # PyTorch flattens NCHW as (C, H, W); instead of transposing the activation
    # back to NCHW (HBM round-trip), permute the constant fc weight's columns
    # once to NHWC flatten order and feed h2.reshape(B, -1) directly.
    _, Ho, Wo, Cout = h2.shape
    n_classes = p["fc_w"].shape[0]
    fc_w_nhwc = (p["fc_w"].reshape(n_classes, Cout, Ho, Wo)
                 .transpose(0, 2, 3, 1)
                 .reshape(n_classes, Ho * Wo * Cout))
    feat = h2.reshape(B, -1)                            # (B, 7*7*32), bf16
    return linear(feat, fc_w_nhwc, p["fc_b"])


# ----------------------------------------------------------------------------
# Deterministic parameter init + demo
# ----------------------------------------------------------------------------
def init_params(key):
    ks = jax.random.split(key, 8)
    f32 = jnp.float32
    return {
        "conv1_w": 0.1 * jax.random.normal(ks[0], (16, 1, 5, 5), f32),
        "conv1_b": 0.1 * jax.random.normal(ks[1], (16,), f32),
        "bn1_g": jnp.ones((16,), f32),
        "bn1_b": jnp.zeros((16,), f32),
        "bn1_m": 0.01 * jax.random.normal(ks[2], (16,), f32),
        "bn1_v": jnp.ones((16,), f32),
        "conv2_w": 0.05 * jax.random.normal(ks[3], (32, 16, 5, 5), f32),
        "conv2_b": 0.1 * jax.random.normal(ks[4], (32,), f32),
        "bn2_g": jnp.ones((32,), f32),
        "bn2_b": jnp.zeros((32,), f32),
        "bn2_m": 0.01 * jax.random.normal(ks[5], (32,), f32),
        "bn2_v": jnp.ones((32,), f32),
        "fc_w": 0.02 * jax.random.normal(ks[6], (10, 7 * 7 * 32), f32),
        "fc_b": 0.02 * jax.random.normal(ks[7], (10,), f32),
    }


if __name__ == "__main__":
    key = jax.random.PRNGKey(0)
    pkey, xkey = jax.random.split(key)
    params = init_params(pkey)

    # MNIST-shaped input (spatial 28x28 is required by the 7*7*32 fc), batch=2.
    # NOTE: at B=2 every call is launch-overhead dominated; don't tune tile
    # sizes against this demo shape.
    x = jax.random.normal(xkey, (2, 1, 28, 28), jnp.float32)

    fwd = jax.jit(net_forward)
    logits = fwd(x, params)
    jax.block_until_ready(logits)

    assert logits.shape == (2, 10)
    assert jnp.all(jnp.isfinite(logits))
    print("KERNEL_OK")
</pallas_src>

<mosaic_0001>
module attributes {stable_mosaic.version = 11 : i64} {
  func.func @conv_bn_relu_pool_kernel(%arg0: i32, %arg1: memref<4x208x25xbf16, #tpu.memory_space<vmem>>, %arg2: memref<25x16xbf16, #tpu.memory_space<vmem>>, %arg3: memref<1x16xf32, #tpu.memory_space<vmem>>, %arg4: memref<208x16xbf16, #tpu.memory_space<vmem>>) attributes {dimension_semantics = [#tpu.dimension_semantics<parallel>], iteration_bounds = array<i64: 2>, scalar_prefetch = 0 : i64, scratch_operands = 0 : i64, tpu.core_type = #tpu.core_type<tc>, window_params = [{transform_indices = @transform_0, window_bounds = array<i64: 4, 208, 25>}, {pipeline_mode = #tpu.pipeline_mode<synchronous>, transform_indices = @transform_1, window_bounds = array<i64: 25, 16>}, {pipeline_mode = #tpu.pipeline_mode<synchronous>, transform_indices = @transform_2, window_bounds = array<i64: 1, 16>}, {transform_indices = @transform_3, window_bounds = array<i64: 208, 16>}]} {
    %c0 = arith.constant 0 : index
    %c0_0 = arith.constant 0 : index
    %0 = vector.load %arg2[%c0, %c0_0] : memref<25x16xbf16, #tpu.memory_space<vmem>>, vector<25x16xbf16>
    %c0_1 = arith.constant 0 : index
    %c0_2 = arith.constant 0 : index
    %1 = vector.load %arg3[%c0_1, %c0_2] : memref<1x16xf32, #tpu.memory_space<vmem>>, vector<1x16xf32>
    %c0_3 = arith.constant 0 : index
    %c0_4 = arith.constant 0 : index
    %c0_5 = arith.constant 0 : index
    %2 = vector.load %arg1[%c0_3, %c0_4, %c0_5] : memref<4x208x25xbf16, #tpu.memory_space<vmem>>, vector<1x208x25xbf16>
    %3 = vector.shape_cast %2 : vector<1x208x25xbf16> to vector<208x25xbf16>
    %cst = arith.constant dense<0.000000e+00> : vector<208x16xf32>
    %4 = tpu.matmul %3, %0, %cst {dimension_numbers = #tpu.dot_dimension_numbers<[1], [0], [0], [1], [0, 0, 1, 1], [], []>} : vector<208x25xbf16>, vector<25x16xbf16>, vector<208x16xf32> -> vector<208x16xf32>
    %5 = vector.broadcast %1 : vector<1x16xf32> to vector<208x16xf32>
    %6 = arith.addf %4, %5 : vector<208x16xf32>
    %cst_6 = arith.constant 0.000000e+00 : f32
    %7 = vector.broadcast %cst_6 : f32 to vector<208x16xf32>
    %8 = arith.maximumf %6, %7 : vector<208x16xf32>
    %c1 = arith.constant 1 : index
    %c0_7 = arith.constant 0 : index
    %c0_8 = arith.constant 0 : index
    %9 = vector.load %arg1[%c1, %c0_7, %c0_8] : memref<4x208x25xbf16, #tpu.memory_space<vmem>>, vector<1x208x25xbf16>
    %10 = vector.shape_cast %9 : vector<1x208x25xbf16> to vector<208x25xbf16>
    %cst_9 = arith.constant dense<0.000000e+00> : vector<208x16xf32>
    %11 = tpu.matmul %10, %0, %cst_9 {dimension_numbers = #tpu.dot_dimension_numbers<[1], [0], [0], [1], [0, 0, 1, 1], [], []>} : vector<208x25xbf16>, vector<25x16xbf16>, vector<208x16xf32> -> vector<208x16xf32>
    %12 = vector.broadcast %1 : vector<1x16xf32> to vector<208x16xf32>
    %13 = arith.addf %11, %12 : vector<208x16xf32>
    %cst_10 = arith.constant 0.000000e+00 : f32
    %14 = vector.broadcast %cst_10 : f32 to vector<208x16xf32>
    %15 = arith.maximumf %13, %14 : vector<208x16xf32>
    %16 = arith.maximumf %8, %15 : vector<208x16xf32>
    %c2 = arith.constant 2 : index
    %c0_11 = arith.constant 0 : index
    %c0_12 = arith.constant 0 : index
    %17 = vector.load %arg1[%c2, %c0_11, %c0_12] : memref<4x208x25xbf16, #tpu.memory_space<vmem>>, vector<1x208x25xbf16>
    %18 = vector.shape_cast %17 : vector<1x208x25xbf16> to vector<208x25xbf16>
    %cst_13 = arith.constant dense<0.000000e+00> : vector<208x16xf32>
    %19 = tpu.matmul %18, %0, %cst_13 {dimension_numbers = #tpu.dot_dimension_numbers<[1], [0], [0], [1], [0, 0, 1, 1], [], []>} : vector<208x25xbf16>, vector<25x16xbf16>, vector<208x16xf32> -> vector<208x16xf32>
    %20 = vector.broadcast %1 : vector<1x16xf32> to vector<208x16xf32>
    %21 = arith.addf %19, %20 : vector<208x16xf32>
    %cst_14 = arith.constant 0.000000e+00 : f32
    %22 = vector.broadcast %cst_14 : f32 to vector<208x16xf32>
    %23 = arith.maximumf %21, %22 : vector<208x16xf32>
    %24 = arith.maximumf %16, %23 : vector<208x16xf32>
    %c3 = arith.constant 3 : index
    %c0_15 = arith.constant 0 : index
    %c0_16 = arith.constant 0 : index
    %25 = vector.load %arg1[%c3, %c0_15, %c0_16] : memref<4x208x25xbf16, #tpu.memory_space<vmem>>, vector<1x208x25xbf16>
    %26 = vector.shape_cast %25 : vector<1x208x25xbf16> to vector<208x25xbf16>
    %cst_17 = arith.constant dense<0.000000e+00> : vector<208x16xf32>
    %27 = tpu.matmul %26, %0, %cst_17 {dimension_numbers = #tpu.dot_dimension_numbers<[1], [0], [0], [1], [0, 0, 1, 1], [], []>} : vector<208x25xbf16>, vector<25x16xbf16>, vector<208x16xf32> -> vector<208x16xf32>
    %28 = vector.broadcast %1 : vector<1x16xf32> to vector<208x16xf32>
    %29 = arith.addf %27, %28 : vector<208x16xf32>
    %cst_18 = arith.constant 0.000000e+00 : f32
    %30 = vector.broadcast %cst_18 : f32 to vector<208x16xf32>
    %31 = arith.maximumf %29, %30 : vector<208x16xf32>
    %32 = arith.maximumf %24, %31 : vector<208x16xf32>
    %33 = arith.truncf %32 : vector<208x16xf32> to vector<208x16xbf16>
    %c0_19 = arith.constant 0 : index
    %c0_20 = arith.constant 0 : index
    %34 = vector.load %arg4[%c0_19, %c0_20] : memref<208x16xbf16, #tpu.memory_space<vmem>>, vector<208x16xbf16>
    tpu.vector_store %arg4[%c0_19, %c0_20], %33 {strides = array<i32>} : memref<208x16xbf16, #tpu.memory_space<vmem>>, vector<208x16xbf16>,
    return
  }
  func.func @transform_0(%arg0: i32) -> (i32, i32, i32) {
    %c0_i32 = arith.constant 0 : i32
    %c0_i32_0 = arith.constant 0 : i32
    %c0_i32_1 = arith.constant 0 : i32
    return %c0_i32, %arg0, %c0_i32_0 : i32, i32, i32
  }
  func.func @transform_1(%arg0: i32) -> (i32, i32) {
    %c0_i32 = arith.constant 0 : i32
    %c0_i32_0 = arith.constant 0 : i32
    %c0_i32_1 = arith.constant 0 : i32
    return %c0_i32, %c0_i32_0 : i32, i32
  }
  func.func @transform_2(%arg0: i32) -> (i32, i32) {
    %c0_i32 = arith.constant 0 : i32
    %c0_i32_0 = arith.constant 0 : i32
    %c0_i32_1 = arith.constant 0 : i32
    return %c0_i32, %c0_i32_0 : i32, i32
  }
  func.func @transform_3(%arg0: i32) -> (i32, i32) {
    %c0_i32 = arith.constant 0 : i32
    %c0_i32_0 = arith.constant 0 : i32
    return %arg0, %c0_i32 : i32, i32
  }
}

module attributes {stable_mosaic.version = 11 : i64} {
  func.func @conv_bn_relu_pool_kernel(%arg0: i32, %arg1: memref<4x64x400xbf16, #tpu.memory_space<vmem>>, %arg2: memref<400x32xbf16, #tpu.memory_space<vmem>>, %arg3: memref<1x32xf32, #tpu.memory_space<vmem>>, %arg4: memref<64x32xbf16, #tpu.memory_space<vmem>>) attributes {dimension_semantics = [#tpu.dimension_semantics<parallel>], iteration_bounds = array<i64: 2>, scalar_prefetch = 0 : i64, scratch_operands = 0 : i64, tpu.core_type = #tpu.core_type<tc>, window_params = [{transform_indices = @transform_0, window_bounds = array<i64: 4, 64, 400>}, {pipeline_mode = #tpu.pipeline_mode<synchronous>, transform_indices = @transform_1, window_bounds = array<i64: 400, 32>}, {pipeline_mode = #tpu.pipeline_mode<synchronous>, transform_indices = @transform_2, window_bounds = array<i64: 1, 32>}, {transform_indices = @transform_3, window_bounds = array<i64: 64, 32>}]} {
    %c0 = arith.constant 0 : index
    %c0_0 = arith.constant 0 : index
    %0 = vector.load %arg2[%c0, %c0_0] : memref<400x32xbf16, #tpu.memory_space<vmem>>, vector<400x32xbf16>
    %c0_1 = arith.constant 0 : index
    %c0_2 = arith.constant 0 : index
    %1 = vector.load %arg3[%c0_1, %c0_2] : memref<1x32xf32, #tpu.memory_space<vmem>>, vector<1x32xf32>
    %c0_3 = arith.constant 0 : index
    %c0_4 = arith.constant 0 : index
    %c0_5 = arith.constant 0 : index
    %2 = vector.load %arg1[%c0_3, %c0_4, %c0_5] : memref<4x64x400xbf16, #tpu.memory_space<vmem>>, vector<1x64x400xbf16>
    %3 = vector.shape_cast %2 : vector<1x64x400xbf16> to vector<64x400xbf16>
    %cst = arith.constant dense<0.000000e+00> : vector<64x32xf32>
    %4 = tpu.matmul %3, %0, %cst {dimension_numbers = #tpu.dot_dimension_numbers<[1], [0], [0], [1], [0, 0, 1, 1], [], []>} : vector<64x400xbf16>, vector<400x32xbf16>, vector<64x32xf32> -> vector<64x32xf32>
    %5 = vector.broadcast %1 : vector<1x32xf32> to vector<64x32xf32>
    %6 = arith.addf %4, %5 : vector<64x32xf32>
    %cst_6 = arith.constant 0.000000e+00 : f32
    %7 = vector.broadcast %cst_6 : f32 to vector<64x32xf32>
    %8 = arith.maximumf %6, %7 : vector<64x32xf32>
    %c1 = arith.constant 1 : index
    %c0_7 = arith.constant 0 : index
    %c0_8 = arith.constant 0 : index
    %9 = vector.load %arg1[%c1, %c0_7, %c0_8] : memref<4x64x400xbf16, #tpu.memory_space<vmem>>, vector<1x64x400xbf16>
    %10 = vector.shape_cast %9 : vector<1x64x400xbf16> to vector<64x400xbf16>
    %cst_9 = arith.constant dense<0.000000e+00> : vector<64x32xf32>
    %11 = tpu.matmul %10, %0, %cst_9 {dimension_numbers = #tpu.dot_dimension_numbers<[1], [0], [0], [1], [0, 0, 1, 1], [], []>} : vector<64x400xbf16>, vector<400x32xbf16>, vector<64x32xf32> -> vector<64x32xf32>
    %12 = vector.broadcast %1 : vector<1x32xf32> to vector<64x32xf32>
    %13 = arith.addf %11, %12 : vector<64x32xf32>
    %cst_10 = arith.constant 0.000000e+00 : f32
    %14 = vector.broadcast %cst_10 : f32 to vector<64x32xf32>
    %15 = arith.maximumf %13, %14 : vector<64x32xf32>
    %16 = arith.maximumf %8, %15 : vector<64x32xf32>
    %c2 = arith.constant 2 : index
    %c0_11 = arith.constant 0 : index
    %c0_12 = arith.constant 0 : index
    %17 = vector.load %arg1[%c2, %c0_11, %c0_12] : memref<4x64x400xbf16, #tpu.memory_space<vmem>>, vector<1x64x400xbf16>
    %18 = vector.shape_cast %17 : vector<1x64x400xbf16> to vector<64x400xbf16>
    %cst_13 = arith.constant dense<0.000000e+00> : vector<64x32xf32>
    %19 = tpu.matmul %18, %0, %cst_13 {dimension_numbers = #tpu.dot_dimension_numbers<[1], [0], [0], [1], [0, 0, 1, 1], [], []>} : vector<64x400xbf16>, vector<400x32xbf16>, vector<64x32xf32> -> vector<64x32xf32>
    %20 = vector.broadcast %1 : vector<1x32xf32> to vector<64x32xf32>
    %21 = arith.addf %19, %20 : vector<64x32xf32>
    %cst_14 = arith.constant 0.000000e+00 : f32
    %22 = vector.broadcast %cst_14 : f32 to vector<64x32xf32>
    %23 = arith.maximumf %21, %22 : vector<64x32xf32>
    %24 = arith.maximumf %16, %23 : vector<64x32xf32>
    %c3 = arith.constant 3 : index
    %c0_15 = arith.constant 0 : index
    %c0_16 = arith.constant 0 : index
    %25 = vector.load %arg1[%c3, %c0_15, %c0_16] : memref<4x64x400xbf16, #tpu.memory_space<vmem>>, vector<1x64x400xbf16>
    %26 = vector.shape_cast %25 : vector<1x64x400xbf16> to vector<64x400xbf16>
    %cst_17 = arith.constant dense<0.000000e+00> : vector<64x32xf32>
    %27 = tpu.matmul %26, %0, %cst_17 {dimension_numbers = #tpu.dot_dimension_numbers<[1], [0], [0], [1], [0, 0, 1, 1], [], []>} : vector<64x400xbf16>, vector<400x32xbf16>, vector<64x32xf32> -> vector<64x32xf32>
    %28 = vector.broadcast %1 : vector<1x32xf32> to vector<64x32xf32>
    %29 = arith.addf %27, %28 : vector<64x32xf32>
    %cst_18 = arith.constant 0.000000e+00 : f32
    %30 = vector.broadcast %cst_18 : f32 to vector<64x32xf32>
    %31 = arith.maximumf %29, %30 : vector<64x32xf32>
    %32 = arith.maximumf %24, %31 : vector<64x32xf32>
    %33 = arith.truncf %32 : vector<64x32xf32> to vector<64x32xbf16>
    %c0_19 = arith.constant 0 : index
    %c0_20 = arith.constant 0 : index
    %34 = vector.load %arg4[%c0_19, %c0_20] : memref<64x32xbf16, #tpu.memory_space<vmem>>, vector<64x32xbf16>
    tpu.vector_store %arg4[%c0_19, %c0_20], %33 {strides = array<i32>} : memref<64x32xbf16, #tpu.memory_space<vmem>>, vector<64x32xbf16>,
    return
  }
  func.func @transform_0(%arg0: i32) -> (i32, i32, i32) {
    %c0_i32 = arith.constant 0 : i32
    %c0_i32_0 = arith.constant 0 : i32
    %c0_i32_1 = arith.constant 0 : i32
    return %c0_i32, %arg0, %c0_i32_0 : i32, i32, i32
  }
  func.func @transform_1(%arg0: i32) -> (i32, i32) {
    %c0_i32 = arith.constant 0 : i32
    %c0_i32_0 = arith.constant 0 : i32
    %c0_i32_1 = arith.constant 0 : i32
    return %c0_i32, %c0_i32_0 : i32, i32
  }
  func.func @transform_2(%arg0: i32) -> (i32, i32) {
    %c0_i32 = arith.constant 0 : i32
    %c0_i32_0 = arith.constant 0 : i32
    %c0_i32_1 = arith.constant 0 : i32
    return %c0_i32, %c0_i32_0 : i32, i32
  }
  func.func @transform_3(%arg0: i32) -> (i32, i32) {
    %c0_i32 = arith.constant 0 : i32
    %c0_i32_0 = arith.constant 0 : i32
    return %arg0, %c0_i32 : i32, i32
  }
}

module attributes {stable_mosaic.version = 11 : i64} {
  func.func @linear_kernel(%arg0: i32, %arg1: memref<16x1568xbf16, #tpu.memory_space<vmem>>, %arg2: memref<1568x10xbf16, #tpu.memory_space<vmem>>, %arg3: memref<1x10xf32, #tpu.memory_space<vmem>>, %arg4: memref<16x10xf32, #tpu.memory_space<vmem>>) attributes {dimension_semantics = [#tpu.dimension_semantics<parallel>], iteration_bounds = array<i64: 1>, scalar_prefetch = 0 : i64, scratch_operands = 0 : i64, tpu.core_type = #tpu.core_type<tc>, window_params = [{transform_indices = @transform_0, window_bounds = array<i64: 16, 1568>}, {pipeline_mode = #tpu.pipeline_mode<synchronous>, transform_indices = @transform_1, window_bounds = array<i64: 1568, 10>}, {pipeline_mode = #tpu.pipeline_mode<synchronous>, transform_indices = @transform_2, window_bounds = array<i64: 1, 10>}, {transform_indices = @transform_3, window_bounds = array<i64: 16, 10>}]} {
    %c0 = arith.constant 0 : index
    %c0_0 = arith.constant 0 : index
    %0 = vector.load %arg1[%c0, %c0_0] : memref<16x1568xbf16, #tpu.memory_space<vmem>>, vector<16x1568xbf16>
    %c0_1 = arith.constant 0 : index
    %c0_2 = arith.constant 0 : index
    %1 = vector.load %arg2[%c0_1, %c0_2] : memref<1568x10xbf16, #tpu.memory_space<vmem>>, vector<1568x10xbf16>
    %cst = arith.constant dense<0.000000e+00> : vector<16x10xf32>
    %2 = tpu.matmul %0, %1, %cst {dimension_numbers = #tpu.dot_dimension_numbers<[1], [0], [0], [1], [0, 0, 1, 1], [], []>} : vector<16x1568xbf16>, vector<1568x10xbf16>, vector<16x10xf32> -> vector<16x10xf32>
    %c0_3 = arith.constant 0 : index
    %c0_4 = arith.constant 0 : index
    %3 = vector.load %arg3[%c0_3, %c0_4] : memref<1x10xf32, #tpu.memory_space<vmem>>, vector<1x10xf32>
    %4 = vector.broadcast %3 : vector<1x10xf32> to vector<16x10xf32>
    %5 = arith.addf %2, %4 : vector<16x10xf32>
    %c0_5 = arith.constant 0 : index
    %c0_6 = arith.constant 0 : index
    %6 = vector.load %arg4[%c0_5, %c0_6] : memref<16x10xf32, #tpu.memory_space<vmem>>, vector<16x10xf32>
    tpu.vector_store %arg4[%c0_5, %c0_6], %5 {strides = array<i32>} : memref<16x10xf32, #tpu.memory_space<vmem>>, vector<16x10xf32>,
    return
  }
  func.func @transform_0(%arg0: i32) -> (i32, i32) {
    %c0_i32 = arith.constant 0 : i32
    %c0_i32_0 = arith.constant 0 : i32
    return %arg0, %c0_i32 : i32, i32
  }
  func.func @transform_1(%arg0: i32) -> (i32, i32) {
    %c0_i32 = arith.constant 0 : i32
    %c0_i32_0 = arith.constant 0 : i32
    %c0_i32_1 = arith.constant 0 : i32
    return %c0_i32, %c0_i32_0 : i32, i32
  }
  func.func @transform_2(%arg0: i32) -> (i32, i32) {
    %c0_i32 = arith.constant 0 : i32
    %c0_i32_0 = arith.constant 0 : i32
    %c0_i32_1 = arith.constant 0 : i32
    return %c0_i32, %c0_i32_0 : i32, i32
  }
  func.func @transform_3(%arg0: i32) -> (i32, i32) {
    %c0_i32 = arith.constant 0 : i32
    %c0_i32_0 = arith.constant 0 : i32
    return %arg0, %c0_i32 : i32, i32
  }
}

</mosaic_0001>

<bundles_post_ra>
// kernel: net_forward.3
= control target key start
LH: loop header
LB: loop body
LE: loop exit
PB: predicated region body
PF: predicated region fallthrough
CT: control target
= control target key end

     0   :  { %s2766_s12 = smov 0   ;;  %s2768_s13 = smov 0   ;;  %s3388_s0 = inlined_call_operand.vmem [shape: bf16[4,416,25], index: 0, kind: input, shape index: {}]   ;;  %s3389_s1 = inlined_call_operand.vmem [shape: bf16[25,16], index: 1, kind: input, shape index: {}]   ;;  %s3390_s2 = inlined_call_operand.vmem [shape: f32[1,16], index: 2, kind: input, shape index: {}]   ;;  %s3391_s3 = inlined_call_operand.vmem [shape: bf16[416,16], index: 3, kind: output, shape index: {}]  }
   0x1   :  { %s2770_s14 = smov 0  }
   0x2 LB: > { %s2104_s15 = sadd.s32 4294967295, %s2741_s14   ;;  %s2783_s16 = sadd.s32 1, %s2741_s14   ;;  %s2741_s14 = sphi %s2770_s14, %s3394_s14   ;;  %s2737_s13 = sphi %s2768_s13, %s3393_s13   ;;  %s2733_s12 = sphi %s2766_s12, %s3392_s12  }
   0x3   : > { %s17_s17 = ssub.s32 %s2741_s14, %s2783_s16  ;;  %s20_s18 = sadd.s32 1, %s2737_s13 }
   0x4   : > { %p18_p0 = scmp.eq.s32.totalorder %s17_s17, 0  ;;  %p27_p1 = scmp.ne.s32.totalorder %s2737_s13, %s2733_s12 }
   0x5   : > { %p28_p2 = scmp.eq.s32.totalorder %s2741_s14, 0  ;;  %p2107_p4 = scmp.ge.s32.totalorder %s2741_s14, 2 }
   0x6   : > { %s2792_s19 = scalar_select %p18_p0, %s2737_s13, %s20_s18  }
   0x7   : > { %p29_p3 = por %p28_p2, %p27_p1  ;;  %127 = sbr.rel (%p2107_p4) target bundleno = 45 (0x2d), region = 24 }
   0xe   : > { %130 = sbr.rel (!%p29_p3) target bundleno = 45 (0x2d), region = 28  ;;  %s132_s20 = sand.u32 (%p29_p3), 1, %s2737_s13  }
   0xf   : > { %s2324_s21 = smul.u32 (%p29_p3), 104, %s2741_s14 }
  0x10   : > { %s2635_s22 = smul.u32 (%p29_p3), 416, %s132_s20 }
  0x11   : > { %s2800_s25 = scalar_lea.vmem (%p29_p3), %s3388_s0, %s2324_s21 }
  0x12   : > { %v153_v0 = vld [vmem:[%s2800_s25] sm:$0xff] (%p29_p3)   ;;  %v157_v1 = vld [vmem:[%s2800_s25 + $0x8] sm:$0xff] (%p29_p3)   ;;  %v161_v2 = vld [vmem:[%s2800_s25 + $0x10] sm:$0xff] (%p29_p3)   ;;  %s2805_s26 = scalar_lea.vmem (%p29_p3), [#allocation2], %s2635_s22 }
  0x13   : > { %154 = vst [vmem:[%s2805_s26] sm:$0xff] (%p29_p3), %v153_v0   ;;  %158 = vst [vmem:[%s2805_s26 + $0x8] sm:$0xff] (%p29_p3), %v157_v1   ;;  %v165_v3 = vld [vmem:[%s2800_s25 + $0x18] sm:$0xff] (%p29_p3)   ;;  %v169_v4 = vld [vmem:[%s2800_s25 + $0x20] sm:$0xff] (%p29_p3)  }
  0x14   : > { %162 = vst [vmem:[%s2805_s26 + $0x10] sm:$0xff] (%p29_p3), %v161_v2   ;;  %v173_v5 = vld [vmem:[%s2800_s25 + $0x28] sm:$0xff] (%p29_p3)   ;;  %166 = vst [vmem:[%s2805_s26 + $0x18] sm:$0xff] (%p29_p3), %v165_v3   ;;  %v177_v6 = vld [vmem:[%s2800_s25 + $0x30] sm:$0xff] (%p29_p3)  }
  0x15   : > { %170 = vst [vmem:[%s2805_s26 + $0x20] sm:$0xff] %v169_v4   ;;  %174 = vst [vmem:[%s2805_s26 + $0x28] sm:$0xff] %v173_v5   ;;  %v181_v7 = vld [vmem:[%s2800_s25 + $0x38] sm:$0xff]   ;;  %v185_v8 = vld [vmem:[%s2800_s25 + $0x40] sm:$0xff]  }
  0x16   : > { %178 = vst [vmem:[%s2805_s26 + $0x30] sm:$0xff] %v177_v6   ;;  %182 = vst [vmem:[%s2805_s26 + $0x38] sm:$0xff] %v181_v7   ;;  %v189_v9 = vld [vmem:[%s2800_s25 + $0x48] sm:$0xff]   ;;  %v193_v10 = vld [vmem:[%s2800_s25 + $0x50] sm:$0xff]  }
  0x17   : > { %186 = vst [vmem:[%s2805_s26 + $0x40] sm:$0xff] %v185_v8   ;;  %v197_v11 = vld [vmem:[%s2800_s25 + $0x58] sm:$0xff]   ;;  %190 = vst [vmem:[%s2805_s26 + $0x48] sm:$0xff] %v189_v9   ;;  %v201_v12 = vld [vmem:[%s2800_s25 + $0x60] sm:$0xff]  }
  0x18   : > { %194 = vst [vmem:[%s2805_s26 + $0x50] sm:$0xff] %v193_v10   ;;  %198 = vst [vmem:[%s2805_s26 + $0x58] sm:$0xff] %v197_v11   ;;  %v205_v13 = vld [vmem:[%s2800_s25 + $0xd0] sm:$0xff]   ;;  %v209_v14 = vld [vmem:[%s2800_s25 + $0xd8] sm:$0xff]  }
  0x19   : > { %202 = vst [vmem:[%s2805_s26 + $0x60] sm:$0xff] %v201_v12   ;;  %206 = vst [vmem:[%s2805_s26 + $0x68] sm:$0xff] %v205_v13   ;;  %v213_v15 = vld [vmem:[%s2800_s25 + $0xe0] sm:$0xff]   ;;  %v217_v16 = vld [vmem:[%s2800_s25 + $0xe8] sm:$0xff]  }
  0x1a   : > { %210 = vst [vmem:[%s2805_s26 + $0x70] sm:$0xff] %v209_v14   ;;  %v221_v17 = vld [vmem:[%s2800_s25 + $0xf0] sm:$0xff]   ;;  %214 = vst [vmem:[%s2805_s26 + $0x78] sm:$0xff] %v213_v15   ;;  %v225_v18 = vld [vmem:[%s2800_s25 + $0xf8] sm:$0xff]  }
  0x1b   : > { %218 = vst [vmem:[%s2805_s26 + $0x80] sm:$0xff] %v217_v16   ;;  %222 = vst [vmem:[%s2805_s26 + $0x88] sm:$0xff] %v221_v17   ;;  %v229_v19 = vld [vmem:[%s2800_s25 + $0x100] sm:$0xff]   ;;  %v233_v20 = vld [vmem:[%s2800_s25 + $0x108] sm:$0xff]  }
  0x1c   : > { %226 = vst [vmem:[%s2805_s26 + $0x90] sm:$0xff] %v225_v18   ;;  %230 = vst [vmem:[%s2805_s26 + $0x98] sm:$0xff] %v229_v19   ;;  %v237_v21 = vld [vmem:[%s2800_s25 + $0x110] sm:$0xff]   ;;  %v241_v22 = vld [vmem:[%s2800_s25 + $0x118] sm:$0xff]  }
  0x1d   : > { %234 = vst [vmem:[%s2805_s26 + $0xa0] sm:$0xff] %v233_v20   ;;  %v245_v23 = vld [vmem:[%s2800_s25 + $0x120] sm:$0xff]   ;;  %238 = vst [vmem:[%s2805_s26 + $0xa8] sm:$0xff] %v237_v21   ;;  %v249_v24 = vld [vmem:[%s2800_s25 + $0x128] sm:$0xff]  }
  0x1e   : > { %242 = vst [vmem:[%s2805_s26 + $0xb0] sm:$0xff] %v241_v22   ;;  %246 = vst [vmem:[%s2805_s26 + $0xb8] sm:$0xff] %v245_v23   ;;  %v253_v25 = vld [vmem:[%s2800_s25 + $0x130] sm:$0xff]   ;;  %v257_v26 = vld [vmem:[%s2800_s25 + $0x1a0] sm:$0xff]  }
  0x1f   : > { %250 = vst [vmem:[%s2805_s26 + $0xc0] sm:$0xff] %v249_v24   ;;  %254 = vst [vmem:[%s2805_s26 + $0xc8] sm:$0xff] %v253_v25   ;;  %v261_v27 = vld [vmem:[%s2800_s25 + $0x1a8] sm:$0xff]   ;;  %v265_v28 = vld [vmem:[%s2800_s25 + $0x1b0] sm:$0xff]  }
  0x20   : > { %258 = vst [vmem:[%s2805_s26 + $0xd0] sm:$0xff] %v257_v26   ;;  %v269_v29 = vld [vmem:[%s2800_s25 + $0x1b8] sm:$0xff]   ;;  %262 = vst [vmem:[%s2805_s26 + $0xd8] sm:$0xff] %v261_v27   ;;  %v273_v30 = vld [vmem:[%s2800_s25 + $0x1c0] sm:$0xff]  }
  0x21   : > { %266 = vst [vmem:[%s2805_s26 + $0xe0] sm:$0xff] %v265_v28   ;;  %270 = vst [vmem:[%s2805_s26 + $0xe8] sm:$0xff] %v269_v29   ;;  %v277_v31 = vld [vmem:[%s2800_s25 + $0x1c8] sm:$0xff]   ;;  %v281_v32 = vld [vmem:[%s2800_s25 + $0x1d0] sm:$0xff]  }
  0x22   : > { %274 = vst [vmem:[%s2805_s26 + $0xf0] sm:$0xff] %v273_v30   ;;  %278 = vst [vmem:[%s2805_s26 + $0xf8] sm:$0xff] %v277_v31   ;;  %v285_v33 = vld [vmem:[%s2800_s25 + $0x1d8] sm:$0xff]   ;;  %v289_v34 = vld [vmem:[%s2800_s25 + $0x1e0] sm:$0xff]  }
  0x23   : > { %282 = vst [vmem:[%s2805_s26 + $0x100] sm:$0xff] %v281_v32   ;;  %v293_v35 = vld [vmem:[%s2800_s25 + $0x1e8] sm:$0xff]   ;;  %286 = vst [vmem:[%s2805_s26 + $0x108] sm:$0xff] %v285_v33   ;;  %v297_v36 = vld [vmem:[%s2800_s25 + $0x1f0] sm:$0xff]  }
  0x24   : > { %290 = vst [vmem:[%s2805_s26 + $0x110] sm:$0xff] %v289_v34   ;;  %294 = vst [vmem:[%s2805_s26 + $0x118] sm:$0xff] %v293_v35   ;;  %v301_v37 = vld [vmem:[%s2800_s25 + $0x1f8] sm:$0xff]   ;;  %v305_v38 = vld [vmem:[%s2800_s25 + $0x200] sm:$0xff]  }
  0x25   : > { %298 = vst [vmem:[%s2805_s26 + $0x120] sm:$0xff] %v297_v36   ;;  %302 = vst [vmem:[%s2805_s26 + $0x128] sm:$0xff] %v301_v37   ;;  %v309_v39 = vld [vmem:[%s2800_s25 + $0x270] sm:$0xff]   ;;  %v313_v40 = vld [vmem:[%s2800_s25 + $0x278] sm:$0xff]  }
  0x26   : > { %306 = vst [vmem:[%s2805_s26 + $0x130] sm:$0xff] %v305_v38   ;;  %v317_v41 = vld [vmem:[%s2800_s25 + $0x280] sm:$0xff]   ;;  %310 = vst [vmem:[%s2805_s26 + $0x138] sm:$0xff] %v309_v39   ;;  %v321_v42 = vld [vmem:[%s2800_s25 + $0x288] sm:$0xff]  }
  0x27   : > { %314 = vst [vmem:[%s2805_s26 + $0x140] sm:$0xff] %v313_v40   ;;  %318 = vst [vmem:[%s2805_s26 + $0x148] sm:$0xff] %v317_v41   ;;  %v325_v43 = vld [vmem:[%s2800_s25 + $0x290] sm:$0xff]   ;;  %v329_v44 = vld [vmem:[%s2800_s25 + $0x298] sm:$0xff]  }
  0x28   : > { %322 = vst [vmem:[%s2805_s26 + $0x150] sm:$0xff] %v321_v42   ;;  %326 = vst [vmem:[%s2805_s26 + $0x158] sm:$0xff] %v325_v43   ;;  %v333_v45 = vld [vmem:[%s2800_s25 + $0x2a0] sm:$0xff]   ;;  %v337_v46 = vld [vmem:[%s2800_s25 + $0x2a8] sm:$0xff]  }
  0x29   : > { %330 = vst [vmem:[%s2805_s26 + $0x160] sm:$0xff] %v329_v44   ;;  %v341_v47 = vld [vmem:[%s2800_s25 + $0x2b0] sm:$0xff]   ;;  %334 = vst [vmem:[%s2805_s26 + $0x168] sm:$0xff] %v333_v45   ;;  %v345_v48 = vld [vmem:[%s2800_s25 + $0x2b8] sm:$0xff]  }
  0x2a   : > { %338 = vst [vmem:[%s2805_s26 + $0x170] sm:$0xff] %v337_v46   ;;  %342 = vst [vmem:[%s2805_s26 + $0x178] sm:$0xff] %v341_v47   ;;  %v349_v49 = vld [vmem:[%s2800_s25 + $0x2c0] sm:$0xff]   ;;  %v353_v50 = vld [vmem:[%s2800_s25 + $0x2c8] sm:$0xff]  }
  0x2b   : > { %346 = vst [vmem:[%s2805_s26 + $0x180] sm:$0xff] %v345_v48   ;;  %350 = vst [vmem:[%s2805_s26 + $0x188] sm:$0xff] %v349_v49   ;;  %v357_v51 = vld [vmem:[%s2800_s25 + $0x2d0] sm:$0xff]  }
  0x2c   : > { %354 = vst [vmem:[%s2805_s26 + $0x190] sm:$0xff] %v353_v50   ;;  %358 = vst [vmem:[%s2805_s26 + $0x198] sm:$0xff] %v357_v51  }
  0x2d PF: > { %p2109_p5 = scmp.ge.s32.totalorder %s2741_s14, 1  ;;  %p590_p6 = scmp.lt.s32.totalorder %s2741_s14, 3 }
  0x2f   : > { %p591_p7 = pnand %p2109_p5, %p590_p6 }
  0x30   : > { %v2664_v52 = vld [vmem:[%s3389_s1] sm:$0xff] (!%p591_p7)   ;;  %v2743_v53 = vmov (!%p591_p7), 0.0   ;;  %v2665_v54 = vld [vmem:[%s3389_s1 + $0x8] sm:$0x1f] (!%p591_p7)   ;;  %vm781_vm0 = vcmask (!%p591_p7), 1043456   ;;  %vm782_vm1 = vcmask (!%p591_p7), 1044480  }
  0x31   : > { %594 = sbr.rel (%p591_p7) target bundleno = 482 (0x1e2), region = 69  ;;  %2411 = vmatprep.subr.bf16.mxu0 (!%p591_p7), %v2743_v53  ;;  %2467 = vmatprep.subr.bf16.mxu1 (!%p591_p7), %v2743_v53  ;;  %s597_s4 = sand.u32 (!%p591_p7), 1, %s2733_s12   ;;  %v2744_v55 = vmov (!%p591_p7), 65535   ;;  %vm2745_vm2 = vmmov (!%p591_p7), 0   ;;  %vm741_vm3 = vcmask (!%p591_p7), 203776   ;;  %vm2015_vm4 = vcmask (!%p591_p7), 125952  }
  0x32   : > { %2412 = vmatpush3.bf16.msra.mxu0 (!%p591_p7), %v2664_v52  ;;  %2468 = vmatpush3.bf16.msra.mxu1 (!%p591_p7), %v2664_v52  ;;  %v783_v56 = vsel (!%p591_p7), %vm781_vm0, 4294967295, %v2744_v55  ;;  %s2636_s5 = smul.u32 (!%p591_p7), 416, %s597_s4  ;;  %v3138_v47 = vld [vmem:[%s3390_s2] ss:$0 sm:$0xff] (!%p591_p7) }
  0x33   : > { %2413 = vmatprep.subr.bf16.mxu0 (!%p591_p7), %v2743_v53  ;;  %2469 = vmatprep.subr.bf16.mxu1 (!%p591_p7), %v2743_v53  ;;  %v784_v57 = vsel (!%p591_p7), %vm782_vm1, %v783_v56, 0  ;;  %s621_s9 = smul.u32 (!%p591_p7), 26, %s2104_s15 }
  0x34   : > { %2415 = vmatprep.mubr.msk.bf16.mxu0 (!%p591_p7), %vm2745_vm2, %v2743_v53  ;;  %2471 = vmatprep.mubr.msk.bf16.mxu1 (!%p591_p7), %vm2745_vm2, %v2743_v53  ;;  %v786_v58 = vand.u32 (!%p591_p7), %v2665_v54, %v784_v57  ;;  %s2925_s6 = scalar_lea.vmem (!%p591_p7), [#allocation2], %s2636_s5 }
  0x35   : > { %v2666_v59 = vld [vmem:[%s2925_s6] sm:$0xff] (!%p591_p7)   ;;  %v2667_v60 = vld [vmem:[%s2925_s6 + $0x68] sm:$0xff] (!%p591_p7)   ;;  %v2669_v62 = vld [vmem:[%s2925_s6 + $0x70] sm:$0xff] (!%p591_p7)   ;;  %p622_p8 = scmp.lt.s32.totalorder (!%p591_p7), %s621_s9, 51 }
  0x36   : > { %2414 = vmatpush3.bf16.msra.mxu0 (!%p591_p7), %v786_v58  ;;  %2470 = vmatpush3.bf16.msra.mxu1 (!%p591_p7), %v786_v58  ;;  %v2668_v61 = vld [vmem:[%s2925_s6 + $0x8] sm:$0xff] (!%p591_p7)   ;;  %v2670_v63 = vld [vmem:[%s2925_s6 + $0x10] sm:$0xff] (!%p591_p7)   ;;  %v2671_v0 = vld [vmem:[%s2925_s6 + $0x78] sm:$0xff] (!%p591_p7)  }
  0x37   : > { %2523 = vmatprep.subr.bf16.mxu0 (!%p591_p7), %v2743_v53  ;;  %2579 = vmatprep.subr.bf16.mxu1 (!%p591_p7), %v2743_v53  ;;  %v2672_v1 = vld [vmem:[%s2925_s6 + $0x18] sm:$0xff] (!%p591_p7)   ;;  %v2673_v2 = vld [vmem:[%s2925_s6 + $0x80] sm:$0xff] (!%p591_p7)   ;;  %v2675_v4 = vld [vmem:[%s2925_s6 + $0x88] sm:$0xff] (!%p591_p7)  }
  0x38   : > { %v2674_v3 = vld [vmem:[%s2925_s6 + $0x20] sm:$0xff]   ;;  %v2676_v5 = vld [vmem:[%s2925_s6 + $0x28] sm:$0xff]   ;;  %v2677_v6 = vld [vmem:[%s2925_s6 + $0x90] sm:$0xff]   ;;  %s3396_s9 = smov (!%p622_p8, %s621_s9), 51 }
  0x39   : > { %2416 = vmatmul.mubr.msk.bf16.vlgmr.msra.gmra.mrb[0].mxu0 %vm741_vm3, %v2666_v59  ;;  %2472 = vmatmul.mubr.msk.bf16.vlgmr.msra.gmra.mrb[0].mxu1 %vm741_vm3, %v2667_v60  ;;  %v2678_v7 = vld [vmem:[%s2925_s6 + $0x30] sm:$0xff]   ;;  %v2679_v8 = vld [vmem:[%s2925_s6 + $0x98] sm:$0xff]   ;;  %v2681_v10 = vld [vmem:[%s2925_s6 + $0xa0] sm:$0xff]   ;;  %s2110_s10 = sshll.u32 %s3396_s9, 2 }
  0x3a   : > { %2524 = vmatpush3.bf16.msra.mxu0 %v2664_v52  ;;  %2580 = vmatpush3.bf16.msra.mxu1 %v2664_v52  ;;  %v2680_v9 = vld [vmem:[%s2925_s6 + $0x38] sm:$0xff]   ;;  %v2682_v11 = vld [vmem:[%s2925_s6 + $0x40] sm:$0xff]   ;;  %v2683_v12 = vld [vmem:[%s2925_s6 + $0xa8] sm:$0xff]   ;;  %s3255_s14 = scalar_lea.vmem %s3391_s3, %s2110_s10 }
  0x3b   : > { %2419 = vmatprep.mubr.msk.bf16.mxu0 %vm2745_vm2, %v2743_v53  ;;  %2475 = vmatprep.mubr.msk.bf16.mxu1 %vm2745_vm2, %v2743_v53  ;;  %v2684_v13 = vld [vmem:[%s2925_s6 + $0x48] sm:$0xff]   ;;  %v2685_v14 = vld [vmem:[%s2925_s6 + $0xb0] sm:$0xff]   ;;  %v2687_v16 = vld [vmem:[%s2925_s6 + $0xb8] sm:$0xff]  }
  0x3c   : > { %2525 = vmatprep.subr.bf16.mxu0 %v2743_v53  ;;  %2581 = vmatprep.subr.bf16.mxu1 %v2743_v53  ;;  %v2686_v15 = vld [vmem:[%s2925_s6 + $0x50] sm:$0xff]   ;;  %v2688_v17 = vld [vmem:[%s2925_s6 + $0x58] sm:$0xff]   ;;  %v2689_v18 = vld [vmem:[%s2925_s6 + $0xc0] sm:$0xff]  }
  0x3d   : > { %v2690_v19 = vld [vmem:[%s2925_s6 + $0x60] sm:$0xff]   ;;  %v2691_v20 = vld [vmem:[%s2925_s6 + $0xc8] sm:$0xff]   ;;  %v2692_v21 = vld [vmem:[%s2925_s6 + $0xd0] sm:$0xff]  }
  0x3e   : > { %2526 = vmatpush3.bf16.msra.mxu0 %v786_v58  ;;  %2582 = vmatpush3.bf16.msra.mxu1 %v786_v58  ;;  %v2693_v22 = vld [vmem:[%s2925_s6 + $0x138] sm:$0xff]   ;;  %v2695_v24 = vld [vmem:[%s2925_s6 + $0x140] sm:$0xff]   ;;  %v2697_v26 = vld [vmem:[%s2925_s6 + $0x148] sm:$0xff]  }
  0x3f   : > { %v2694_v23 = vld [vmem:[%s2925_s6 + $0xd8] sm:$0xff]   ;;  %v2696_v25 = vld [vmem:[%s2925_s6 + $0xe0] sm:$0xff]   ;;  %v2698_v27 = vld [vmem:[%s2925_s6 + $0xe8] sm:$0xff]  }
  0x40   : > { %v2699_v28 = vld [vmem:[%s2925_s6 + $0x150] sm:$0xff]   ;;  %v2701_v30 = vld [vmem:[%s2925_s6 + $0x158] sm:$0xff]   ;;  %v2703_v32 = vld [vmem:[%s2925_s6 + $0x160] sm:$0xff]  }
  0x41   : > { %2420 = vmatmul.mubr.msk.bf16.gmra.mrb[4].mxu0 %vm741_vm3, %v2668_v61  ;;  %2476 = vmatmul.mubr.msk.bf16.gmra.mrb[4].mxu1 %vm741_vm3, %v2669_v62  ;;  %v2700_v29 = vld [vmem:[%s2925_s6 + $0xf0] sm:$0xff]   ;;  %v2702_v31 = vld [vmem:[%s2925_s6 + $0xf8] sm:$0xff]   ;;  %v2704_v33 = vld [vmem:[%s2925_s6 + $0x100] sm:$0xff]  }
  0x42   : > { %2423 = vmatprep.mubr.msk.bf16.mxu0 %vm2745_vm2, %v2743_v53  ;;  %2479 = vmatprep.mubr.msk.bf16.mxu1 %vm2745_vm2, %v2743_v53  ;;  %v2705_v34 = vld [vmem:[%s2925_s6 + $0x168] sm:$0xff]   ;;  %v2707_v36 = vld [vmem:[%s2925_s6 + $0x170] sm:$0xff]   ;;  %v2709_v38 = vld [vmem:[%s2925_s6 + $0x178] sm:$0xff]  }
  0x43   : > { %v2706_v35 = vld [vmem:[%s2925_s6 + $0x108] sm:$0xff]   ;;  %v2708_v37 = vld [vmem:[%s2925_s6 + $0x110] sm:$0xff]   ;;  %v2710_v39 = vld [vmem:[%s2925_s6 + $0x118] sm:$0xff]  }
  0x44   : > { %v2711_v40 = vld [vmem:[%s2925_s6 + $0x180] sm:$0xff]   ;;  %v2713_v42 = vld [vmem:[%s2925_s6 + $0x188] sm:$0xff]   ;;  %v2715_v44 = vld [vmem:[%s2925_s6 + $0x190] sm:$0xff]  }
  0x45   : > { %v2712_v41 = vld [vmem:[%s2925_s6 + $0x120] sm:$0xff]   ;;  %v2714_v43 = vld [vmem:[%s2925_s6 + $0x128] sm:$0xff]   ;;  %v2716_v45 = vld [vmem:[%s2925_s6 + $0x130] sm:$0xff]  }
  0x46   : > { %v2717_v46 = vld [vmem:[%s2925_s6 + $0x198] sm:$0xff]  }
  0x49   : > { %2424 = vmatmul.mubr.msk.bf16.gmra.mrb[8].mxu0 %vm741_vm3, %v2670_v63  ;;  %2480 = vmatmul.mubr.msk.bf16.gmra.mrb[8].mxu1 %vm741_vm3, %v2671_v0 }
  0x4a   : > { %2427 = vmatprep.mubr.msk.bf16.mxu0 %vm2745_vm2, %v2743_v53  ;;  %2483 = vmatprep.mubr.msk.bf16.mxu1 %vm2745_vm2, %v2743_v53 }
  0x51   : > { %2428 = vmatmul.mubr.msk.bf16.gmra.mrb[12].mxu0 %vm741_vm3, %v2672_v1  ;;  %2484 = vmatmul.mubr.msk.bf16.gmra.mrb[12].mxu1 %vm741_vm3, %v2673_v2 }
  0x52   : > { %2431 = vmatprep.mubr.msk.bf16.mxu0 %vm2745_vm2, %v2743_v53  ;;  %2487 = vmatprep.mubr.msk.bf16.mxu1 %vm2745_vm2, %v2743_v53 }
  0x59   : > { %2432 = vmatmul.mubr.msk.bf16.gmra.mrb[16].mxu0 %vm741_vm3, %v2674_v3  ;;  %2488 = vmatmul.mubr.msk.bf16.gmra.mrb[16].mxu1 %vm741_vm3, %v2675_v4 }
  0x5a   : > { %2435 = vmatprep.mubr.msk.bf16.mxu0 %vm2745_vm2, %v2743_v53  ;;  %2491 = vmatprep.mubr.msk.bf16.mxu1 %vm2745_vm2, %v2743_v53 }
  0x61   : > { %2436 = vmatmul.mubr.msk.bf16.gmra.mrb[20].mxu0 %vm741_vm3, %v2676_v5  ;;  %2492 = vmatmul.mubr.msk.bf16.gmra.mrb[20].mxu1 %vm741_vm3, %v2677_v6 }
  0x62   : > { %2439 = vmatprep.mubr.msk.bf16.mxu0 %vm2745_vm2, %v2743_v53  ;;  %2495 = vmatprep.mubr.msk.bf16.mxu1 %vm2745_vm2, %v2743_v53 }
  0x69   : > { %2440 = vmatmul.mubr.msk.bf16.gmra.mrb[24].mxu0 %vm741_vm3, %v2678_v7  ;;  %2496 = vmatmul.mubr.msk.bf16.gmra.mrb[24].mxu1 %vm741_vm3, %v2679_v8 }
  0x6a   : > { %2443 = vmatprep.mubr.msk.bf16.mxu0 %vm2745_vm2, %v2743_v53  ;;  %2499 = vmatprep.mubr.msk.bf16.mxu1 %vm2745_vm2, %v2743_v53 }
  0x71   : > { %2444 = vmatmul.mubr.msk.bf16.gmra.mrb[28].mxu0 %vm741_vm3, %v2680_v9  ;;  %2500 = vmatmul.mubr.msk.bf16.gmra.mrb[28].mxu1 %vm741_vm3, %v2681_v10 }
  0x72   : > { %2447 = vmatprep.mubr.msk.bf16.mxu0 %vm2745_vm2, %v2743_v53  ;;  %2503 = vmatprep.mubr.msk.bf16.mxu1 %vm2745_vm2, %v2743_v53 }
  0x79   : > { %2448 = vmatmul.mubr.msk.bf16.gmra.mrb[32].mxu0 %vm741_vm3, %v2682_v11  ;;  %2504 = vmatmul.mubr.msk.bf16.gmra.mrb[32].mxu1 %vm741_vm3, %v2683_v12 }
  0x7a   : > { %2451 = vmatprep.mubr.msk.bf16.mxu0 %vm2745_vm2, %v2743_v53  ;;  %2507 = vmatprep.mubr.msk.bf16.mxu1 %vm2745_vm2, %v2743_v53 }
  0x81   : > { %2452 = vmatmul.mubr.msk.bf16.gmra.mrb[36].mxu0 %vm741_vm3, %v2684_v13  ;;  %2508 = vmatmul.mubr.msk.bf16.gmra.mrb[36].mxu1 %vm741_vm3, %v2685_v14 }
  0x82   : > { %2455 = vmatprep.mubr.msk.bf16.mxu0 %vm2745_vm2, %v2743_v53  ;;  %2511 = vmatprep.mubr.msk.bf16.mxu1 %vm2745_vm2, %v2743_v53 }
  0x89   : > { %2456 = vmatmul.mubr.msk.bf16.gmra.mrb[40].mxu0 %vm741_vm3, %v2686_v15  ;;  %2512 = vmatmul.mubr.msk.bf16.gmra.mrb[40].mxu1 %vm741_vm3, %v2687_v16 }
  0x8a   : > { %2459 = vmatprep.mubr.msk.bf16.mxu0 %vm2745_vm2, %v2743_v53  ;;  %2515 = vmatprep.mubr.msk.bf16.mxu1 %vm2745_vm2, %v2743_v53 }
  0x91   : > { %2460 = vmatmul.mubr.msk.bf16.gmra.mrb[44].mxu0 %vm741_vm3, %v2688_v17  ;;  %2516 = vmatmul.mubr.msk.bf16.gmra.mrb[44].mxu1 %vm741_vm3, %v2689_v18 }
  0x92   : > { %2463 = vmatprep.mubr.msk.bf16.mxu0 %vm2745_vm2, %v2743_v53  ;;  %2519 = vmatprep.mubr.msk.bf16.mxu1 %vm2745_vm2, %v2743_v53 }
  0x99   : > { %2464 = vmatmul.mubr.msk.bf16.gmra.mrb[48].mxu0 %vm741_vm3, %v2690_v19  ;;  %2520 = vmatmul.mubr.msk.bf16.gmra.mrb[48].mxu1 %vm741_vm3, %v2691_v20 }
  0x9a   : > { %2527 = vmatprep.mubr.msk.bf16.mxu0 %vm2745_vm2, %v2743_v53  ;;  %2583 = vmatprep.mubr.msk.bf16.mxu1 %vm2745_vm2, %v2743_v53 }
  0xa1   : > { %2528 = vmatmul.mubr.msk.bf16.vlgmr.msra.gmra.mrb[52].mxu0 %vm741_vm3, %v2692_v21  ;;  %2584 = vmatmul.mubr.msk.bf16.vlgmr.msra.gmra.mrb[52].mxu1 %vm741_vm3, %v2693_v22 }
  0xa2   : > { %2531 = vmatprep.mubr.msk.bf16.mxu0 %vm2745_vm2, %v2743_v53  ;;  %2587 = vmatprep.mubr.msk.bf16.mxu1 %vm2745_vm2, %v2743_v53 }
  0xa9   : > { %2532 = vmatmul.mubr.msk.bf16.gmra.mrb[56].mxu0 %vm741_vm3, %v2694_v23  ;;  %2588 = vmatmul.mubr.msk.bf16.gmra.mrb[56].mxu1 %vm741_vm3, %v2695_v24 }
  0xaa   : > { %2535 = vmatprep.mubr.msk.bf16.mxu0 %vm2745_vm2, %v2743_v53  ;;  %2591 = vmatprep.mubr.msk.bf16.mxu1 %vm2745_vm2, %v2743_v53 }
  0xb1   : > { %2536 = vmatmul.mubr.msk.bf16.gmra.mrb[60].mxu0 %vm741_vm3, %v2696_v25  ;;  %2592 = vmatmul.mubr.msk.bf16.gmra.mrb[60].mxu1 %vm741_vm3, %v2697_v26 }
  0xb2   : > { %2539 = vmatprep.mubr.msk.bf16.mxu0 %vm2745_vm2, %v2743_v53  ;;  %2595 = vmatprep.mubr.msk.bf16.mxu1 %vm2745_vm2, %v2743_v53 }
  0xb9   : > { %2540 = vmatmul.mubr.msk.bf16.gmra.mrb[64].mxu0 %vm741_vm3, %v2698_v27  ;;  %2596 = vmatmul.mubr.msk.bf16.gmra.mrb[64].mxu1 %vm741_vm3, %v2699_v28 }
  0xba   : > { %2543 = vmatprep.mubr.msk.bf16.mxu0 %vm2745_vm2, %v2743_v53  ;;  %2599 = vmatprep.mubr.msk.bf16.mxu1 %vm2745_vm2, %v2743_v53 }
  0xc1   : > { %2544 = vmatmul.mubr.msk.bf16.gmra.mrb[68].mxu0 %vm741_vm3, %v2700_v29  ;;  %2600 = vmatmul.mubr.msk.bf16.gmra.mrb[68].mxu1 %vm741_vm3, %v2701_v30 }
  0xc2   : > { %2547 = vmatprep.mubr.msk.bf16.mxu0 %vm2745_vm2, %v2743_v53  ;;  %2603 = vmatprep.mubr.msk.bf16.mxu1 %vm2745_vm2, %v2743_v53 }
  0xc9   : > { %2548 = vmatmul.mubr.msk.bf16.gmra.mrb[72].mxu0 %vm741_vm3, %v2702_v31  ;;  %2604 = vmatmul.mubr.msk.bf16.gmra.mrb[72].mxu1 %vm741_vm3, %v2703_v32 }
  0xca   : > { %2551 = vmatprep.mubr.msk.bf16.mxu0 %vm2745_vm2, %v2743_v53  ;;  %2607 = vmatprep.mubr.msk.bf16.mxu1 %vm2745_vm2, %v2743_v53 }
  0xd1   : > { %2552 = vmatmul.mubr.msk.bf16.gmra.mrb[76].mxu0 %vm741_vm3, %v2704_v33  ;;  %2608 = vmatmul.mubr.msk.bf16.gmra.mrb[76].mxu1 %vm741_vm3, %v2705_v34 }
  0xd2   : > { %2555 = vmatprep.mubr.msk.bf16.mxu0 %vm2745_vm2, %v2743_v53  ;;  %2611 = vmatprep.mubr.msk.bf16.mxu1 %vm2745_vm2, %v2743_v53 }
  0xd9   : > { %2556 = vmatmul.mubr.msk.bf16.gmra.mrb[80].mxu0 %vm741_vm3, %v2706_v35  ;;  %2612 = vmatmul.mubr.msk.bf16.gmra.mrb[80].mxu1 %vm741_vm3, %v2707_v36 }
  0xda   : > { %2559 = vmatprep.mubr.msk.bf16.mxu0 %vm2745_vm2, %v2743_v53  ;;  %2615 = vmatprep.mubr.msk.bf16.mxu1 %vm2745_vm2, %v2743_v53 }
  0xe1   : > { %2560 = vmatmul.mubr.msk.bf16.gmra.mrb[84].mxu0 %vm741_vm3, %v2708_v37  ;;  %2616 = vmatmul.mubr.msk.bf16.gmra.mrb[84].mxu1 %vm741_vm3, %v2709_v38 }
  0xe2   : > { %2563 = vmatprep.mubr.msk.bf16.mxu0 %vm2745_vm2, %v2743_v53  ;;  %2619 = vmatprep.mubr.msk.bf16.mxu1 %vm2745_vm2, %v2743_v53 }
  0xe9   : > { %2564 = vmatmul.mubr.msk.bf16.gmra.mrb[88].mxu0 %vm741_vm3, %v2710_v39  ;;  %2620 = vmatmul.mubr.msk.bf16.gmra.mrb[88].mxu1 %vm741_vm3, %v2711_v40 }
  0xea   : > { %2567 = vmatprep.mubr.msk.bf16.mxu0 %vm2745_vm2, %v2743_v53  ;;  %2623 = vmatprep.mubr.msk.bf16.mxu1 %vm2745_vm2, %v2743_v53 }
  0xf1   : > { %2568 = vmatmul.mubr.msk.bf16.gmra.mrb[92].mxu0 %vm741_vm3, %v2712_v41  ;;  %2624 = vmatmul.mubr.msk.bf16.gmra.mrb[92].mxu1 %vm741_vm3, %v2713_v42 }
  0xf2   : > { %2571 = vmatprep.mubr.msk.bf16.mxu0 %vm2745_vm2, %v2743_v53  ;;  %2627 = vmatprep.mubr.msk.bf16.mxu1 %vm2745_vm2, %v2743_v53 }
  0xf9   : > { %2572 = vmatmul.mubr.msk.bf16.gmra.mrb[96].mxu0 %vm741_vm3, %v2714_v43  ;;  %2628 = vmatmul.mubr.msk.bf16.gmra.mrb[96].mxu1 %vm741_vm3, %v2715_v44 }
  0xfa   : > { %2575 = vmatprep.mubr.msk.bf16.mxu0 %vm2745_vm2, %v2743_v53  ;;  %2631 = vmatprep.mubr.msk.bf16.mxu1 %vm2745_vm2, %v2743_v53 }
 0x101   : > { %2576 = vmatmul.mubr.msk.bf16.gmra.mrb[100].mxu0 %vm741_vm3, %v2716_v45  ;;  %2632 = vmatmul.mubr.msk.bf16.gmra.mrb[100].mxu1 %vm741_vm3, %v2717_v46 }
 0x10c   : > { %v822_v48 = vpop.f32.mrb[0].mxu0  ;;  %v1116_v49 = vpop.f32.mrb[0].mxu1 }
 0x10d   : > { %v823_v50 = vadd.f32 %v3138_v47, %v822_v48  ;;  %v1117_v51 = vadd.f32 %v3138_v47, %v1116_v49  ;;  %v2417_v52 = vpop.f32.mrb[1].mxu0  ;;  %v2473_v54 = vpop.f32.mrb[1].mxu1 }
 0x10e   : > { %v825_v53 = vpop.f32.mrb[2].mxu0  ;;  %v1119_v55 = vpop.f32.mrb[2].mxu1 }
 0x10f   : > { %v925_v56 = vmax.f32 %v823_v50, 0.0  ;;  %v1219_v57 = vmax.f32 %v1117_v51, 0.0  ;;  %v826_v58 = vadd.f32 %v3138_v47, %v825_v53  ;;  %v1120_v59 = vadd.f32 %v3138_v47, %v1119_v55  ;;  %v2418_v60 = vpop.f32.mrb[3].mxu0  ;;  %v2474_v61 = vpop.f32.mrb[3].mxu1 }
 0x111   : > { %v3144_v62 = vmax.f32 %v925_v56, %v1219_v57  ;;  %v926_v63 = vmax.f32 %v826_v58, 0.0  ;;  %v1220_v0 = vmax.f32 %v1120_v59, 0.0 }
 0x113   : > { %v3146_v1 = vmax.f32 %v926_v63, %v1220_v0 }
 0x114   : > { %v830_v2 = vpop.f32.mrb[4].mxu0  ;;  %v1124_v3 = vpop.f32.mrb[4].mxu1 }
 0x115   : > { %v831_v4 = vadd.f32 %v3138_v47, %v830_v2  ;;  %v1125_v5 = vadd.f32 %v3138_v47, %v1124_v3  ;;  %v2421_v6 = vpop.f32.mrb[5].mxu0  ;;  %v2477_v7 = vpop.f32.mrb[5].mxu1 }
 0x116   : > { %v833_v8 = vpop.f32.mrb[6].mxu0  ;;  %v1127_v9 = vpop.f32.mrb[6].mxu1 }
 0x117   : > { %v927_v10 = vmax.f32 %v831_v4, 0.0  ;;  %v1221_v11 = vmax.f32 %v1125_v5, 0.0  ;;  %v834_v12 = vadd.f32 %v3138_v47, %v833_v8  ;;  %v1128_v13 = vadd.f32 %v3138_v47, %v1127_v9  ;;  %v2422_v14 = vpop.f32.mrb[7].mxu0  ;;  %v2478_v15 = vpop.f32.mrb[7].mxu1 }
 0x119   : > { %v3152_v16 = vmax.f32 %v927_v10, %v1221_v11  ;;  %v928_v17 = vmax.f32 %v834_v12, 0.0  ;;  %v1222_v18 = vmax.f32 %v1128_v13, 0.0 }
 0x11b   : > { %v3154_v19 = vmax.f32 %v928_v17, %v1222_v18 }
 0x11c   : > { %v838_v20 = vpop.f32.mrb[8].mxu0  ;;  %v1132_v21 = vpop.f32.mrb[8].mxu1 }
 0x11d   : > { %v839_v22 = vadd.f32 %v3138_v47, %v838_v20  ;;  %v1133_v23 = vadd.f32 %v3138_v47, %v1132_v21  ;;  %v2425_v24 = vpop.f32.mrb[9].mxu0  ;;  %v2481_v25 = vpop.f32.mrb[9].mxu1 }
 0x11e   : > { %v841_v26 = vpop.f32.mrb[10].mxu0  ;;  %v1135_v27 = vpop.f32.mrb[10].mxu1 }
 0x11f   : > { %v929_v28 = vmax.f32 %v839_v22, 0.0  ;;  %v1223_v29 = vmax.f32 %v1133_v23, 0.0  ;;  %v842_v30 = vadd.f32 %v3138_v47, %v841_v26  ;;  %v1136_v31 = vadd.f32 %v3138_v47, %v1135_v27  ;;  %v2426_v32 = vpop.f32.mrb[11].mxu0  ;;  %v2482_v33 = vpop.f32.mrb[11].mxu1 }
 0x121   : > { %v3160_v34 = vmax.f32 %v929_v28, %v1223_v29  ;;  %v930_v35 = vmax.f32 %v842_v30, 0.0  ;;  %v1224_v36 = vmax.f32 %v1136_v31, 0.0 }
 0x123   : > { %v3162_v37 = vmax.f32 %v930_v35, %v1224_v36 }
 0x124   : > { %v846_v38 = vpop.f32.mrb[12].mxu0  ;;  %v1140_v39 = vpop.f32.mrb[12].mxu1 }
 0x125   : > { %v847_v40 = vadd.f32 %v3138_v47, %v846_v38  ;;  %v1141_v41 = vadd.f32 %v3138_v47, %v1140_v39  ;;  %v2429_v42 = vpop.f32.mrb[13].mxu0  ;;  %v2485_v43 = vpop.f32.mrb[13].mxu1 }
 0x126   : > { %v849_v44 = vpop.f32.mrb[14].mxu0  ;;  %v1143_v45 = vpop.f32.mrb[14].mxu1 }
 0x127   : > { %v931_v46 = vmax.f32 %v847_v40, 0.0  ;;  %v1225_v48 = vmax.f32 %v1141_v41, 0.0  ;;  %v850_v49 = vadd.f32 %v3138_v47, %v849_v44  ;;  %v1144_v50 = vadd.f32 %v3138_v47, %v1143_v45  ;;  %v2430_v51 = vpop.f32.mrb[15].mxu0  ;;  %v2486_v52 = vpop.f32.mrb[15].mxu1 }
 0x129   : > { %v3168_v54 = vmax.f32 %v931_v46, %v1225_v48  ;;  %v932_v53 = vmax.f32 %v850_v49, 0.0  ;;  %v1226_v55 = vmax.f32 %v1144_v50, 0.0 }
 0x12b   : > { %v3170_v56 = vmax.f32 %v932_v53, %v1226_v55 }
 0x12c   : > { %v854_v57 = vpop.f32.mrb[16].mxu0  ;;  %v1148_v58 = vpop.f32.mrb[16].mxu1 }
 0x12d   : > { %v855_v59 = vadd.f32 %v3138_v47, %v854_v57  ;;  %v1149_v60 = vadd.f32 %v3138_v47, %v1148_v58  ;;  %v2433_v61 = vpop.f32.mrb[17].mxu0  ;;  %v2489_v63 = vpop.f32.mrb[17].mxu1 }
 0x12e   : > { %v857_v0 = vpop.f32.mrb[18].mxu0  ;;  %v1151_v2 = vpop.f32.mrb[18].mxu1 }
 0x12f   : > { %v933_v3 = vmax.f32 %v855_v59, 0.0  ;;  %v1227_v4 = vmax.f32 %v1149_v60, 0.0  ;;  %v858_v5 = vadd.f32 %v3138_v47, %v857_v0  ;;  %v1152_v6 = vadd.f32 %v3138_v47, %v1151_v2  ;;  %v2434_v7 = vpop.f32.mrb[19].mxu0  ;;  %v2490_v8 = vpop.f32.mrb[19].mxu1 }
 0x131   : > { %v3176_v9 = vmax.f32 %v933_v3, %v1227_v4  ;;  %v934_v10 = vmax.f32 %v858_v5, 0.0  ;;  %v1228_v11 = vmax.f32 %v1152_v6, 0.0 }
 0x133   : > { %v3178_v12 = vmax.f32 %v934_v10, %v1228_v11 }
 0x134   : > { %v862_v13 = vpop.f32.mrb[20].mxu0  ;;  %v1156_v14 = vpop.f32.mrb[20].mxu1 }
 0x135   : > { %v863_v15 = vadd.f32 %v3138_v47, %v862_v13  ;;  %v1157_v17 = vadd.f32 %v3138_v47, %v1156_v14  ;;  %v2437_v18 = vpop.f32.mrb[21].mxu0  ;;  %v2493_v20 = vpop.f32.mrb[21].mxu1 }
 0x136   : > { %v865_v21 = vpop.f32.mrb[22].mxu0  ;;  %v1159_v22 = vpop.f32.mrb[22].mxu1 }
 0x137   : > { %v935_v23 = vmax.f32 %v863_v15, 0.0  ;;  %v1229_v24 = vmax.f32 %v1157_v17, 0.0  ;;  %v866_v25 = vadd.f32 %v3138_v47, %v865_v21  ;;  %v1160_v26 = vadd.f32 %v3138_v47, %v1159_v22  ;;  %v2438_v27 = vpop.f32.mrb[23].mxu0  ;;  %v2494_v28 = vpop.f32.mrb[23].mxu1 }
 0x139   : > { %v3184_v29 = vmax.f32 %v935_v23, %v1229_v24  ;;  %v936_v30 = vmax.f32 %v866_v25, 0.0  ;;  %v1230_v31 = vmax.f32 %v1160_v26, 0.0 }
 0x13b   : > { %v3186_v32 = vmax.f32 %v936_v30, %v1230_v31 }
 0x13c   : > { %v870_v33 = vpop.f32.mrb[24].mxu0  ;;  %v1164_v35 = vpop.f32.mrb[24].mxu1 }
 0x13d   : > { %v871_v36 = vadd.f32 %v3138_v47, %v870_v33  ;;  %v1165_v38 = vadd.f32 %v3138_v47, %v1164_v35  ;;  %v2441_v39 = vpop.f32.mrb[25].mxu0  ;;  %v2497_v40 = vpop.f32.mrb[25].mxu1 }
 0x13e   : > { %v873_v41 = vpop.f32.mrb[26].mxu0  ;;  %v1167_v42 = vpop.f32.mrb[26].mxu1 }
 0x13f   : > { %v937_v43 = vmax.f32 %v871_v36, 0.0  ;;  %v1231_v44 = vmax.f32 %v1165_v38, 0.0  ;;  %v874_v45 = vadd.f32 %v3138_v47, %v873_v41  ;;  %v1168_v46 = vadd.f32 %v3138_v47, %v1167_v42  ;;  %v2442_v48 = vpop.f32.mrb[27].mxu0  ;;  %v2498_v49 = vpop.f32.mrb[27].mxu1 }
 0x141   : > { %v3192_v50 = vmax.f32 %v937_v43, %v1231_v44  ;;  %v938_v51 = vmax.f32 %v874_v45, 0.0  ;;  %v1232_v52 = vmax.f32 %v1168_v46, 0.0 }
 0x143   : > { %v3194_v53 = vmax.f32 %v938_v51, %v1232_v52 }
 0x144   : > { %v878_v55 = vpop.f32.mrb[28].mxu0  ;;  %v1172_v57 = vpop.f32.mrb[28].mxu1 }
 0x145   : > { %v879_v58 = vadd.f32 %v3138_v47, %v878_v55  ;;  %v1173_v59 = vadd.f32 %v3138_v47, %v1172_v57  ;;  %v2445_v60 = vpop.f32.mrb[29].mxu0  ;;  %v2501_v61 = vpop.f32.mrb[29].mxu1 }
 0x146   : > { %v881_v63 = vpop.f32.mrb[30].mxu0  ;;  %v1175_v0 = vpop.f32.mrb[30].mxu1 }
 0x147   : > { %v939_v2 = vmax.f32 %v879_v58, 0.0  ;;  %v1233_v3 = vmax.f32 %v1173_v59, 0.0  ;;  %v882_v4 = vadd.f32 %v3138_v47, %v881_v63  ;;  %v1176_v5 = vadd.f32 %v3138_v47, %v1175_v0  ;;  %v2446_v6 = vpop.f32.mrb[31].mxu0  ;;  %v2502_v7 = vpop.f32.mrb[31].mxu1 }
 0x149   : > { %v3200_v8 = vmax.f32 %v939_v2, %v1233_v3  ;;  %v940_v10 = vmax.f32 %v882_v4, 0.0  ;;  %v1234_v11 = vmax.f32 %v1176_v5, 0.0 }
 0x14b   : > { %v3202_v13 = vmax.f32 %v940_v10, %v1234_v11 }
 0x14c   : > { %v886_v14 = vpop.f32.mrb[32].mxu0  ;;  %v1180_v15 = vpop.f32.mrb[32].mxu1 }
 0x14d   : > { %v887_v17 = vadd.f32 %v3138_v47, %v886_v14  ;;  %v1181_v18 = vadd.f32 %v3138_v47, %v1180_v15  ;;  %v2449_v20 = vpop.f32.mrb[33].mxu0  ;;  %v2505_v21 = vpop.f32.mrb[33].mxu1 }
 0x14e   : > { %v889_v22 = vpop.f32.mrb[34].mxu0  ;;  %v1183_v23 = vpop.f32.mrb[34].mxu1 }
 0x14f   : > { %v941_v24 = vmax.f32 %v887_v17, 0.0  ;;  %v1235_v25 = vmax.f32 %v1181_v18, 0.0  ;;  %v890_v26 = vadd.f32 %v3138_v47, %v889_v22  ;;  %v1184_v27 = vadd.f32 %v3138_v47, %v1183_v23  ;;  %v2450_v28 = vpop.f32.mrb[35].mxu0  ;;  %v2506_v30 = vpop.f32.mrb[35].mxu1 }
 0x151   : > { %v3208_v31 = vmax.f32 %v941_v24, %v1235_v25  ;;  %v942_v33 = vmax.f32 %v890_v26, 0.0  ;;  %v1236_v35 = vmax.f32 %v1184_v27, 0.0 }
 0x153   : > { %v3210_v36 = vmax.f32 %v942_v33, %v1236_v35 }
 0x154   : > { %v894_v38 = vpop.f32.mrb[36].mxu0  ;;  %v1188_v39 = vpop.f32.mrb[36].mxu1 }
 0x155   : > { %v895_v40 = vadd.f32 %v3138_v47, %v894_v38  ;;  %v1189_v41 = vadd.f32 %v3138_v47, %v1188_v39  ;;  %v2453_v42 = vpop.f32.mrb[37].mxu0  ;;  %v2509_v43 = vpop.f32.mrb[37].mxu1 }
 0x156   : > { %v897_v44 = vpop.f32.mrb[38].mxu0  ;;  %v1191_v45 = vpop.f32.mrb[38].mxu1 }
 0x157   : > { %v943_v46 = vmax.f32 %v895_v40, 0.0  ;;  %v1237_v48 = vmax.f32 %v1189_v41, 0.0  ;;  %v898_v49 = vadd.f32 %v3138_v47, %v897_v44  ;;  %v1192_v51 = vadd.f32 %v3138_v47, %v1191_v45  ;;  %v2454_v52 = vpop.f32.mrb[39].mxu0  ;;  %v2510_v55 = vpop.f32.mrb[39].mxu1 }
 0x159   : > { %v3216_v57 = vmax.f32 %v943_v46, %v1237_v48  ;;  %v944_v58 = vmax.f32 %v898_v49, 0.0  ;;  %v1238_v59 = vmax.f32 %v1192_v51, 0.0 }
 0x15b   : > { %v3218_v60 = vmax.f32 %v944_v58, %v1238_v59 }
 0x15c   : > { %v902_v61 = vpop.f32.mrb[40].mxu0  ;;  %v1196_v63 = vpop.f32.mrb[40].mxu1 }
 0x15d   : > { %v903_v0 = vadd.f32 %v3138_v47, %v902_v61  ;;  %v1197_v2 = vadd.f32 %v3138_v47, %v1196_v63  ;;  %v2457_v3 = vpop.f32.mrb[41].mxu0  ;;  %v2513_v4 = vpop.f32.mrb[41].mxu1 }
 0x15e   : > { %v905_v5 = vpop.f32.mrb[42].mxu0  ;;  %v1199_v6 = vpop.f32.mrb[42].mxu1 }
 0x15f   : > { %v945_v7 = vmax.f32 %v903_v0, 0.0  ;;  %v1239_v10 = vmax.f32 %v1197_v2, 0.0  ;;  %v906_v11 = vadd.f32 %v3138_v47, %v905_v5  ;;  %v1200_v14 = vadd.f32 %v3138_v47, %v1199_v6  ;;  %v2458_v15 = vpop.f32.mrb[43].mxu0  ;;  %v2514_v17 = vpop.f32.mrb[43].mxu1 }
 0x161   : > { %v3224_v18 = vmax.f32 %v945_v7, %v1239_v10  ;;  %v946_v20 = vmax.f32 %v906_v11, 0.0  ;;  %v1240_v21 = vmax.f32 %v1200_v14, 0.0 }
 0x163   : > { %v3226_v22 = vmax.f32 %v946_v20, %v1240_v21 }
 0x164   : > { %v910_v23 = vpop.f32.mrb[44].mxu0  ;;  %v1204_v24 = vpop.f32.mrb[44].mxu1 }
 0x165   : > { %v911_v25 = vadd.f32 %v3138_v47, %v910_v23  ;;  %v1205_v26 = vadd.f32 %v3138_v47, %v1204_v24  ;;  %v2461_v27 = vpop.f32.mrb[45].mxu0  ;;  %v2517_v28 = vpop.f32.mrb[45].mxu1 }
 0x166   : > { %v913_v30 = vpop.f32.mrb[46].mxu0  ;;  %v1207_v33 = vpop.f32.mrb[46].mxu1 }
 0x167   : > { %v947_v35 = vmax.f32 %v911_v25, 0.0  ;;  %v1241_v38 = vmax.f32 %v1205_v26, 0.0  ;;  %v914_v39 = vadd.f32 %v3138_v47, %v913_v30  ;;  %v1208_v40 = vadd.f32 %v3138_v47, %v1207_v33  ;;  %v2462_v41 = vpop.f32.mrb[47].mxu0  ;;  %v2518_v42 = vpop.f32.mrb[47].mxu1 }
 0x169   : > { %v3232_v43 = vmax.f32 %v947_v35, %v1241_v38  ;;  %v948_v44 = vmax.f32 %v914_v39, 0.0  ;;  %v1242_v45 = vmax.f32 %v1208_v40, 0.0 }
 0x16b   : > { %v3234_v46 = vmax.f32 %v948_v44, %v1242_v45 }
 0x16c   : > { %v918_v48 = vpop.f32.mrb[48].mxu0  ;;  %v1212_v49 = vpop.f32.mrb[48].mxu1 }
 0x16d   : > { %v919_v51 = vadd.f32 %v3138_v47, %v918_v48  ;;  %v1213_v52 = vadd.f32 %v3138_v47, %v1212_v49  ;;  %v2465_v55 = vpop.f32.mrb[49].mxu0  ;;  %v2521_v58 = vpop.f32.mrb[49].mxu1 }
 0x16e   : > { %v921_v59 = vpop.f32.mrb[50].mxu0  ;;  %v1215_v61 = vpop.f32.mrb[50].mxu1 }
 0x16f   : > { %v949_v63 = vmax.f32 %v919_v51, 0.0  ;;  %v1243_v0 = vmax.f32 %v1213_v52, 0.0  ;;  %v922_v2 = vadd.f32 %v3138_v47, %v921_v59  ;;  %v1216_v3 = vadd.f32 %v3138_v47, %v1215_v61  ;;  %v2466_v4 = vpop.f32.mrb[51].mxu0  ;;  %v2522_v5 = vpop.f32.mrb[51].mxu1 }
 0x171   : > { %v3242_v6 = vmax.f32 %v949_v63, %v1243_v0  ;;  %v950_v7 = vmax.f32 %v922_v2, 0.0  ;;  %v1244_v10 = vmax.f32 %v1216_v3, 0.0 }
 0x173   : > { %v3244_v11 = vmax.f32 %v950_v7, %v1244_v10 }
 0x174   : > { %v1436_v14 = vpop.f32.mrb[52].mxu0  ;;  %v1756_v15 = vpop.f32.mrb[52].mxu1 }
 0x175   : > { %v1437_v17 = vadd.f32 %v3138_v47, %v1436_v14  ;;  %v1757_v20 = vadd.f32 %v3138_v47, %v1756_v15  ;;  %v2529_v21 = vpop.f32.mrb[53].mxu0  ;;  %v2585_v23 = vpop.f32.mrb[53].mxu1 }
 0x176   : > { %v1439_v24 = vpop.f32.mrb[54].mxu0  ;;  %v1759_v25 = vpop.f32.mrb[54].mxu1 }
 0x177   : > { %v1539_v26 = vmax.f32 %v1437_v17, 0.0  ;;  %v1859_v27 = vmax.f32 %v1757_v20, 0.0  ;;  %v1440_v28 = vadd.f32 %v3138_v47, %v1439_v24  ;;  %v1760_v30 = vadd.f32 %v3138_v47, %v1759_v25  ;;  %v2530_v33 = vpop.f32.mrb[55].mxu0  ;;  %v2586_v35 = vpop.f32.mrb[55].mxu1 }
 0x179   : > { %v1565_v38 = vmax.f32 %v3144_v62, %v1539_v26  ;;  %v1540_v39 = vmax.f32 %v1440_v28, 0.0  ;;  %v1860_v42 = vmax.f32 %v1760_v30, 0.0 }
 0x17b   : > { %v1885_v40 = vmax.f32 %v1565_v38, %v1859_v27  ;;  %v1566_v41 = vmax.f32 %v3146_v1, %v1540_v39 }
 0x17c   : > { %v1444_v44 = vpop.f32.mrb[56].mxu0  ;;  %v1764_v45 = vpop.f32.mrb[56].mxu1 }
 0x17d   : > { %v2325_v48 = vpack.c.bf16 %v1885_v40, %v1885_v40  ;;  %v1886_v49 = vmax.f32 %v1566_v41, %v1860_v42  ;;  %v1445_v62 = vadd.f32 %v3138_v47, %v1444_v44  ;;  %v1765_v51 = vadd.f32 %v3138_v47, %v1764_v45  ;;  %v2533_v52 = vpop.f32.mrb[57].mxu0  ;;  %v2589_v55 = vpop.f32.mrb[57].mxu1 }
 0x17e   : > { %v1447_v1 = vpop.f32.mrb[58].mxu0  ;;  %v1767_v58 = vpop.f32.mrb[58].mxu1 }
 0x17f   : > { %2016 = vst.msk [vmem:[%s3255_s14] sm:$0xf] %vm2015_vm4, %v2325_v48  ;;  %v2326_v59 = vpack.c.bf16 %v1886_v49, %v1886_v49  ;;  %v1541_v61 = vmax.f32 %v1445_v62, 0.0  ;;  %v1861_v63 = vmax.f32 %v1765_v51, 0.0  ;;  %v1448_v0 = vadd.f32 %v3138_v47, %v1447_v1  ;;  %v2534_v2 = vpop.f32.mrb[59].mxu0  ;;  %v2590_v3 = vpop.f32.mrb[59].mxu1 }
 0x180   : > { %v1768_v4 = vadd.f32 %v3138_v47, %v1767_v58 }
 0x181   : > { %2017 = vst.msk [vmem:[%s3255_s14 + $0x4] sm:$0xf] %vm2015_vm4, %v2326_v59  ;;  %v1567_v5 = vmax.f32 %v3152_v16, %v1541_v61  ;;  %v1542_v7 = vmax.f32 %v1448_v0, 0.0 }
 0x182   : > { %v1862_v15 = vmax.f32 %v1768_v4, 0.0 }
 0x183   : > { %v1887_v10 = vmax.f32 %v1567_v5, %v1861_v63  ;;  %v1568_v14 = vmax.f32 %v3154_v19, %v1542_v7 }
 0x184   : > { %v1452_v17 = vpop.f32.mrb[60].mxu0  ;;  %v1772_v20 = vpop.f32.mrb[60].mxu1 }
 0x185   : > { %v2327_v21 = vpack.c.bf16 %v1887_v10, %v1887_v10  ;;  %v1888_v23 = vmax.f32 %v1568_v14, %v1862_v15  ;;  %v1453_v24 = vadd.f32 %v3138_v47, %v1452_v17  ;;  %v1773_v25 = vadd.f32 %v3138_v47, %v1772_v20  ;;  %v2537_v26 = vpop.f32.mrb[61].mxu0  ;;  %v2593_v27 = vpop.f32.mrb[61].mxu1 }
 0x186   : > { %v1455_v28 = vpop.f32.mrb[62].mxu0  ;;  %v1775_v30 = vpop.f32.mrb[62].mxu1 }
 0x187   : > { %2018 = vst.msk [vmem:[%s3255_s14 + $0x8] sm:$0xf] %vm2015_vm4, %v2327_v21  ;;  %v2328_v16 = vpack.c.bf16 %v1888_v23, %v1888_v23  ;;  %v1543_v33 = vmax.f32 %v1453_v24, 0.0  ;;  %v1863_v35 = vmax.f32 %v1773_v25, 0.0  ;;  %v1456_v19 = vadd.f32 %v3138_v47, %v1455_v28  ;;  %v2538_v38 = vpop.f32.mrb[63].mxu0  ;;  %v2594_v39 = vpop.f32.mrb[63].mxu1 }
 0x188   : > { %v1776_v40 = vadd.f32 %v3138_v47, %v1775_v30 }
 0x189   : > { %2019 = vst.msk [vmem:[%s3255_s14 + $0xc] sm:$0xf] %vm2015_vm4, %v2328_v16  ;;  %v1569_v41 = vmax.f32 %v3160_v34, %v1543_v33  ;;  %v1544_v42 = vmax.f32 %v1456_v19, 0.0 }
 0x18a   : > { %v1864_v48 = vmax.f32 %v1776_v40, 0.0 }
 0x18b   : > { %v1889_v44 = vmax.f32 %v1569_v41, %v1863_v35  ;;  %v1570_v45 = vmax.f32 %v3162_v37, %v1544_v42 }
 0x18c   : > { %v1460_v49 = vpop.f32.mrb[64].mxu0  ;;  %v1780_v62 = vpop.f32.mrb[64].mxu1 }
 0x18d   : > { %v2329_v51 = vpack.c.bf16 %v1889_v44, %v1889_v44  ;;  %v1890_v52 = vmax.f32 %v1570_v45, %v1864_v48  ;;  %v1461_v55 = vadd.f32 %v3138_v47, %v1460_v49  ;;  %v1781_v1 = vadd.f32 %v3138_v47, %v1780_v62  ;;  %v2541_v58 = vpop.f32.mrb[65].mxu0  ;;  %v2597_v59 = vpop.f32.mrb[65].mxu1 }
 0x18e   : > { %v1463_v61 = vpop.f32.mrb[66].mxu0  ;;  %v1783_v63 = vpop.f32.mrb[66].mxu1 }
 0x18f   : > { %2020 = vst.msk [vmem:[%s3255_s14 + $0x10] sm:$0xf] %vm2015_vm4, %v2329_v51  ;;  %v2330_v34 = vpack.c.bf16 %v1890_v52, %v1890_v52  ;;  %v1545_v0 = vmax.f32 %v1461_v55, 0.0  ;;  %v1865_v2 = vmax.f32 %v1781_v1, 0.0  ;;  %v1464_v37 = vadd.f32 %v3138_v47, %v1463_v61  ;;  %v2542_v3 = vpop.f32.mrb[67].mxu0  ;;  %v2598_v4 = vpop.f32.mrb[67].mxu1 }
 0x190   : > { %v1784_v5 = vadd.f32 %v3138_v47, %v1783_v63 }
 0x191   : > { %2021 = vst.msk [vmem:[%s3255_s14 + $0x14] sm:$0xf] %vm2015_vm4, %v2330_v34  ;;  %v1571_v7 = vmax.f32 %v3168_v54, %v1545_v0  ;;  %v1546_v10 = vmax.f32 %v1464_v37, 0.0 }
 0x192   : > { %v1866_v17 = vmax.f32 %v1784_v5, 0.0 }
 0x193   : > { %v1891_v14 = vmax.f32 %v1571_v7, %v1865_v2  ;;  %v1572_v15 = vmax.f32 %v3170_v56, %v1546_v10 }
 0x194   : > { %v1468_v20 = vpop.f32.mrb[68].mxu0  ;;  %v1788_v21 = vpop.f32.mrb[68].mxu1 }
 0x195   : > { %v2331_v23 = vpack.c.bf16 %v1891_v14, %v1891_v14  ;;  %v1892_v24 = vmax.f32 %v1572_v15, %v1866_v17  ;;  %v1469_v25 = vadd.f32 %v3138_v47, %v1468_v20  ;;  %v1789_v26 = vadd.f32 %v3138_v47, %v1788_v21  ;;  %v2545_v27 = vpop.f32.mrb[69].mxu0  ;;  %v2601_v28 = vpop.f32.mrb[69].mxu1 }
 0x196   : > { %v1471_v30 = vpop.f32.mrb[70].mxu0  ;;  %v1791_v16 = vpop.f32.mrb[70].mxu1 }
 0x197   : > { %2022 = vst.msk [vmem:[%s3255_s14 + $0x18] sm:$0xf] %vm2015_vm4, %v2331_v23  ;;  %v2332_v54 = vpack.c.bf16 %v1892_v24, %v1892_v24  ;;  %v1547_v33 = vmax.f32 %v1469_v25, 0.0  ;;  %v1867_v35 = vmax.f32 %v1789_v26, 0.0  ;;  %v1472_v56 = vadd.f32 %v3138_v47, %v1471_v30  ;;  %v2546_v19 = vpop.f32.mrb[71].mxu0  ;;  %v2602_v38 = vpop.f32.mrb[71].mxu1 }
 0x198   : > { %v1792_v39 = vadd.f32 %v3138_v47, %v1791_v16 }
 0x199   : > { %2023 = vst.msk [vmem:[%s3255_s14 + $0x1c] sm:$0xf] %vm2015_vm4, %v2332_v54  ;;  %v1573_v40 = vmax.f32 %v3176_v9, %v1547_v33  ;;  %v1548_v41 = vmax.f32 %v1472_v56, 0.0 }
 0x19a   : > { %v1868_v45 = vmax.f32 %v1792_v39, 0.0 }
 0x19b   : > { %v1893_v42 = vmax.f32 %v1573_v40, %v1867_v35  ;;  %v1574_v44 = vmax.f32 %v3178_v12, %v1548_v41 }
 0x19c   : > { %v1476_v48 = vpop.f32.mrb[72].mxu0  ;;  %v1796_v49 = vpop.f32.mrb[72].mxu1 }
 0x19d   : > { %v2333_v62 = vpack.c.bf16 %v1893_v42, %v1893_v42  ;;  %v1894_v51 = vmax.f32 %v1574_v44, %v1868_v45  ;;  %v1477_v52 = vadd.f32 %v3138_v47, %v1476_v48  ;;  %v1797_v55 = vadd.f32 %v3138_v47, %v1796_v49  ;;  %v2549_v1 = vpop.f32.mrb[73].mxu0  ;;  %v2605_v58 = vpop.f32.mrb[73].mxu1 }
 0x19e   : > { %v1479_v59 = vpop.f32.mrb[74].mxu0  ;;  %v1799_v61 = vpop.f32.mrb[74].mxu1 }
 0x19f   : > { %2024 = vst.msk [vmem:[%s3255_s14 + $0x20] sm:$0xf] %vm2015_vm4, %v2333_v62  ;;  %v2334_v9 = vpack.c.bf16 %v1894_v51, %v1894_v51  ;;  %v1549_v63 = vmax.f32 %v1477_v52, 0.0  ;;  %v1869_v34 = vmax.f32 %v1797_v55, 0.0  ;;  %v1480_v12 = vadd.f32 %v3138_v47, %v1479_v59  ;;  %v2550_v0 = vpop.f32.mrb[75].mxu0  ;;  %v2606_v2 = vpop.f32.mrb[75].mxu1 }
 0x1a0   : > { %v1800_v37 = vadd.f32 %v3138_v47, %v1799_v61 }
 0x1a1   : > { %2025 = vst.msk [vmem:[%s3255_s14 + $0x24] sm:$0xf] %vm2015_vm4, %v2334_v9  ;;  %v1575_v3 = vmax.f32 %v3184_v29, %v1549_v63  ;;  %v1550_v4 = vmax.f32 %v1480_v12, 0.0 }
 0x1a2   : > { %v1870_v10 = vmax.f32 %v1800_v37, 0.0 }
 0x1a3   : > { %v1895_v5 = vmax.f32 %v1575_v3, %v1869_v34  ;;  %v1576_v7 = vmax.f32 %v3186_v32, %v1550_v4 }
 0x1a4   : > { %v1484_v14 = vpop.f32.mrb[76].mxu0  ;;  %v1804_v15 = vpop.f32.mrb[76].mxu1 }
 0x1a5   : > { %v2335_v17 = vpack.c.bf16 %v1895_v5, %v1895_v5  ;;  %v1896_v20 = vmax.f32 %v1576_v7, %v1870_v10  ;;  %v1485_v21 = vadd.f32 %v3138_v47, %v1484_v14  ;;  %v1805_v23 = vadd.f32 %v3138_v47, %v1804_v15  ;;  %v2553_v24 = vpop.f32.mrb[77].mxu0  ;;  %v2609_v25 = vpop.f32.mrb[77].mxu1 }
 0x1a6   : > { %v1487_v26 = vpop.f32.mrb[78].mxu0  ;;  %v1807_v27 = vpop.f32.mrb[78].mxu1 }
 0x1a7   : > { %2026 = vst.msk [vmem:[%s3255_s14 + $0x28] sm:$0xf] %vm2015_vm4, %v2335_v17  ;;  %v2336_v29 = vpack.c.bf16 %v1896_v20, %v1896_v20  ;;  %v1551_v28 = vmax.f32 %v1485_v21, 0.0  ;;  %v1871_v30 = vmax.f32 %v1805_v23, 0.0  ;;  %v1488_v32 = vadd.f32 %v3138_v47, %v1487_v26  ;;  %v2554_v16 = vpop.f32.mrb[79].mxu0  ;;  %v2610_v54 = vpop.f32.mrb[79].mxu1 }
 0x1a8   : > { %v1808_v33 = vadd.f32 %v3138_v47, %v1807_v27 }
 0x1a9   : > { %2027 = vst.msk [vmem:[%s3255_s14 + $0x2c] sm:$0xf] %vm2015_vm4, %v2336_v29  ;;  %v1577_v35 = vmax.f32 %v3192_v50, %v1551_v28  ;;  %v1552_v56 = vmax.f32 %v1488_v32, 0.0 }
 0x1aa   : > { %v1872_v39 = vmax.f32 %v1808_v33, 0.0 }
 0x1ab   : > { %v1897_v19 = vmax.f32 %v1577_v35, %v1871_v30  ;;  %v1578_v38 = vmax.f32 %v3194_v53, %v1552_v56 }
 0x1ac   : > { %v1492_v40 = vpop.f32.mrb[80].mxu0  ;;  %v1812_v41 = vpop.f32.mrb[80].mxu1 }
 0x1ad   : > { %v2337_v42 = vpack.c.bf16 %v1897_v19, %v1897_v19  ;;  %v1898_v44 = vmax.f32 %v1578_v38, %v1872_v39  ;;  %v1493_v45 = vadd.f32 %v3138_v47, %v1492_v40  ;;  %v1813_v48 = vadd.f32 %v3138_v47, %v1812_v41  ;;  %v2557_v49 = vpop.f32.mrb[81].mxu0  ;;  %v2613_v62 = vpop.f32.mrb[81].mxu1 }
 0x1ae   : > { %v1495_v51 = vpop.f32.mrb[82].mxu0  ;;  %v1815_v52 = vpop.f32.mrb[82].mxu1 }
 0x1af   : > { %2028 = vst.msk [vmem:[%s3255_s14 + $0x30] sm:$0xf] %vm2015_vm4, %v2337_v42  ;;  %v2338_v50 = vpack.c.bf16 %v1898_v44, %v1898_v44  ;;  %v1553_v55 = vmax.f32 %v1493_v45, 0.0  ;;  %v1873_v1 = vmax.f32 %v1813_v48, 0.0  ;;  %v1496_v53 = vadd.f32 %v3138_v47, %v1495_v51  ;;  %v2558_v58 = vpop.f32.mrb[83].mxu0  ;;  %v2614_v59 = vpop.f32.mrb[83].mxu1 }
 0x1b0   : > { %v1816_v61 = vadd.f32 %v3138_v47, %v1815_v52 }
 0x1b1   : > { %2029 = vst.msk [vmem:[%s3255_s14 + $0x34] sm:$0xf] %vm2015_vm4, %v2338_v50  ;;  %v1579_v9 = vmax.f32 %v3200_v8, %v1553_v55  ;;  %v1554_v63 = vmax.f32 %v1496_v53, 0.0 }
 0x1b2   : > { %v1874_v0 = vmax.f32 %v1816_v61, 0.0 }
 0x1b3   : > { %v1899_v34 = vmax.f32 %v1579_v9, %v1873_v1  ;;  %v1580_v12 = vmax.f32 %v3202_v13, %v1554_v63 }
 0x1b4   : > { %v1500_v2 = vpop.f32.mrb[84].mxu0  ;;  %v1820_v37 = vpop.f32.mrb[84].mxu1 }
 0x1b5   : > { %v2339_v3 = vpack.c.bf16 %v1899_v34, %v1899_v34  ;;  %v1900_v4 = vmax.f32 %v1580_v12, %v1874_v0  ;;  %v1501_v5 = vadd.f32 %v3138_v47, %v1500_v2  ;;  %v1821_v7 = vadd.f32 %v3138_v47, %v1820_v37  ;;  %v2561_v10 = vpop.f32.mrb[85].mxu0  ;;  %v2617_v14 = vpop.f32.mrb[85].mxu1 }
 0x1b6   : > { %v1503_v15 = vpop.f32.mrb[86].mxu0  ;;  %v1823_v17 = vpop.f32.mrb[86].mxu1 }
 0x1b7   : > { %2030 = vst.msk [vmem:[%s3255_s14 + $0x38] sm:$0xf] %vm2015_vm4, %v2339_v3  ;;  %v2340_v8 = vpack.c.bf16 %v1900_v4, %v1900_v4  ;;  %v1555_v20 = vmax.f32 %v1501_v5, 0.0  ;;  %v1875_v21 = vmax.f32 %v1821_v7, 0.0  ;;  %v1504_v13 = vadd.f32 %v3138_v47, %v1503_v15  ;;  %v2562_v23 = vpop.f32.mrb[87].mxu0  ;;  %v2618_v24 = vpop.f32.mrb[87].mxu1 }
 0x1b8   : > { %v1824_v25 = vadd.f32 %v3138_v47, %v1823_v17 }
 0x1b9   : > { %2031 = vst.msk [vmem:[%s3255_s14 + $0x3c] sm:$0xf] %vm2015_vm4, %v2340_v8  ;;  %v1581_v26 = vmax.f32 %v3208_v31, %v1555_v20  ;;  %v1556_v27 = vmax.f32 %v1504_v13, 0.0 }
 0x1ba   : > { %v1876_v30 = vmax.f32 %v1824_v25, 0.0 }
 0x1bb   : > { %v1901_v29 = vmax.f32 %v1581_v26, %v1875_v21  ;;  %v1582_v28 = vmax.f32 %v3210_v36, %v1556_v27 }
 0x1bc   : > { %v1508_v32 = vpop.f32.mrb[88].mxu0  ;;  %v1828_v16 = vpop.f32.mrb[88].mxu1 }
 0x1bd   : > { %v2341_v54 = vpack.c.bf16 %v1901_v29, %v1901_v29  ;;  %v1902_v33 = vmax.f32 %v1582_v28, %v1876_v30  ;;  %v1509_v35 = vadd.f32 %v3138_v47, %v1508_v32  ;;  %v1829_v56 = vadd.f32 %v3138_v47, %v1828_v16  ;;  %v2565_v19 = vpop.f32.mrb[89].mxu0  ;;  %v2621_v38 = vpop.f32.mrb[89].mxu1 }
 0x1be   : > { %v1511_v39 = vpop.f32.mrb[90].mxu0  ;;  %v1831_v40 = vpop.f32.mrb[90].mxu1 }
 0x1bf   : > { %2032 = vst.msk [vmem:[%s3255_s14 + $0x40] sm:$0xf] %vm2015_vm4, %v2341_v54  ;;  %v2342_v31 = vpack.c.bf16 %v1902_v33, %v1902_v33  ;;  %v1557_v41 = vmax.f32 %v1509_v35, 0.0  ;;  %v1877_v42 = vmax.f32 %v1829_v56, 0.0  ;;  %v1512_v36 = vadd.f32 %v3138_v47, %v1511_v39  ;;  %v2566_v44 = vpop.f32.mrb[91].mxu0  ;;  %v2622_v45 = vpop.f32.mrb[91].mxu1 }
 0x1c0   : > { %v1832_v48 = vadd.f32 %v3138_v47, %v1831_v40 }
 0x1c1   : > { %2033 = vst.msk [vmem:[%s3255_s14 + $0x44] sm:$0xf] %vm2015_vm4, %v2342_v31  ;;  %v1583_v49 = vmax.f32 %v3216_v57, %v1557_v41  ;;  %v1558_v62 = vmax.f32 %v1512_v36, 0.0 }
 0x1c2   : > { %v1878_v50 = vmax.f32 %v1832_v48, 0.0 }
 0x1c3   : > { %v1903_v51 = vmax.f32 %v1583_v49, %v1877_v42  ;;  %v1584_v52 = vmax.f32 %v3218_v60, %v1558_v62 }
 0x1c4   : > { %v1516_v55 = vpop.f32.mrb[92].mxu0  ;;  %v1836_v1 = vpop.f32.mrb[92].mxu1 }
 0x1c5   : > { %v2343_v53 = vpack.c.bf16 %v1903_v51, %v1903_v51  ;;  %v1904_v58 = vmax.f32 %v1584_v52, %v1878_v50  ;;  %v1517_v59 = vadd.f32 %v3138_v47, %v1516_v55  ;;  %v1837_v61 = vadd.f32 %v3138_v47, %v1836_v1  ;;  %v2569_v9 = vpop.f32.mrb[93].mxu0  ;;  %v2625_v63 = vpop.f32.mrb[93].mxu1 }
 0x1c6   : > { %v1519_v34 = vpop.f32.mrb[94].mxu0  ;;  %v1839_v12 = vpop.f32.mrb[94].mxu1 }
 0x1c7   : > { %2034 = vst.msk [vmem:[%s3255_s14 + $0x48] sm:$0xf] %vm2015_vm4, %v2343_v53  ;;  %v2344_v57 = vpack.c.bf16 %v1904_v58, %v1904_v58  ;;  %v1559_v0 = vmax.f32 %v1517_v59, 0.0  ;;  %v1879_v2 = vmax.f32 %v1837_v61, 0.0  ;;  %v1520_v60 = vadd.f32 %v3138_v47, %v1519_v34  ;;  %v2570_v37 = vpop.f32.mrb[95].mxu0  ;;  %v2626_v3 = vpop.f32.mrb[95].mxu1 }
 0x1c8   : > { %v1840_v4 = vadd.f32 %v3138_v47, %v1839_v12 }
 0x1c9   : > { %2035 = vst.msk [vmem:[%s3255_s14 + $0x4c] sm:$0xf] %vm2015_vm4, %v2344_v57  ;;  %v1585_v5 = vmax.f32 %v3224_v18, %v1559_v0  ;;  %v1560_v7 = vmax.f32 %v1520_v60, 0.0 }
 0x1ca   : > { %v1880_v15 = vmax.f32 %v1840_v4, 0.0 }
 0x1cb   : > { %v1905_v10 = vmax.f32 %v1585_v5, %v1879_v2  ;;  %v1586_v14 = vmax.f32 %v3226_v22, %v1560_v7  ;;  %v2718_v22 = vld [vmem:[%s3390_s2] ss:$0 sm:$0xff] }
 0x1cc   : > { %v1524_v17 = vpop.f32.mrb[96].mxu0  ;;  %v1844_v8 = vpop.f32.mrb[96].mxu1 }
 0x1cd   : > { %v2345_v20 = vpack.c.bf16 %v1905_v10, %v1905_v10  ;;  %v1906_v21 = vmax.f32 %v1586_v14, %v1880_v15  ;;  %v1525_v13 = vadd.f32 %v3138_v47, %v1524_v17  ;;  %v1845_v23 = vadd.f32 %v3138_v47, %v1844_v8  ;;  %v2573_v24 = vpop.f32.mrb[97].mxu0  ;;  %v2629_v25 = vpop.f32.mrb[97].mxu1 }
 0x1ce   : > { %v1527_v26 = vpop.f32.mrb[98].mxu0  ;;  %v1847_v27 = vpop.f32.mrb[98].mxu1 }
 0x1cf   : > { %2036 = vst.msk [vmem:[%s3255_s14 + $0x50] sm:$0xf] %vm2015_vm4, %v2345_v20  ;;  %v2346_v18 = vpack.c.bf16 %v1906_v21, %v1906_v21  ;;  %v1561_v29 = vmax.f32 %v1525_v13, 0.0  ;;  %v1881_v28 = vmax.f32 %v1845_v23, 0.0  ;;  %v1528_v30 = vadd.f32 %v2718_v22, %v1527_v26  ;;  %v2574_v32 = vpop.f32.mrb[99].mxu0  ;;  %v2630_v16 = vpop.f32.mrb[99].mxu1 }
 0x1d0   : > { %v1848_v54 = vadd.f32 %v2718_v22, %v1847_v27 }
 0x1d1   : > { %2037 = vst.msk [vmem:[%s3255_s14 + $0x54] sm:$0xf] %vm2015_vm4, %v2346_v18  ;;  %v1587_v47 = vmax.f32 %v3232_v43, %v1561_v29  ;;  %v1562_v33 = vmax.f32 %v1528_v30, 0.0 }
 0x1d2   : > { %v1882_v19 = vmax.f32 %v1848_v54, 0.0 }
 0x1d3   : > { %v1907_v35 = vmax.f32 %v1587_v47, %v1881_v28  ;;  %v1588_v56 = vmax.f32 %v3234_v46, %v1562_v33 }
 0x1d4   : > { %v1532_v38 = vpop.f32.mrb[100].mxu0  ;;  %v1852_v39 = vpop.f32.mrb[100].mxu1 }
 0x1d5   : > { %v2347_v40 = vpack.c.bf16 %v1907_v35, %v1907_v35  ;;  %v1908_v31 = vmax.f32 %v1588_v56, %v1882_v19  ;;  %v1533_v41 = vadd.f32 %v2718_v22, %v1532_v38  ;;  %v1853_v42 = vadd.f32 %v2718_v22, %v1852_v39  ;;  %v2577_v36 = vpop.f32.mrb[101].mxu0  ;;  %v2633_v44 = vpop.f32.mrb[101].mxu1 }
 0x1d6   : > { %v1535_v45 = vpop.f32.mrb[102].mxu0  ;;  %v1855_v48 = vpop.f32.mrb[102].mxu1 }
 0x1d7   : > { %2038 = vst.msk [vmem:[%s3255_s14 + $0x58] sm:$0xf] %vm2015_vm4, %v2347_v40  ;;  %v2348_v43 = vpack.c.bf16 %v1908_v31, %v1908_v31  ;;  %v1563_v49 = vmax.f32 %v1533_v41, 0.0  ;;  %v1883_v62 = vmax.f32 %v1853_v42, 0.0  ;;  %v1536_v46 = vadd.f32 %v2718_v22, %v1535_v45  ;;  %v2578_v51 = vpop.f32.mrb[103].mxu0  ;;  %v2634_v52 = vpop.f32.mrb[103].mxu1 }
 0x1d8   : > { %v1856_v50 = vadd.f32 %v2718_v22, %v1855_v48 }
 0x1d9   : > { %2039 = vst.msk [vmem:[%s3255_s14 + $0x5c] sm:$0xf] %vm2015_vm4, %v2348_v43  ;;  %v1589_v55 = vmax.f32 %v3242_v6, %v1563_v49  ;;  %v1564_v1 = vmax.f32 %v1536_v46, 0.0 }
 0x1da   : > { %v1884_v59 = vmax.f32 %v1856_v50, 0.0 }
 0x1db   : > { %v1909_v53 = vmax.f32 %v1589_v55, %v1883_v62  ;;  %v1590_v58 = vmax.f32 %v3244_v11, %v1564_v1 }
 0x1dd   : > { %v2349_v61 = vpack.c.bf16 %v1909_v53, %v1909_v53  ;;  %v1910_v9 = vmax.f32 %v1590_v58, %v1884_v59 }
 0x1df   : > { %2040 = vst.msk [vmem:[%s3255_s14 + $0x60] sm:$0xf] %vm2015_vm4, %v2349_v61  ;;  %v2350_v63 = vpack.c.bf16 %v1910_v9, %v1910_v9 }
 0x1e1   : > { %2041 = vst.msk [vmem:[%s3255_s14 + $0x64] sm:$0xf] %vm2015_vm4, %v2350_v63 }
 0x1e2 PF: > { %p10_p9 = scmp.ge.s32.totalorder %s2783_s16, 4   ;;  %s3392_s12 = smov %s2737_s13 }
 0x1e3   : > { %s3393_s13 = smov %s2792_s19  ;;  %s3394_s14 = smov %s2783_s16 }
 0x1e4   :  { %12 = sbr.rel (!%p10_p9) target bundleno = 2 (0x2), region = 111 }

// kernel: net_forward.4
= control target key start
LH: loop header
LB: loop body
LE: loop exit
PB: predicated region body
PF: predicated region fallthrough
CT: control target
= control target key end

     0   :  { %s2164_s12 = smov 0   ;;  %s2166_s13 = smov 0   ;;  %s2818_s0 = inlined_call_operand.vmem [shape: bf16[4,128,400], index: 0, kind: input, shape index: {}]   ;;  %s2819_s1 = inlined_call_operand.vmem [shape: bf16[400,32], index: 1, kind: input, shape index: {}]   ;;  %s2820_s2 = inlined_call_operand.vmem [shape: f32[1,32], index: 2, kind: input, shape index: {}]   ;;  %s2821_s3 = inlined_call_operand.vmem [shape: bf16[128,32], index: 3, kind: output, shape index: {}]  }
   0x1   :  { %s2168_s14 = smov 0  }
   0x2 LB: > { %s1627_s15 = sadd.s32 4294967295, %s2141_s14   ;;  %s2181_s16 = sadd.s32 1, %s2141_s14   ;;  %s2141_s14 = sphi %s2168_s14, %s2824_s14   ;;  %s2137_s13 = sphi %s2166_s13, %s2823_s13   ;;  %s2133_s12 = sphi %s2164_s12, %s2822_s12  }
   0x3   : > { %s17_s17 = ssub.s32 %s2141_s14, %s2181_s16  ;;  %s20_s18 = sadd.s32 1, %s2137_s13 }
   0x4   : > { %p18_p0 = scmp.eq.s32.totalorder %s17_s17, 0  ;;  %p27_p1 = scmp.ne.s32.totalorder %s2137_s13, %s2133_s12 }
   0x5   : > { %p28_p2 = scmp.eq.s32.totalorder %s2141_s14, 0  ;;  %p1630_p4 = scmp.ge.s32.totalorder %s2141_s14, 2 }
   0x6   : > { %s2190_s19 = scalar_select %p18_p0, %s2137_s13, %s20_s18  }
   0x7   : > { %p29_p3 = por %p28_p2, %p27_p1  ;;  %127 = sbr.rel (%p1630_p4) target bundleno = 50 (0x32), region = 24 }
   0xe   : > { %130 = sbr.rel (!%p29_p3) target bundleno = 50 (0x32), region = 28  ;;  %s132_s20 = sand.u32 (%p29_p3), 1, %s2137_s13  }
   0xf   : > { %s1804_s21 = sshll.u32 (%p29_p3), %s2141_s14, 7  ;;  %s1631_s22 = sshll.u32 (%p29_p3), %s132_s20, 9 }
  0x10   : > { %s2198_s25 = scalar_lea.vmem (%p29_p3), %s2818_s0, %s1804_s21  ;;  %s2203_s26 = scalar_lea.vmem (%p29_p3), [#allocation2], %s1631_s22 }
  0x11   : > { %v151_v0 = vld [vmem:[%s2198_s25] sm:$0xff] (%p29_p3)  ;;  %v153_v1 = vld [vmem:[%s2198_s25 + $0x8] sm:$0xff] (%p29_p3)  ;;  %v155_v2 = vld [vmem:[%s2198_s25 + $0x10] sm:$0xff] (%p29_p3) }
  0x12   : > { %152 = vst [vmem:[%s2203_s26] sm:$0xff] (%p29_p3), %v151_v0  ;;  %154 = vst [vmem:[%s2203_s26 + $0x8] sm:$0xff] (%p29_p3), %v153_v1  ;;  %v157_v3 = vld [vmem:[%s2198_s25 + $0x18] sm:$0xff] (%p29_p3)  ;;  %v159_v4 = vld [vmem:[%s2198_s25 + $0x20] sm:$0xff] (%p29_p3) }
  0x13   : > { %156 = vst [vmem:[%s2203_s26 + $0x10] sm:$0xff] (%p29_p3), %v155_v2  ;;  %v161_v5 = vld [vmem:[%s2198_s25 + $0x28] sm:$0xff] (%p29_p3)  ;;  %158 = vst [vmem:[%s2203_s26 + $0x18] sm:$0xff] (%p29_p3), %v157_v3  ;;  %v163_v6 = vld [vmem:[%s2198_s25 + $0x30] sm:$0xff] (%p29_p3) }
  0x14   : > { %160 = vst [vmem:[%s2203_s26 + $0x20] sm:$0xff] (%p29_p3), %v159_v4  ;;  %162 = vst [vmem:[%s2203_s26 + $0x28] sm:$0xff] (%p29_p3), %v161_v5  ;;  %v165_v7 = vld [vmem:[%s2198_s25 + $0x38] sm:$0xff] (%p29_p3)  ;;  %v167_v8 = vld [vmem:[%s2198_s25 + $0x40] sm:$0xff] (%p29_p3) }
  0x15   : > { %164 = vst [vmem:[%s2203_s26 + $0x30] sm:$0xff] %v163_v6  ;;  %166 = vst [vmem:[%s2203_s26 + $0x38] sm:$0xff] %v165_v7  ;;  %v169_v9 = vld [vmem:[%s2198_s25 + $0x48] sm:$0xff]  ;;  %v171_v10 = vld [vmem:[%s2198_s25 + $0x50] sm:$0xff] }
  0x16   : > { %168 = vst [vmem:[%s2203_s26 + $0x40] sm:$0xff] %v167_v8  ;;  %v173_v11 = vld [vmem:[%s2198_s25 + $0x58] sm:$0xff]  ;;  %170 = vst [vmem:[%s2203_s26 + $0x48] sm:$0xff] %v169_v9  ;;  %v175_v12 = vld [vmem:[%s2198_s25 + $0x60] sm:$0xff] }
  0x17   : > { %172 = vst [vmem:[%s2203_s26 + $0x50] sm:$0xff] %v171_v10  ;;  %174 = vst [vmem:[%s2203_s26 + $0x58] sm:$0xff] %v173_v11  ;;  %v177_v13 = vld [vmem:[%s2198_s25 + $0x68] sm:$0xff]  ;;  %v179_v14 = vld [vmem:[%s2198_s25 + $0x70] sm:$0xff] }
  0x18   : > { %176 = vst [vmem:[%s2203_s26 + $0x60] sm:$0xff] %v175_v12  ;;  %178 = vst [vmem:[%s2203_s26 + $0x68] sm:$0xff] %v177_v13  ;;  %v181_v15 = vld [vmem:[%s2198_s25 + $0x78] sm:$0xff]  ;;  %v183_v16 = vld [vmem:[%s2198_s25 + $0x100] sm:$0xff] }
  0x19   : > { %180 = vst [vmem:[%s2203_s26 + $0x70] sm:$0xff] %v179_v14  ;;  %v185_v17 = vld [vmem:[%s2198_s25 + $0x108] sm:$0xff]  ;;  %182 = vst [vmem:[%s2203_s26 + $0x78] sm:$0xff] %v181_v15  ;;  %v187_v18 = vld [vmem:[%s2198_s25 + $0x110] sm:$0xff] }
  0x1a   : > { %184 = vst [vmem:[%s2203_s26 + $0x80] sm:$0xff] %v183_v16  ;;  %186 = vst [vmem:[%s2203_s26 + $0x88] sm:$0xff] %v185_v17  ;;  %v189_v19 = vld [vmem:[%s2198_s25 + $0x118] sm:$0xff]  ;;  %v191_v20 = vld [vmem:[%s2198_s25 + $0x120] sm:$0xff] }
  0x1b   : > { %188 = vst [vmem:[%s2203_s26 + $0x90] sm:$0xff] %v187_v18  ;;  %190 = vst [vmem:[%s2203_s26 + $0x98] sm:$0xff] %v189_v19  ;;  %v193_v21 = vld [vmem:[%s2198_s25 + $0x128] sm:$0xff]  ;;  %v195_v22 = vld [vmem:[%s2198_s25 + $0x130] sm:$0xff] }
  0x1c   : > { %192 = vst [vmem:[%s2203_s26 + $0xa0] sm:$0xff] %v191_v20  ;;  %v197_v23 = vld [vmem:[%s2198_s25 + $0x138] sm:$0xff]  ;;  %194 = vst [vmem:[%s2203_s26 + $0xa8] sm:$0xff] %v193_v21  ;;  %v199_v24 = vld [vmem:[%s2198_s25 + $0x140] sm:$0xff] }
  0x1d   : > { %196 = vst [vmem:[%s2203_s26 + $0xb0] sm:$0xff] %v195_v22  ;;  %198 = vst [vmem:[%s2203_s26 + $0xb8] sm:$0xff] %v197_v23  ;;  %v201_v25 = vld [vmem:[%s2198_s25 + $0x148] sm:$0xff]  ;;  %v203_v26 = vld [vmem:[%s2198_s25 + $0x150] sm:$0xff] }
  0x1e   : > { %200 = vst [vmem:[%s2203_s26 + $0xc0] sm:$0xff] %v199_v24  ;;  %202 = vst [vmem:[%s2203_s26 + $0xc8] sm:$0xff] %v201_v25  ;;  %v205_v27 = vld [vmem:[%s2198_s25 + $0x158] sm:$0xff]  ;;  %v207_v28 = vld [vmem:[%s2198_s25 + $0x160] sm:$0xff] }
  0x1f   : > { %204 = vst [vmem:[%s2203_s26 + $0xd0] sm:$0xff] %v203_v26  ;;  %v209_v29 = vld [vmem:[%s2198_s25 + $0x168] sm:$0xff]  ;;  %206 = vst [vmem:[%s2203_s26 + $0xd8] sm:$0xff] %v205_v27  ;;  %v211_v30 = vld [vmem:[%s2198_s25 + $0x170] sm:$0xff] }
  0x20   : > { %208 = vst [vmem:[%s2203_s26 + $0xe0] sm:$0xff] %v207_v28  ;;  %210 = vst [vmem:[%s2203_s26 + $0xe8] sm:$0xff] %v209_v29  ;;  %v213_v31 = vld [vmem:[%s2198_s25 + $0x178] sm:$0xff]  ;;  %v215_v32 = vld [vmem:[%s2198_s25 + $0x200] sm:$0xff] }
  0x21   : > { %212 = vst [vmem:[%s2203_s26 + $0xf0] sm:$0xff] %v211_v30  ;;  %214 = vst [vmem:[%s2203_s26 + $0xf8] sm:$0xff] %v213_v31  ;;  %v217_v33 = vld [vmem:[%s2198_s25 + $0x208] sm:$0xff]  ;;  %v219_v34 = vld [vmem:[%s2198_s25 + $0x210] sm:$0xff] }
  0x22   : > { %216 = vst [vmem:[%s2203_s26 + $0x100] sm:$0xff] %v215_v32  ;;  %v221_v35 = vld [vmem:[%s2198_s25 + $0x218] sm:$0xff]  ;;  %218 = vst [vmem:[%s2203_s26 + $0x108] sm:$0xff] %v217_v33  ;;  %v223_v36 = vld [vmem:[%s2198_s25 + $0x220] sm:$0xff] }
  0x23   : > { %220 = vst [vmem:[%s2203_s26 + $0x110] sm:$0xff] %v219_v34  ;;  %222 = vst [vmem:[%s2203_s26 + $0x118] sm:$0xff] %v221_v35  ;;  %v225_v37 = vld [vmem:[%s2198_s25 + $0x228] sm:$0xff]  ;;  %v227_v38 = vld [vmem:[%s2198_s25 + $0x230] sm:$0xff] }
  0x24   : > { %224 = vst [vmem:[%s2203_s26 + $0x120] sm:$0xff] %v223_v36  ;;  %226 = vst [vmem:[%s2203_s26 + $0x128] sm:$0xff] %v225_v37  ;;  %v229_v39 = vld [vmem:[%s2198_s25 + $0x238] sm:$0xff]  ;;  %v231_v40 = vld [vmem:[%s2198_s25 + $0x240] sm:$0xff] }
  0x25   : > { %228 = vst [vmem:[%s2203_s26 + $0x130] sm:$0xff] %v227_v38  ;;  %v233_v41 = vld [vmem:[%s2198_s25 + $0x248] sm:$0xff]  ;;  %230 = vst [vmem:[%s2203_s26 + $0x138] sm:$0xff] %v229_v39  ;;  %v235_v42 = vld [vmem:[%s2198_s25 + $0x250] sm:$0xff] }
  0x26   : > { %232 = vst [vmem:[%s2203_s26 + $0x140] sm:$0xff] %v231_v40  ;;  %234 = vst [vmem:[%s2203_s26 + $0x148] sm:$0xff] %v233_v41  ;;  %v237_v43 = vld [vmem:[%s2198_s25 + $0x258] sm:$0xff]  ;;  %v239_v44 = vld [vmem:[%s2198_s25 + $0x260] sm:$0xff] }
  0x27   : > { %236 = vst [vmem:[%s2203_s26 + $0x150] sm:$0xff] %v235_v42  ;;  %238 = vst [vmem:[%s2203_s26 + $0x158] sm:$0xff] %v237_v43  ;;  %v241_v45 = vld [vmem:[%s2198_s25 + $0x268] sm:$0xff]  ;;  %v243_v46 = vld [vmem:[%s2198_s25 + $0x270] sm:$0xff] }
  0x28   : > { %240 = vst [vmem:[%s2203_s26 + $0x160] sm:$0xff] %v239_v44  ;;  %v245_v47 = vld [vmem:[%s2198_s25 + $0x278] sm:$0xff]  ;;  %242 = vst [vmem:[%s2203_s26 + $0x168] sm:$0xff] %v241_v45  ;;  %v247_v48 = vld [vmem:[%s2198_s25 + $0x300] sm:$0xff] }
  0x29   : > { %244 = vst [vmem:[%s2203_s26 + $0x170] sm:$0xff] %v243_v46  ;;  %246 = vst [vmem:[%s2203_s26 + $0x178] sm:$0xff] %v245_v47  ;;  %v249_v49 = vld [vmem:[%s2198_s25 + $0x308] sm:$0xff]  ;;  %v251_v50 = vld [vmem:[%s2198_s25 + $0x310] sm:$0xff] }
  0x2a   : > { %248 = vst [vmem:[%s2203_s26 + $0x180] sm:$0xff] %v247_v48  ;;  %250 = vst [vmem:[%s2203_s26 + $0x188] sm:$0xff] %v249_v49  ;;  %v253_v51 = vld [vmem:[%s2198_s25 + $0x318] sm:$0xff]  ;;  %v255_v52 = vld [vmem:[%s2198_s25 + $0x320] sm:$0xff] }
  0x2b   : > { %252 = vst [vmem:[%s2203_s26 + $0x190] sm:$0xff] %v251_v50  ;;  %v257_v53 = vld [vmem:[%s2198_s25 + $0x328] sm:$0xff]  ;;  %254 = vst [vmem:[%s2203_s26 + $0x198] sm:$0xff] %v253_v51  ;;  %v259_v54 = vld [vmem:[%s2198_s25 + $0x330] sm:$0xff] }
  0x2c   : > { %256 = vst [vmem:[%s2203_s26 + $0x1a0] sm:$0xff] %v255_v52  ;;  %258 = vst [vmem:[%s2203_s26 + $0x1a8] sm:$0xff] %v257_v53  ;;  %v261_v55 = vld [vmem:[%s2198_s25 + $0x338] sm:$0xff]  ;;  %v263_v56 = vld [vmem:[%s2198_s25 + $0x340] sm:$0xff] }
  0x2d   : > { %260 = vst [vmem:[%s2203_s26 + $0x1b0] sm:$0xff] %v259_v54  ;;  %262 = vst [vmem:[%s2203_s26 + $0x1b8] sm:$0xff] %v261_v55  ;;  %v265_v57 = vld [vmem:[%s2198_s25 + $0x348] sm:$0xff]  ;;  %v267_v58 = vld [vmem:[%s2198_s25 + $0x350] sm:$0xff] }
  0x2e   : > { %264 = vst [vmem:[%s2203_s26 + $0x1c0] sm:$0xff] %v263_v56  ;;  %v269_v59 = vld [vmem:[%s2198_s25 + $0x358] sm:$0xff]  ;;  %266 = vst [vmem:[%s2203_s26 + $0x1c8] sm:$0xff] %v265_v57  ;;  %v271_v60 = vld [vmem:[%s2198_s25 + $0x360] sm:$0xff] }
  0x2f   : > { %268 = vst [vmem:[%s2203_s26 + $0x1d0] sm:$0xff] %v267_v58  ;;  %270 = vst [vmem:[%s2203_s26 + $0x1d8] sm:$0xff] %v269_v59  ;;  %v273_v61 = vld [vmem:[%s2198_s25 + $0x368] sm:$0xff]  ;;  %v275_v62 = vld [vmem:[%s2198_s25 + $0x370] sm:$0xff] }
  0x30   : > { %272 = vst [vmem:[%s2203_s26 + $0x1e0] sm:$0xff] %v271_v60  ;;  %274 = vst [vmem:[%s2203_s26 + $0x1e8] sm:$0xff] %v273_v61  ;;  %v277_v63 = vld [vmem:[%s2198_s25 + $0x378] sm:$0xff] }
  0x31   : > { %276 = vst [vmem:[%s2203_s26 + $0x1f0] sm:$0xff] %v275_v62  ;;  %278 = vst [vmem:[%s2203_s26 + $0x1f8] sm:$0xff] %v277_v63 }
  0x32 PF: > { %p1635_p5 = scmp.ge.s32.totalorder %s2141_s14, 1  ;;  %p283_p6 = scmp.lt.s32.totalorder %s2141_s14, 3 }
  0x34   : > { %p284_p7 = pnand %p1635_p5, %p283_p6 }
  0x35   : > { %v2335_v0 = vld [vmem:[%s2819_s1 + $0x40] sm:$0xff] (!%p284_p7)   ;;  %v2143_v1 = vmov (!%p284_p7), 0   ;;  %v2353_v4 = vld [vmem:[%s2819_s1 + $0x48] sm:$0xff] (!%p284_p7)   ;;  %v2371_v7 = vld [vmem:[%s2819_s1 + $0x50] sm:$0xff] (!%p284_p7)   ;;  %s290_s9 = sand.u32 (!%p284_p7), 1, %s2133_s12   ;;  %vm620_vm0 = vcmask (!%p284_p7), 130048  }
  0x36   : > { %287 = sbr.rel (%p284_p7) target bundleno = 445 (0x1bd), region = 51  ;;  %698 = vmatprep.subr.bf16.mxu1 (!%p284_p7), %v2143_v1  ;;  %v2341_v2 = vld [vmem:[%s2819_s1 + $0x80] sm:$0xff] (!%p284_p7)   ;;  %1813 = vmatprep.subr.bf16.mxu0 (!%p284_p7), %v2335_v0  ;;  %v2360_v5 = vld [vmem:[%s2819_s1 + $0x88] sm:$0xff] (!%p284_p7)   ;;  %v2377_v8 = vld [vmem:[%s2819_s1 + $0x90] sm:$0xff] (!%p284_p7)   ;;  %s1636_s20 = sshll.u32 (!%p284_p7), %s290_s9, 9  ;;  %vm1556_vm1 = vcmask (!%p284_p7), 257024  }
  0x37   : > { %v2347_v3 = vld [vmem:[%s2819_s1] sm:$0xff] (!%p284_p7)   ;;  %699 = vmatpush1.bf16.msra.mxu1 (!%p284_p7), %v2341_v2  ;;  %v2366_v6 = vld [vmem:[%s2819_s1 + $0x8] sm:$0xff] (!%p284_p7)   ;;  %v2384_v9 = vld [vmem:[%s2819_s1 + $0x10] sm:$0xff] (!%p284_p7)   ;;  %s2468_s30 = scalar_lea.vmem (!%p284_p7), [#allocation2], %s1636_s20  ;;  %s1637_s17 = sshll.u32 (!%p284_p7), %s1627_s15, 3 }
  0x38   : > { %1814 = vmatpush3.bf16.msra.mxu0 (!%p284_p7), %v2347_v3  ;;  %700 = vmatprep.subr.bf16.mxu1 (!%p284_p7), %v2143_v1  ;;  %v2390_v10 = vld [vmem:[%s2819_s1 + $0x58] sm:$0xff] (!%p284_p7)   ;;  %v2409_v13 = vld [vmem:[%s2819_s1 + $0x60] sm:$0xff] (!%p284_p7)   ;;  %v2429_v16 = vld [vmem:[%s2819_s1 + $0x68] sm:$0xff] (!%p284_p7)   ;;  %p315_p8 = scmp.lt.s32.totalorder (!%p284_p7), %s1637_s17, 15 }
  0x39   : > { %1815 = vmatprep.subr.bf16.mxu0 (!%p284_p7), %v2353_v4  ;;  %v2396_v11 = vld [vmem:[%s2819_s1 + $0x98] sm:$0xff] (!%p284_p7)   ;;  %v2415_v14 = vld [vmem:[%s2819_s1 + $0xa0] sm:$0xff] (!%p284_p7)   ;;  %v2435_v17 = vld [vmem:[%s2819_s1 + $0xa8] sm:$0xff] (!%p284_p7)  }
  0x3a   : > { %v2403_v12 = vld [vmem:[%s2819_s1 + $0x18] sm:$0xff] (!%p284_p7)   ;;  %v2422_v15 = vld [vmem:[%s2819_s1 + $0x20] sm:$0xff] (!%p284_p7)   ;;  %v2442_v18 = vld [vmem:[%s2819_s1 + $0x28] sm:$0xff] (!%p284_p7)  }
  0x3b   : > { %701 = vmatpush1.bf16.msra.mxu1 (!%p284_p7), %v2360_v5  ;;  %v2448_v19 = vld [vmem:[%s2819_s1 + $0x70] sm:$0xff] (!%p284_p7)   ;;  %v2466_v22 = vld [vmem:[%s2819_s1 + $0x78] sm:$0xff] (!%p284_p7)   ;;  %v2493_v28 = vld [vmem:[%s2819_s1 + $0xc0] sm:$0xff] (!%p284_p7)  }
  0x3c   : > { %1816 = vmatpush3.bf16.msra.mxu0 (!%p284_p7), %v2366_v6  ;;  %702 = vmatprep.subr.bf16.mxu1 (!%p284_p7), %v2143_v1  ;;  %v2453_v20 = vld [vmem:[%s2819_s1 + $0xb0] sm:$0xff] (!%p284_p7)   ;;  %v2476_v24 = vld [vmem:[%s2819_s1 + $0xb8] sm:$0xff] (!%p284_p7)  }
  0x3d   : > { %1817 = vmatprep.subr.bf16.mxu0 %v2371_v7  ;;  %v2459_v21 = vld [vmem:[%s2819_s1 + $0x30] sm:$0xff]   ;;  %v2028_v25 = vld [vmem:[%s2468_s30 + $0xc] ss:$16 sps:$4 sm:$0xff]   ;;  %v2026_v30 = vld [vmem:[%s2468_s30 + $0x8] ss:$16 sps:$4 sm:$0xff]   ;;  %s2826_s17 = smov (!%p315_p8, %s1637_s17), 15 }
  0x3e   : > { %v2024_v23 = vld [vmem:[%s2468_s30 + $0x4] ss:$16 sps:$4 sm:$0xff]   ;;  %v2484_v26 = vld [vmem:[%s2819_s1 + $0x38] sm:$0xff]   ;;  %1681 = vmatprep.mubr.msk.bf16.mxu1 %vm620_vm0, %v2028_v25  ;;  %v2022_v27 = vld [vmem:[%s2468_s30] ss:$16 sps:$4 sm:$0xff]   ;;  %s1638_s14 = sshll.u32 %s2826_s17, 2 }
  0x3f   : > { %703 = vmatpush1.bf16.msra.mxu1 %v2377_v8  ;;  %665 = vmatprep.mubr.bf16.mxu0 %v2024_v23  ;;  %v2029_v29 = vld [vmem:[%s2468_s30 + $0x24] ss:$16 sps:$4 sm:$0xff]   ;;  %v2032_v31 = vld [vmem:[%s2468_s30 + $0x2c] ss:$16 sps:$4 sm:$0xff]   ;;  %v2031_v32 = vld [vmem:[%s2468_s30 + $0x20] ss:$16 sps:$4 sm:$0xff]   ;;  %s2778_s20 = scalar_lea.vmem %s2821_s3, %s1638_s14 }
  0x40   : > { %1818 = vmatpush3.bf16.msra.mxu0 %v2384_v9  ;;  %704 = vmatprep.subr.bf16.mxu1 %v2143_v1  ;;  %v2035_v33 = vld [vmem:[%s2468_s30 + $0x44] ss:$16 sps:$4 sm:$0xff]   ;;  %v2034_v34 = vld [vmem:[%s2468_s30 + $0x28] ss:$16 sps:$4 sm:$0xff]   ;;  %v2038_v35 = vld [vmem:[%s2468_s30 + $0x4c] ss:$16 sps:$4 sm:$0xff]  }
  0x41   : > { %1819 = vmatprep.subr.bf16.mxu0 %v2390_v10  ;;  %v2037_v36 = vld [vmem:[%s2468_s30 + $0x40] ss:$16 sps:$4 sm:$0xff]   ;;  %v2041_v37 = vld [vmem:[%s2468_s30 + $0x64] ss:$16 sps:$4 sm:$0xff]   ;;  %v2040_v38 = vld [vmem:[%s2468_s30 + $0x48] ss:$16 sps:$4 sm:$0xff]  }
  0x42   : > { %v2044_v39 = vld [vmem:[%s2468_s30 + $0x6c] ss:$16 sps:$4 sm:$0xff]   ;;  %v2043_v40 = vld [vmem:[%s2468_s30 + $0x60] ss:$16 sps:$4 sm:$0xff]   ;;  %v2049_v41 = vld [vmem:[%s2468_s30 + $0x84] ss:$16 sps:$4 sm:$0xff]  }
  0x43   : > { %705 = vmatpush1.bf16.msra.mxu1 %v2396_v11  ;;  %v2046_v42 = vld [vmem:[%s2468_s30 + $0x68] ss:$16 sps:$4 sm:$0xff]   ;;  %v2052_v43 = vld [vmem:[%s2468_s30 + $0x8c] ss:$16 sps:$4 sm:$0xff]   ;;  %v2047_v44 = vld [vmem:[%s2468_s30 + $0x80] ss:$16 sps:$4 sm:$0xff]  }
  0x44   : > { %1820 = vmatpush3.bf16.msra.mxu0 %v2403_v12  ;;  %706 = vmatprep.subr.bf16.mxu1 %v2143_v1  ;;  %v2053_v45 = vld [vmem:[%s2468_s30 + $0xa4] ss:$16 sps:$4 sm:$0xff]   ;;  %v2050_v46 = vld [vmem:[%s2468_s30 + $0x88] ss:$16 sps:$4 sm:$0xff]   ;;  %v2055_v47 = vld [vmem:[%s2468_s30 + $0xa0] ss:$16 sps:$4 sm:$0xff]  }
  0x45   : > { %1821 = vmatprep.subr.bf16.mxu0 %v2409_v13  ;;  %v2056_v48 = vld [vmem:[%s2468_s30 + $0xac] ss:$16 sps:$4 sm:$0xff]   ;;  %v2059_v49 = vld [vmem:[%s2468_s30 + $0xc4] ss:$16 sps:$4 sm:$0xff]   ;;  %v2058_v50 = vld [vmem:[%s2468_s30 + $0xa8] ss:$16 sps:$4 sm:$0xff]  }
  0x46   : > { %v2061_v51 = vld [vmem:[%s2468_s30 + $0xc0] ss:$16 sps:$4 sm:$0xff]   ;;  %v2062_v52 = vld [vmem:[%s2468_s30 + $0xcc] ss:$16 sps:$4 sm:$0xff]   ;;  %v2065_v53 = vld [vmem:[%s2468_s30 + $0xe4] ss:$16 sps:$4 sm:$0xff]  }
  0x47   : > { %707 = vmatpush1.bf16.msra.mxu1 %v2415_v14  ;;  %v2064_v54 = vld [vmem:[%s2468_s30 + $0xc8] ss:$16 sps:$4 sm:$0xff]   ;;  %v2067_v55 = vld [vmem:[%s2468_s30 + $0xe0] ss:$16 sps:$4 sm:$0xff]   ;;  %v2068_v56 = vld [vmem:[%s2468_s30 + $0xec] ss:$16 sps:$4 sm:$0xff]  }
  0x48   : > { %1822 = vmatpush3.bf16.msra.mxu0 %v2422_v15  ;;  %708 = vmatprep.subr.bf16.mxu1 %v2143_v1  ;;  %v2073_v57 = vld [vmem:[%s2468_s30 + $0x104] ss:$16 sps:$4 sm:$0xff]   ;;  %v2070_v58 = vld [vmem:[%s2468_s30 + $0xe8] ss:$16 sps:$4 sm:$0xff]   ;;  %v2076_v59 = vld [vmem:[%s2468_s30 + $0x10c] ss:$16 sps:$4 sm:$0xff]  }
  0x49   : > { %1823 = vmatprep.subr.bf16.mxu0 %v2429_v16  ;;  %v2071_v60 = vld [vmem:[%s2468_s30 + $0x100] ss:$16 sps:$4 sm:$0xff]   ;;  %v2077_v61 = vld [vmem:[%s2468_s30 + $0x124] ss:$16 sps:$4 sm:$0xff]   ;;  %v2118_v25 = vld [vmem:[%s2468_s30 + $0x1e8] ss:$16 sps:$4 sm:$0xff]  }
  0x4a   : > { %v2079_v62 = vld [vmem:[%s2468_s30 + $0x120] ss:$16 sps:$4 sm:$0xff]   ;;  %v2083_v63 = vld [vmem:[%s2468_s30 + $0x144] ss:$16 sps:$4 sm:$0xff]  }
  0x4b   : > { %709 = vmatpush1.bf16.msra.mxu1 %v2435_v17  ;;  %v2114_v23 = vld [vmem:[%s2468_s30 + $0x1e0] ss:$16 sps:$4 sm:$0xff]  }
  0x4c   : > { %1824 = vmatpush3.bf16.msra.mxu0 %v2442_v18  ;;  %710 = vmatprep.subr.bf16.mxu1 %v2143_v1 }
  0x4d   : > { %1825 = vmatprep.subr.bf16.mxu0 %v2448_v19 }
  0x4f   : > { %711 = vmatpush1.bf16.msra.mxu1 %v2453_v20 }
  0x50   : > { %1826 = vmatpush3.bf16.msra.mxu0 %v2459_v21  ;;  %712 = vmatprep.subr.bf16.mxu1 %v2143_v1 }
  0x51   : > { %1827 = vmatprep.subr.bf16.mxu0 %v2466_v22 }
  0x53   : > { %713 = vmatpush1.bf16.msra.mxu1 %v2476_v24 }
  0x54   : > { %1828 = vmatpush3.bf16.msra.mxu0 %v2484_v26  ;;  %714 = vmatprep.subr.bf16.mxu1 %v2143_v1 }
  0x55   : > { %1853 = vmatprep.subr.bf16.mxu0 %v2335_v0 }
  0x57   : > { %666 = vmatmul.mubr.bf16.vlgmr.msra.gmra.mrb[0].mxu0 %v2022_v27  ;;  %715 = vmatpush1.bf16.msra.mxu1 %v2493_v28 }
  0x58   : > { %1854 = vmatpush3.bf16.msra.mxu0 %v2347_v3  ;;  %941 = vmatprep.subr.bf16.mxu1 %v2143_v1 }
  0x59   : > { %1855 = vmatprep.subr.bf16.mxu0 %v2353_v4  ;;  %673 = vmatprep.mubr.bf16.mxu0 %v2029_v29 }
  0x5a   : > { %731 = vmatmul.mubr.bf16.vlgmr.msra.gmra.mrb[0].mxu1 %v2026_v30 }
  0x5b   : > { %942 = vmatpush1.bf16.msra.mxu1 %v2341_v2  ;;  %1682 = vmatprep.mubr.msk.bf16.mxu1 %vm620_vm0, %v2032_v31 }
  0x5c   : > { %1856 = vmatpush3.bf16.msra.mxu0 %v2366_v6  ;;  %943 = vmatprep.subr.bf16.mxu1 %v2143_v1 }
  0x5d   : > { %1857 = vmatprep.subr.bf16.mxu0 %v2371_v7 }
  0x5f   : > { %944 = vmatpush1.bf16.msra.mxu1 %v2360_v5  ;;  %674 = vmatmul.mubr.bf16.gmra.mrb[4].mxu0 %v2031_v32 }
  0x60   : > { %1858 = vmatpush3.bf16.msra.mxu0 %v2384_v9  ;;  %945 = vmatprep.subr.bf16.mxu1 %v2143_v1 }
  0x61   : > { %1859 = vmatprep.subr.bf16.mxu0 %v2390_v10  ;;  %681 = vmatprep.mubr.bf16.mxu0 %v2035_v33 }
  0x62   : > { %739 = vmatmul.mubr.bf16.gmra.mrb[4].mxu1 %v2034_v34 }
  0x63   : > { %946 = vmatpush1.bf16.msra.mxu1 %v2377_v8  ;;  %1683 = vmatprep.mubr.msk.bf16.mxu1 %vm620_vm0, %v2038_v35 }
  0x64   : > { %1860 = vmatpush3.bf16.msra.mxu0 %v2403_v12  ;;  %947 = vmatprep.subr.bf16.mxu1 %v2143_v1 }
  0x65   : > { %1861 = vmatprep.subr.bf16.mxu0 %v2409_v13 }
  0x67   : > { %948 = vmatpush1.bf16.msra.mxu1 %v2396_v11  ;;  %682 = vmatmul.mubr.bf16.gmra.mrb[8].mxu0 %v2037_v36 }
  0x68   : > { %1862 = vmatpush3.bf16.msra.mxu0 %v2422_v15  ;;  %949 = vmatprep.subr.bf16.mxu1 %v2143_v1 }
  0x69   : > { %1863 = vmatprep.subr.bf16.mxu0 %v2429_v16  ;;  %689 = vmatprep.mubr.bf16.mxu0 %v2041_v37 }
  0x6a   : > { %747 = vmatmul.mubr.bf16.gmra.mrb[8].mxu1 %v2040_v38 }
  0x6b   : > { %950 = vmatpush1.bf16.msra.mxu1 %v2415_v14  ;;  %1684 = vmatprep.mubr.msk.bf16.mxu1 %vm620_vm0, %v2044_v39 }
  0x6c   : > { %1864 = vmatpush3.bf16.msra.mxu0 %v2442_v18  ;;  %951 = vmatprep.subr.bf16.mxu1 %v2143_v1 }
  0x6d   : > { %1865 = vmatprep.subr.bf16.mxu0 %v2448_v19 }
  0x6f   : > { %952 = vmatpush1.bf16.msra.mxu1 %v2435_v17  ;;  %690 = vmatmul.mubr.bf16.gmra.mrb[12].mxu0 %v2043_v40 }
  0x70   : > { %1866 = vmatpush3.bf16.msra.mxu0 %v2459_v21  ;;  %953 = vmatprep.subr.bf16.mxu1 %v2143_v1 }
  0x71   : > { %1867 = vmatprep.subr.bf16.mxu0 %v2466_v22  ;;  %908 = vmatprep.mubr.bf16.mxu0 %v2049_v41 }
  0x72   : > { %755 = vmatmul.mubr.bf16.gmra.mrb[12].mxu1 %v2046_v42 }
  0x73   : > { %954 = vmatpush1.bf16.msra.mxu1 %v2453_v20  ;;  %1717 = vmatprep.mubr.msk.bf16.mxu1 %vm620_vm0, %v2052_v43 }
  0x74   : > { %1868 = vmatpush3.bf16.msra.mxu0 %v2484_v26  ;;  %955 = vmatprep.subr.bf16.mxu1 %v2143_v1 }
  0x75   : > { %1893 = vmatprep.subr.bf16.mxu0 %v2335_v0 }
  0x77   : > { %956 = vmatpush1.bf16.msra.mxu1 %v2476_v24  ;;  %909 = vmatmul.mubr.bf16.vlgmr.msra.gmra.mrb[16].mxu0 %v2047_v44 }
  0x78   : > { %957 = vmatprep.subr.bf16.mxu1 %v2143_v1  ;;  %1894 = vmatpush3.bf16.msra.mxu0 %v2347_v3 }
  0x79   : > { %916 = vmatprep.mubr.bf16.mxu0 %v2053_v45  ;;  %1895 = vmatprep.subr.bf16.mxu0 %v2353_v4 }
  0x7b   : > { %958 = vmatpush1.bf16.msra.mxu1 %v2493_v28 }
  0x7c   : > { %1192 = vmatprep.subr.bf16.mxu1 %v2143_v1  ;;  %1896 = vmatpush3.bf16.msra.mxu0 %v2366_v6 }
  0x7d   : > { %1897 = vmatprep.subr.bf16.mxu0 %v2371_v7 }
  0x7e   : > { %974 = vmatmul.mubr.bf16.vlgmr.msra.gmra.mrb[16].mxu1 %v2050_v46 }
  0x7f   : > { %1193 = vmatpush1.bf16.msra.mxu1 %v2341_v2  ;;  %917 = vmatmul.mubr.bf16.gmra.mrb[20].mxu0 %v2055_v47 }
  0x80   : > { %1194 = vmatprep.subr.bf16.mxu1 %v2143_v1  ;;  %1718 = vmatprep.mubr.msk.bf16.mxu1 %vm620_vm0, %v2056_v48 }
  0x81   : > { %1898 = vmatpush3.bf16.msra.mxu0 %v2384_v9  ;;  %924 = vmatprep.mubr.bf16.mxu0 %v2059_v49 }
  0x82   : > { %1899 = vmatprep.subr.bf16.mxu0 %v2390_v10 }
  0x83   : > { %1195 = vmatpush1.bf16.msra.mxu1 %v2360_v5 }
  0x84   : > { %1196 = vmatprep.subr.bf16.mxu1 %v2143_v1 }
  0x85   : > { %1900 = vmatpush3.bf16.msra.mxu0 %v2403_v12 }
  0x86   : > { %982 = vmatmul.mubr.bf16.gmra.mrb[20].mxu1 %v2058_v50  ;;  %1901 = vmatprep.subr.bf16.mxu0 %v2409_v13 }
  0x87   : > { %1197 = vmatpush1.bf16.msra.mxu1 %v2377_v8  ;;  %925 = vmatmul.mubr.bf16.gmra.mrb[24].mxu0 %v2061_v51 }
  0x88   : > { %1198 = vmatprep.subr.bf16.mxu1 %v2143_v1  ;;  %1719 = vmatprep.mubr.msk.bf16.mxu1 %vm620_vm0, %v2062_v52 }
  0x89   : > { %1902 = vmatpush3.bf16.msra.mxu0 %v2422_v15  ;;  %932 = vmatprep.mubr.bf16.mxu0 %v2065_v53 }
  0x8a   : > { %1903 = vmatprep.subr.bf16.mxu0 %v2429_v16 }
  0x8b   : > { %1199 = vmatpush1.bf16.msra.mxu1 %v2396_v11 }
  0x8c   : > { %1200 = vmatprep.subr.bf16.mxu1 %v2143_v1 }
  0x8d   : > { %1904 = vmatpush3.bf16.msra.mxu0 %v2442_v18 }
  0x8e   : > { %990 = vmatmul.mubr.bf16.gmra.mrb[24].mxu1 %v2064_v54  ;;  %1905 = vmatprep.subr.bf16.mxu0 %v2448_v19 }
  0x8f   : > { %1201 = vmatpush1.bf16.msra.mxu1 %v2415_v14  ;;  %933 = vmatmul.mubr.bf16.gmra.mrb[28].mxu0 %v2067_v55 }
  0x90   : > { %1202 = vmatprep.subr.bf16.mxu1 %v2143_v1  ;;  %1720 = vmatprep.mubr.msk.bf16.mxu1 %vm620_vm0, %v2068_v56 }
  0x91   : > { %1906 = vmatpush3.bf16.msra.mxu0 %v2459_v21  ;;  %1159 = vmatprep.mubr.bf16.mxu0 %v2073_v57 }
  0x92   : > { %1907 = vmatprep.subr.bf16.mxu0 %v2466_v22 }
  0x93   : > { %1203 = vmatpush1.bf16.msra.mxu1 %v2435_v17 }
  0x94   : > { %1204 = vmatprep.subr.bf16.mxu1 %v2143_v1 }
  0x95   : > { %1908 = vmatpush3.bf16.msra.mxu0 %v2484_v26 }
  0x96   : > { %998 = vmatmul.mubr.bf16.gmra.mrb[28].mxu1 %v2070_v58  ;;  %1933 = vmatprep.subr.bf16.mxu0 %v2335_v0  ;;  %v2074_v0 = vld [vmem:[%s2468_s30 + $0x108] ss:$16 sps:$4 sm:$0xff]  }
  0x97   : > { %1205 = vmatpush1.bf16.msra.mxu1 %v2453_v20  ;;  %1753 = vmatprep.mubr.msk.bf16.mxu1 %vm620_vm0, %v2076_v59 }
  0x98   : > { %1206 = vmatprep.subr.bf16.mxu1 %v2143_v1  ;;  %1160 = vmatmul.mubr.bf16.vlgmr.msra.gmra.mrb[32].mxu0 %v2071_v60 }
  0x99   : > { %1934 = vmatpush3.bf16.msra.mxu0 %v2347_v3  ;;  %1167 = vmatprep.mubr.bf16.mxu0 %v2077_v61  ;;  %v2080_v3 = vld [vmem:[%s2468_s30 + $0x12c] ss:$16 sps:$4 sm:$0xff]  }
  0x9a   : > { %1935 = vmatprep.subr.bf16.mxu0 %v2353_v4  ;;  %v2085_v4 = vld [vmem:[%s2468_s30 + $0x140] ss:$16 sps:$4 sm:$0xff]  }
  0x9b   : > { %1207 = vmatpush1.bf16.msra.mxu1 %v2476_v24 }
  0x9c   : > { %1208 = vmatprep.subr.bf16.mxu1 %v2143_v1 }
  0x9d   : > { %1936 = vmatpush3.bf16.msra.mxu0 %v2366_v6  ;;  %v2089_v6 = vld [vmem:[%s2468_s30 + $0x164] ss:$16 sps:$4 sm:$0xff]  }
  0x9e   : > { %1937 = vmatprep.subr.bf16.mxu0 %v2371_v7  ;;  %v2082_v7 = vld [vmem:[%s2468_s30 + $0x128] ss:$16 sps:$4 sm:$0xff]  }
  0x9f   : > { %1209 = vmatpush1.bf16.msra.mxu1 %v2493_v28 }
  0xa0   : > { %1443 = vmatprep.subr.bf16.mxu1 %v2143_v1  ;;  %1168 = vmatmul.mubr.bf16.gmra.mrb[36].mxu0 %v2079_v62 }
  0xa1   : > { %1938 = vmatpush3.bf16.msra.mxu0 %v2384_v9  ;;  %1175 = vmatprep.mubr.bf16.mxu0 %v2083_v63  ;;  %v2086_v9 = vld [vmem:[%s2468_s30 + $0x14c] ss:$16 sps:$4 sm:$0xff]  }
  0xa2   : > { %1225 = vmatmul.mubr.bf16.vlgmr.msra.gmra.mrb[32].mxu1 %v2074_v0  ;;  %1939 = vmatprep.subr.bf16.mxu0 %v2390_v10  ;;  %v2088_v10 = vld [vmem:[%s2468_s30 + $0x148] ss:$16 sps:$4 sm:$0xff]  }
  0xa3   : > { %1444 = vmatpush1.bf16.msra.mxu1 %v2341_v2  ;;  %1754 = vmatprep.mubr.msk.bf16.mxu1 %vm620_vm0, %v2080_v3  ;;  %v2091_v2 = vld [vmem:[%s2468_s30 + $0x160] ss:$16 sps:$4 sm:$0xff]  }
  0xa4   : > { %1445 = vmatprep.subr.bf16.mxu1 %v2143_v1 }
  0xa5   : > { %1940 = vmatpush3.bf16.msra.mxu0 %v2403_v12  ;;  %v2092_v12 = vld [vmem:[%s2468_s30 + $0x16c] ss:$16 sps:$4 sm:$0xff]  }
  0xa6   : > { %1941 = vmatprep.subr.bf16.mxu0 %v2409_v13  ;;  %v2094_v13 = vld [vmem:[%s2468_s30 + $0x168] ss:$16 sps:$4 sm:$0xff]  }
  0xa7   : > { %1446 = vmatpush1.bf16.msra.mxu1 %v2360_v5  ;;  %v2097_v5 = vld [vmem:[%s2468_s30 + $0x184] ss:$16 sps:$4 sm:$0xff]  }
  0xa8   : > { %1447 = vmatprep.subr.bf16.mxu1 %v2143_v1  ;;  %1176 = vmatmul.mubr.bf16.gmra.mrb[40].mxu0 %v2085_v4 }
  0xa9   : > { %1942 = vmatpush3.bf16.msra.mxu0 %v2422_v15  ;;  %1183 = vmatprep.mubr.bf16.mxu0 %v2089_v6  ;;  %v2102_v15 = vld [vmem:[%s2468_s30 + $0x18c] ss:$16 sps:$4 sm:$0xff]  }
  0xaa   : > { %1233 = vmatmul.mubr.bf16.gmra.mrb[36].mxu1 %v2082_v7  ;;  %1943 = vmatprep.subr.bf16.mxu0 %v2429_v16  ;;  %v2104_v16 = vld [vmem:[%s2468_s30 + $0x1c4] ss:$16 sps:$4 sm:$0xff]  }
  0xab   : > { %1448 = vmatpush1.bf16.msra.mxu1 %v2377_v8  ;;  %1755 = vmatprep.mubr.msk.bf16.mxu1 %vm620_vm0, %v2086_v9  ;;  %v2095_v8 = vld [vmem:[%s2468_s30 + $0x180] ss:$16 sps:$4 sm:$0xff]  }
  0xac   : > { %1449 = vmatprep.subr.bf16.mxu1 %v2143_v1 }
  0xad   : > { %1944 = vmatpush3.bf16.msra.mxu0 %v2442_v18  ;;  %v2106_v18 = vld [vmem:[%s2468_s30 + $0x1ac] ss:$16 sps:$4 sm:$0xff]  }
  0xae   : > { %1945 = vmatprep.subr.bf16.mxu0 %v2448_v19  ;;  %v2108_v19 = vld [vmem:[%s2468_s30 + $0x1c0] ss:$16 sps:$4 sm:$0xff]  }
  0xaf   : > { %1450 = vmatpush1.bf16.msra.mxu1 %v2396_v11  ;;  %v2098_v11 = vld [vmem:[%s2468_s30 + $0x1a4] ss:$16 sps:$4 sm:$0xff]  }
  0xb0   : > { %1451 = vmatprep.subr.bf16.mxu1 %v2143_v1  ;;  %1184 = vmatmul.mubr.bf16.gmra.mrb[44].mxu0 %v2091_v2 }
  0xb1   : > { %1946 = vmatpush3.bf16.msra.mxu0 %v2459_v21  ;;  %1410 = vmatprep.mubr.bf16.mxu0 %v2097_v5  ;;  %v2109_v21 = vld [vmem:[%s2468_s30 + $0x1a8] ss:$16 sps:$4 sm:$0xff]  }
  0xb2   : > { %1241 = vmatmul.mubr.bf16.gmra.mrb[40].mxu1 %v2088_v10  ;;  %1947 = vmatprep.subr.bf16.mxu0 %v2466_v22  ;;  %v2112_v22 = vld [vmem:[%s2468_s30 + $0x1cc] ss:$16 sps:$4 sm:$0xff]  }
  0xb3   : > { %1452 = vmatpush1.bf16.msra.mxu1 %v2415_v14  ;;  %1756 = vmatprep.mubr.msk.bf16.mxu1 %vm620_vm0, %v2092_v12  ;;  %v2103_v14 = vld [vmem:[%s2468_s30 + $0x1a0] ss:$16 sps:$4 sm:$0xff]  }
  0xb4   : > { %1453 = vmatprep.subr.bf16.mxu1 %v2143_v1 }
  0xb5   : > { %1948 = vmatpush3.bf16.msra.mxu0 %v2484_v26 }
  0xb7   : > { %1454 = vmatpush1.bf16.msra.mxu1 %v2435_v17  ;;  %v2100_v17 = vld [vmem:[%s2468_s30 + $0x188] ss:$16 sps:$4 sm:$0xff]  }
  0xb8   : > { %1455 = vmatprep.subr.bf16.mxu1 %v2143_v1  ;;  %1411 = vmatmul.mubr.bf16.vlgmr.msra.gmra.mrb[48].mxu0 %v2095_v8 }
  0xb9   : > { %1418 = vmatprep.mubr.bf16.mxu0 %v2098_v11 }
  0xba   : > { %1249 = vmatmul.mubr.bf16.gmra.mrb[44].mxu1 %v2094_v13 }
  0xbb   : > { %1456 = vmatpush1.bf16.msra.mxu1 %v2453_v20  ;;  %1789 = vmatprep.mubr.msk.bf16.mxu1 %vm620_vm0, %v2102_v15  ;;  %v2110_v20 = vld [vmem:[%s2468_s30 + $0x1e4] ss:$16 sps:$4 sm:$0xff]  }
  0xbc   : > { %1457 = vmatprep.subr.bf16.mxu1 %v2143_v1 }
  0xbf   : > { %1458 = vmatpush1.bf16.msra.mxu1 %v2476_v24  ;;  %v2116_v24 = vld [vmem:[%s2468_s30 + $0x1ec] ss:$16 sps:$4 sm:$0xff]  }
  0xc0   : > { %1459 = vmatprep.subr.bf16.mxu1 %v2143_v1  ;;  %1419 = vmatmul.mubr.bf16.gmra.mrb[52].mxu0 %v2103_v14  ;;  %v2115_v1 = vld [vmem:[%s2468_s30 + $0x1c8] ss:$16 sps:$4 sm:$0xff]  }
  0xc1   : > { %1426 = vmatprep.mubr.bf16.mxu0 %v2104_v16 }
  0xc3   : > { %1460 = vmatpush1.bf16.msra.mxu1 %v2493_v28  ;;  %v2679_v28 = vld [vmem:[%s2820_s2] ss:$0 sm:$0xff] }
  0xc6   : > { %1476 = vmatmul.mubr.bf16.vlgmr.msra.gmra.mrb[48].mxu1 %v2100_v17 }
  0xc7   : > { %1790 = vmatprep.mubr.msk.bf16.mxu1 %vm620_vm0, %v2106_v18 }
  0xc8   : > { %1427 = vmatmul.mubr.bf16.gmra.mrb[56].mxu0 %v2108_v19 }
  0xc9   : > { %1434 = vmatprep.mubr.bf16.mxu0 %v2110_v20 }
  0xce   : > { %1484 = vmatmul.mubr.bf16.gmra.mrb[52].mxu1 %v2109_v21 }
  0xcf   : > { %1791 = vmatprep.mubr.msk.bf16.mxu1 %vm620_vm0, %v2112_v22 }
  0xd0   : > { %1435 = vmatmul.mubr.bf16.gmra.mrb[60].mxu0 %v2114_v23 }
  0xd6   : > { %1492 = vmatmul.mubr.bf16.gmra.mrb[56].mxu1 %v2115_v1 }
  0xd7   : > { %1792 = vmatprep.mubr.msk.bf16.mxu1 %vm620_vm0, %v2116_v24 }
  0xde   : > { %1500 = vmatmul.mubr.bf16.gmra.mrb[60].mxu1 %v2118_v25 }
 0x12a   : > { %v1829_v26 = vpop.f32.mrb[0].mxu0 }
 0x12b   : > { %v1830_v27 = vpop.f32.mrb[1].mxu0 }
 0x12c   : > { %v1831_v29 = vadd.f32 %v1830_v27, %v1829_v26  ;;  %v1832_v30 = vpop.f32.mrb[2].mxu0 }
 0x12d   : > { %v1833_v31 = vpop.f32.mrb[3].mxu0  ;;  %v732_v32 = vpop.f32.mrb[0].mxu1 }
 0x12e   : > { %v1834_v33 = vadd.f32 %v1833_v31, %v1832_v30  ;;  %v668_v34 = vadd.f32 %v1831_v29, %v2679_v28  ;;  %v734_v35 = vpop.f32.mrb[1].mxu1 }
 0x12f   : > { %v735_v36 = vpop.f32.mrb[2].mxu1 }
 0x130   : > { %v2682_v37 = vadd.f32 %v732_v32, %v668_v34  ;;  %v671_v38 = vadd.f32 %v1834_v33, %v2679_v28  ;;  %v737_v39 = vpop.f32.mrb[3].mxu1 }
 0x132   : > { %v2685_v40 = vadd.f32 %v735_v36, %v671_v38  ;;  %v1835_v41 = vpop.f32.mrb[4].mxu0  ;;  %v763_v34 = vmax.f32 %v2682_v37, 0.0 }
 0x133   : > { %v1836_v42 = vpop.f32.mrb[5].mxu0 }
 0x134   : > { %v1837_v43 = vadd.f32 %v1836_v42, %v1835_v41  ;;  %v1838_v44 = vpop.f32.mrb[6].mxu0  ;;  %v764_v42 = vmax.f32 %v2685_v40, 0.0 }
 0x135   : > { %v1839_v45 = vpop.f32.mrb[7].mxu0  ;;  %v740_v46 = vpop.f32.mrb[4].mxu1 }
 0x136   : > { %v1840_v47 = vadd.f32 %v1839_v45, %v1838_v44  ;;  %v676_v48 = vadd.f32 %v1837_v43, %v2679_v28  ;;  %v742_v49 = vpop.f32.mrb[5].mxu1 }
 0x137   : > { %v743_v50 = vpop.f32.mrb[6].mxu1 }
 0x138   : > { %v2688_v51 = vadd.f32 %v740_v46, %v676_v48  ;;  %v679_v52 = vadd.f32 %v1840_v47, %v2679_v28  ;;  %v745_v53 = vpop.f32.mrb[7].mxu1 }
 0x13a   : > { %v2691_v54 = vadd.f32 %v743_v50, %v679_v52  ;;  %v1841_v55 = vpop.f32.mrb[8].mxu0 }
 0x13b   : > { %v1842_v56 = vpop.f32.mrb[9].mxu0 }
 0x13c   : > { %v1843_v57 = vadd.f32 %v1842_v56, %v1841_v55  ;;  %v1844_v58 = vpop.f32.mrb[10].mxu0 }
 0x13d   : > { %v1845_v59 = vpop.f32.mrb[11].mxu0  ;;  %v748_v60 = vpop.f32.mrb[8].mxu1 }
 0x13e   : > { %v1846_v61 = vadd.f32 %v1845_v59, %v1844_v58  ;;  %v684_v62 = vadd.f32 %v1843_v57, %v2679_v28  ;;  %v750_v63 = vpop.f32.mrb[9].mxu1  ;;  %v765_v57 = vmax.f32 %v2688_v51, 0.0 }
 0x13f   : > { %v751_v0 = vpop.f32.mrb[10].mxu1 }
 0x140   : > { %v2694_v3 = vadd.f32 %v748_v60, %v684_v62  ;;  %v687_v4 = vadd.f32 %v1846_v61, %v2679_v28  ;;  %v753_v6 = vpop.f32.mrb[11].mxu1  ;;  %v766_v62 = vmax.f32 %v2691_v54, 0.0 }
 0x142   : > { %v2697_v7 = vadd.f32 %v751_v0, %v687_v4  ;;  %v1847_v9 = vpop.f32.mrb[12].mxu0 }
 0x143   : > { %v1848_v2 = vpop.f32.mrb[13].mxu0 }
 0x144   : > { %v1849_v5 = vadd.f32 %v1848_v2, %v1847_v9  ;;  %v1850_v10 = vpop.f32.mrb[14].mxu0 }
 0x145   : > { %v1851_v12 = vpop.f32.mrb[15].mxu0  ;;  %v756_v8 = vpop.f32.mrb[12].mxu1 }
 0x146   : > { %v1852_v11 = vadd.f32 %v1851_v12, %v1850_v10  ;;  %v692_v13 = vadd.f32 %v1849_v5, %v2679_v28  ;;  %v758_v15 = vpop.f32.mrb[13].mxu1 }
 0x147   : > { %v759_v14 = vpop.f32.mrb[14].mxu1  ;;  %v767_v15 = vmax.f32 %v2694_v3, 0.0 }
 0x148   : > { %v2700_v16 = vadd.f32 %v756_v8, %v692_v13  ;;  %v695_v17 = vadd.f32 %v1852_v11, %v2679_v28  ;;  %v761_v18 = vpop.f32.mrb[15].mxu1 }
 0x14a   : > { %v2703_v19 = vadd.f32 %v759_v14, %v695_v17  ;;  %v1869_v20 = vpop.f32.mrb[16].mxu0 }
 0x14b   : > { %v1870_v21 = vpop.f32.mrb[17].mxu0 }
 0x14c   : > { %v1871_v22 = vadd.f32 %v1870_v21, %v1869_v20  ;;  %v1872_v23 = vpop.f32.mrb[18].mxu0  ;;  %v768_v21 = vmax.f32 %v2697_v7, 0.0 }
 0x14d   : > { %v1873_v1 = vpop.f32.mrb[19].mxu0 }
 0x14e   : > { %v1874_v24 = vadd.f32 %v1873_v1, %v1872_v23  ;;  %v911_v25 = vadd.f32 %v1871_v22, %v2679_v28 }
 0x150   : > { %v914_v26 = vadd.f32 %v1874_v24, %v2679_v28 }
 0x151   : > { %v975_v27 = vpop.f32.mrb[16].mxu1 }
 0x152   : > { %v976_v29 = vadd.f32 %v975_v27, %v911_v25  ;;  %v977_v30 = vpop.f32.mrb[17].mxu1  ;;  %v1875_v31 = vpop.f32.mrb[20].mxu0 }
 0x153   : > { %v978_v32 = vpop.f32.mrb[18].mxu1  ;;  %v1876_v33 = vpop.f32.mrb[21].mxu0 }
 0x154   : > { %v1006_v35 = vmax.f32 %v976_v29, 0.0  ;;  %v979_v36 = vadd.f32 %v978_v32, %v914_v26  ;;  %v980_v38 = vpop.f32.mrb[19].mxu1  ;;  %v1877_v39 = vadd.f32 %v1876_v33, %v1875_v31  ;;  %v1878_v41 = vpop.f32.mrb[22].mxu0  ;;  %v769_v33 = vmax.f32 %v2700_v16, 0.0 }
 0x155   : > { %v1879_v43 = vpop.f32.mrb[23].mxu0 }
 0x156   : > { %v2709_v44 = vmax.f32 %v763_v34, %v1006_v35  ;;  %v1007_v45 = vmax.f32 %v979_v36, 0.0  ;;  %v1880_v46 = vadd.f32 %v1879_v43, %v1878_v41  ;;  %v919_v47 = vadd.f32 %v1877_v39, %v2679_v28 }
 0x157   : > { %v770_v41 = vmax.f32 %v2703_v19, 0.0 }
 0x158   : > { %v2712_v48 = vmax.f32 %v764_v42, %v1007_v45  ;;  %v922_v49 = vadd.f32 %v1880_v46, %v2679_v28 }
 0x159   : > { %v983_v50 = vpop.f32.mrb[20].mxu1 }
 0x15a   : > { %v984_v37 = vadd.f32 %v983_v50, %v919_v47  ;;  %v985_v52 = vpop.f32.mrb[21].mxu1  ;;  %v1881_v53 = vpop.f32.mrb[24].mxu0 }
 0x15b   : > { %v986_v55 = vpop.f32.mrb[22].mxu1  ;;  %v1882_v56 = vpop.f32.mrb[25].mxu0 }
 0x15c   : > { %v1008_v40 = vmax.f32 %v984_v37, 0.0  ;;  %v987_v58 = vadd.f32 %v986_v55, %v922_v49  ;;  %v1883_v59 = vadd.f32 %v1882_v56, %v1881_v53  ;;  %v1884_v60 = vpop.f32.mrb[26].mxu0  ;;  %v988_v61 = vpop.f32.mrb[23].mxu1 }
 0x15d   : > { %v1885_v63 = vpop.f32.mrb[27].mxu0 }
 0x15e   : > { %v2717_v0 = vmax.f32 %v765_v57, %v1008_v40  ;;  %v1009_v4 = vmax.f32 %v987_v58, 0.0  ;;  %v1886_v6 = vadd.f32 %v1885_v63, %v1884_v60  ;;  %v927_v9 = vadd.f32 %v1883_v59, %v2679_v28 }
 0x160   : > { %v2720_v2 = vmax.f32 %v766_v62, %v1009_v4  ;;  %v930_v5 = vadd.f32 %v1886_v6, %v2679_v28 }
 0x161   : > { %v991_v10 = vpop.f32.mrb[24].mxu1 }
 0x162   : > { %v992_v51 = vadd.f32 %v991_v10, %v927_v9  ;;  %v993_v12 = vpop.f32.mrb[25].mxu1  ;;  %v1887_v8 = vpop.f32.mrb[28].mxu0 }
 0x163   : > { %v994_v11 = vpop.f32.mrb[26].mxu1  ;;  %v1888_v13 = vpop.f32.mrb[29].mxu0 }
 0x164   : > { %v1010_v54 = vmax.f32 %v992_v51, 0.0  ;;  %v995_v14 = vadd.f32 %v994_v11, %v930_v5  ;;  %v1889_v17 = vadd.f32 %v1888_v13, %v1887_v8  ;;  %v1890_v18 = vpop.f32.mrb[30].mxu0  ;;  %v996_v20 = vpop.f32.mrb[27].mxu1 }
 0x165   : > { %v1891_v22 = vpop.f32.mrb[31].mxu0 }
 0x166   : > { %v2725_v23 = vmax.f32 %v767_v15, %v1010_v54  ;;  %v1011_v1 = vmax.f32 %v995_v14, 0.0  ;;  %v1892_v24 = vadd.f32 %v1891_v22, %v1890_v18  ;;  %v935_v25 = vadd.f32 %v1889_v17, %v2679_v28 }
 0x168   : > { %v2728_v26 = vmax.f32 %v768_v21, %v1011_v1  ;;  %v938_v27 = vadd.f32 %v1892_v24, %v2679_v28 }
 0x169   : > { %v999_v29 = vpop.f32.mrb[28].mxu1 }
 0x16a   : > { %v1000_v3 = vadd.f32 %v999_v29, %v935_v25  ;;  %v1001_v30 = vpop.f32.mrb[29].mxu1 }
 0x16b   : > { %v1002_v31 = vpop.f32.mrb[30].mxu1  ;;  %v1909_v32 = vpop.f32.mrb[32].mxu0 }
 0x16c   : > { %v1012_v34 = vmax.f32 %v1000_v3, 0.0  ;;  %v1003_v7 = vadd.f32 %v1002_v31, %v938_v27  ;;  %v1004_v35 = vpop.f32.mrb[31].mxu1  ;;  %v1910_v36 = vpop.f32.mrb[33].mxu0 }
 0x16d   : > { %v1911_v38 = vadd.f32 %v1910_v36, %v1909_v32  ;;  %v1912_v39 = vpop.f32.mrb[34].mxu0 }
 0x16e   : > { %v2733_v42 = vmax.f32 %v769_v33, %v1012_v34  ;;  %v1013_v43 = vmax.f32 %v1003_v7, 0.0  ;;  %v1913_v45 = vpop.f32.mrb[35].mxu0 }
 0x16f   : > { %v1914_v46 = vadd.f32 %v1913_v45, %v1912_v39  ;;  %v1162_v49 = vadd.f32 %v1911_v38, %v2679_v28 }
 0x170   : > { %v2735_v47 = vmax.f32 %v770_v41, %v1013_v43 }
 0x171   : > { %v1165_v16 = vadd.f32 %v1914_v46, %v2679_v28 }
 0x173   : > { %v1915_v50 = vpop.f32.mrb[36].mxu0 }
 0x174   : > { %v1916_v37 = vpop.f32.mrb[37].mxu0 }
 0x175   : > { %v1226_v52 = vpop.f32.mrb[32].mxu1  ;;  %v1917_v53 = vadd.f32 %v1916_v37, %v1915_v50  ;;  %v1918_v55 = vpop.f32.mrb[38].mxu0 }
 0x176   : > { %v1227_v56 = vadd.f32 %v1226_v52, %v1162_v49  ;;  %v1228_v57 = vpop.f32.mrb[33].mxu1  ;;  %v1919_v40 = vpop.f32.mrb[39].mxu0 }
 0x177   : > { %v1229_v19 = vpop.f32.mrb[34].mxu1  ;;  %v1920_v58 = vadd.f32 %v1919_v40, %v1918_v55  ;;  %v1170_v4 = vadd.f32 %v1917_v53, %v2679_v28 }
 0x178   : > { %v1257_v59 = vmax.f32 %v1227_v56, 0.0  ;;  %v1230_v60 = vadd.f32 %v1229_v19, %v1165_v16  ;;  %v1231_v61 = vpop.f32.mrb[35].mxu1 }
 0x179   : > { %v1173_v5 = vadd.f32 %v1920_v58, %v2679_v28 }
 0x17a   : > { %v2740_v62 = vmax.f32 %v2709_v44, %v1257_v59  ;;  %v1258_v63 = vmax.f32 %v1230_v60, 0.0 }
 0x17b   : > { %v1921_v6 = vpop.f32.mrb[40].mxu0 }
 0x17c   : > { %v2744_v9 = vmax.f32 %v2712_v48, %v1258_v63  ;;  %v1922_v10 = vpop.f32.mrb[41].mxu0 }
 0x17d   : > { %v1234_v51 = vpop.f32.mrb[36].mxu1  ;;  %v1923_v12 = vadd.f32 %v1922_v10, %v1921_v6  ;;  %v1924_v8 = vpop.f32.mrb[42].mxu0 }
 0x17e   : > { %v1235_v11 = vadd.f32 %v1234_v51, %v1170_v4  ;;  %v1236_v13 = vpop.f32.mrb[37].mxu1  ;;  %v1925_v15 = vpop.f32.mrb[43].mxu0 }
 0x17f   : > { %v1237_v54 = vpop.f32.mrb[38].mxu1  ;;  %v1926_v14 = vadd.f32 %v1925_v15, %v1924_v8  ;;  %v1178_v48 = vadd.f32 %v1923_v12, %v2679_v28 }
 0x180   : > { %v1259_v44 = vmax.f32 %v1235_v11, 0.0  ;;  %v1238_v17 = vadd.f32 %v1237_v54, %v1173_v5  ;;  %v1239_v18 = vpop.f32.mrb[39].mxu1 }
 0x181   : > { %v1181_v24 = vadd.f32 %v1926_v14, %v2679_v28 }
 0x182   : > { %v2748_v20 = vmax.f32 %v2717_v0, %v1259_v44  ;;  %v1260_v21 = vmax.f32 %v1238_v17, 0.0 }
 0x183   : > { %v1927_v22 = vpop.f32.mrb[44].mxu0 }
 0x184   : > { %v2752_v1 = vmax.f32 %v2720_v2, %v1260_v21  ;;  %v1928_v25 = vpop.f32.mrb[45].mxu0 }
 0x185   : > { %v1242_v27 = vpop.f32.mrb[40].mxu1  ;;  %v1929_v29 = vadd.f32 %v1928_v25, %v1927_v22  ;;  %v1930_v3 = vpop.f32.mrb[46].mxu0 }
 0x186   : > { %v1243_v30 = vadd.f32 %v1242_v27, %v1178_v48  ;;  %v1244_v31 = vpop.f32.mrb[41].mxu1  ;;  %v1931_v32 = vpop.f32.mrb[47].mxu0 }
 0x187   : > { %v1245_v33 = vpop.f32.mrb[42].mxu1  ;;  %v1932_v34 = vadd.f32 %v1931_v32, %v1930_v3  ;;  %v1186_v2 = vadd.f32 %v1929_v29, %v2679_v28 }
 0x188   : > { %v1261_v0 = vmax.f32 %v1243_v30, 0.0  ;;  %v1246_v7 = vadd.f32 %v1245_v33, %v1181_v24  ;;  %v1247_v35 = vpop.f32.mrb[43].mxu1 }
 0x189   : > { %v1189_v43 = vadd.f32 %v1932_v34, %v2679_v28 }
 0x18a   : > { %v2756_v36 = vmax.f32 %v2725_v23, %v1261_v0  ;;  %v1262_v38 = vmax.f32 %v1246_v7, 0.0 }
 0x18b   : > { %v1949_v39 = vpop.f32.mrb[48].mxu0 }
 0x18c   : > { %v2760_v41 = vmax.f32 %v2728_v26, %v1262_v38  ;;  %v1950_v45 = vpop.f32.mrb[49].mxu0 }
 0x18d   : > { %v1250_v46 = vpop.f32.mrb[44].mxu1  ;;  %v1951_v49 = vadd.f32 %v1950_v45, %v1949_v39  ;;  %v1952_v50 = vpop.f32.mrb[50].mxu0 }
 0x18e   : > { %v1251_v16 = vadd.f32 %v1250_v46, %v1186_v2  ;;  %v1252_v37 = vpop.f32.mrb[45].mxu1  ;;  %v1953_v52 = vpop.f32.mrb[51].mxu0 }
 0x18f   : > { %v1253_v53 = vpop.f32.mrb[46].mxu1  ;;  %v1954_v23 = vadd.f32 %v1953_v52, %v1952_v50  ;;  %v1413_v63 = vadd.f32 %v1951_v49, %v2679_v28 }
 0x190   : > { %v1263_v55 = vmax.f32 %v1251_v16, 0.0  ;;  %v1254_v56 = vadd.f32 %v1253_v53, %v1189_v43  ;;  %v1255_v57 = vpop.f32.mrb[47].mxu1 }
 0x192   : > { %v2766_v40 = vmax.f32 %v2733_v42, %v1263_v55  ;;  %v1264_v26 = vmax.f32 %v1254_v56, 0.0  ;;  %v1416_v42 = vadd.f32 %v1954_v23, %v2679_v28 }
 0x193   : > { %v1955_v19 = vpop.f32.mrb[52].mxu0 }
 0x194   : > { %v2769_v58 = vmax.f32 %v2735_v47, %v1264_v26  ;;  %v1956_v59 = vpop.f32.mrb[53].mxu0 }
 0x195   : > { %v1957_v60 = vadd.f32 %v1956_v59, %v1955_v19  ;;  %v1958_v61 = vpop.f32.mrb[54].mxu0 }
 0x196   : > { %v1959_v4 = vpop.f32.mrb[55].mxu0 }
 0x197   : > { %v1960_v6 = vadd.f32 %v1959_v4, %v1958_v61  ;;  %v1421_v18 = vadd.f32 %v1957_v60, %v2679_v28 }
 0x199   : > { %v1477_v5 = vpop.f32.mrb[48].mxu1  ;;  %v1424_v3 = vadd.f32 %v1960_v6, %v2679_v28 }
 0x19a   : > { %v1478_v10 = vadd.f32 %v1477_v5, %v1413_v63  ;;  %v1479_v51 = vpop.f32.mrb[49].mxu1 }
 0x19b   : > { %v1480_v12 = vpop.f32.mrb[50].mxu1  ;;  %v1961_v8 = vpop.f32.mrb[56].mxu0 }
 0x19c   : > { %v1508_v11 = vmax.f32 %v1478_v10, 0.0  ;;  %v1481_v47 = vadd.f32 %v1480_v12, %v1416_v42  ;;  %v1482_v13 = vpop.f32.mrb[51].mxu1  ;;  %v1962_v15 = vpop.f32.mrb[57].mxu0 }
 0x19d   : > { %v1963_v54 = vadd.f32 %v1962_v15, %v1961_v8  ;;  %v1964_v14 = vpop.f32.mrb[58].mxu0 }
 0x19e   : > { %v1516_v44 = vmax.f32 %v2740_v62, %v1508_v11  ;;  %v1509_v17 = vmax.f32 %v1481_v47, 0.0  ;;  %v1965_v21 = vpop.f32.mrb[59].mxu0 }
 0x19f   : > { %v1966_v48 = vadd.f32 %v1965_v21, %v1964_v14  ;;  %v1429_v2 = vadd.f32 %v1963_v54, %v2679_v28 }
 0x1a0   : > { %v1805_v22 = vpack.c.bf16 %v1516_v44, %v1516_v44  ;;  %v1517_v24 = vmax.f32 %v2744_v9, %v1509_v17 }
 0x1a1   : > { %v1485_v25 = vpop.f32.mrb[52].mxu1  ;;  %v1432_v52 = vadd.f32 %v1966_v48, %v2679_v28 }
 0x1a2   : > { %1557 = vst.msk [vmem:[%s2778_s20] sm:$0xf] %vm1556_vm1, %v1805_v22  ;;  %v1806_v62 = vpack.c.bf16 %v1517_v24, %v1517_v24  ;;  %v1486_v27 = vadd.f32 %v1485_v25, %v1421_v18  ;;  %v1487_v29 = vpop.f32.mrb[53].mxu1 }
 0x1a3   : > { %v1488_v30 = vpop.f32.mrb[54].mxu1  ;;  %v1967_v31 = vpop.f32.mrb[60].mxu0 }
 0x1a4   : > { %1558 = vst.msk [vmem:[%s2778_s20 + $0x4] sm:$0xf] %vm1556_vm1, %v1806_v62  ;;  %v1510_v32 = vmax.f32 %v1486_v27, 0.0  ;;  %v1489_v33 = vadd.f32 %v1488_v30, %v1424_v3  ;;  %v1490_v34 = vpop.f32.mrb[55].mxu1  ;;  %v1968_v0 = vpop.f32.mrb[61].mxu0 }
 0x1a5   : > { %v1969_v7 = vadd.f32 %v1968_v0, %v1967_v31  ;;  %v1970_v9 = vpop.f32.mrb[62].mxu0 }
 0x1a6   : > { %v1518_v35 = vmax.f32 %v2748_v20, %v1510_v32  ;;  %v1511_v38 = vmax.f32 %v1489_v33, 0.0  ;;  %v1971_v39 = vpop.f32.mrb[63].mxu0 }
 0x1a7   : > { %v1972_v43 = vadd.f32 %v1971_v39, %v1970_v9 }
 0x1a8   : > { %v1807_v45 = vpack.c.bf16 %v1518_v35, %v1518_v35  ;;  %v1519_v46 = vmax.f32 %v2752_v1, %v1511_v38  ;;  %v1437_v1 = vadd.f32 %v1969_v7, %v2679_v28 }
 0x1a9   : > { %v1493_v49 = vpop.f32.mrb[56].mxu1  ;;  %v1440_v4 = vadd.f32 %v1972_v43, %v2679_v28 }
 0x1aa   : > { %1559 = vst.msk [vmem:[%s2778_s20 + $0x8] sm:$0xf] %vm1556_vm1, %v1807_v45  ;;  %v1808_v50 = vpack.c.bf16 %v1519_v46, %v1519_v46  ;;  %v1494_v16 = vadd.f32 %v1493_v49, %v1429_v2  ;;  %v1495_v37 = vpop.f32.mrb[57].mxu1 }
 0x1ab   : > { %v1496_v53 = vpop.f32.mrb[58].mxu1 }
 0x1ac   : > { %1560 = vst.msk [vmem:[%s2778_s20 + $0xc] sm:$0xf] %vm1556_vm1, %v1808_v50  ;;  %v1512_v20 = vmax.f32 %v1494_v16, 0.0  ;;  %v1497_v23 = vadd.f32 %v1496_v53, %v1432_v52  ;;  %v1498_v55 = vpop.f32.mrb[59].mxu1 }
 0x1ae   : > { %v1520_v56 = vmax.f32 %v2756_v36, %v1512_v20  ;;  %v1513_v57 = vmax.f32 %v1497_v23, 0.0 }
 0x1b0   : > { %v1809_v26 = vpack.c.bf16 %v1520_v56, %v1520_v56  ;;  %v1521_v19 = vmax.f32 %v2760_v41, %v1513_v57 }
 0x1b1   : > { %v1501_v59 = vpop.f32.mrb[60].mxu1 }
 0x1b2   : > { %1561 = vst.msk [vmem:[%s2778_s20 + $0x10] sm:$0xf] %vm1556_vm1, %v1809_v26  ;;  %v1810_v60 = vpack.c.bf16 %v1521_v19, %v1521_v19  ;;  %v1502_v61 = vadd.f32 %v1501_v59, %v1437_v1  ;;  %v1503_v63 = vpop.f32.mrb[61].mxu1 }
 0x1b3   : > { %v1504_v6 = vpop.f32.mrb[62].mxu1 }
 0x1b4   : > { %1562 = vst.msk [vmem:[%s2778_s20 + $0x14] sm:$0xf] %vm1556_vm1, %v1810_v60  ;;  %v1514_v36 = vmax.f32 %v1502_v61, 0.0  ;;  %v1505_v5 = vadd.f32 %v1504_v6, %v1440_v4  ;;  %v1506_v10 = vpop.f32.mrb[63].mxu1 }
 0x1b6   : > { %v1522_v51 = vmax.f32 %v2766_v40, %v1514_v36  ;;  %v1515_v42 = vmax.f32 %v1505_v5, 0.0 }
 0x1b8   : > { %v1811_v41 = vpack.c.bf16 %v1522_v51, %v1522_v51  ;;  %v1523_v12 = vmax.f32 %v2769_v58, %v1515_v42 }
 0x1ba   : > { %1563 = vst.msk [vmem:[%s2778_s20 + $0x18] sm:$0xf] %vm1556_vm1, %v1811_v41  ;;  %v1812_v8 = vpack.c.bf16 %v1523_v12, %v1523_v12 }
 0x1bc   : > { %1564 = vst.msk [vmem:[%s2778_s20 + $0x1c] sm:$0xf] %vm1556_vm1, %v1812_v8 }
 0x1bd PF: > { %p10_p9 = scmp.ge.s32.totalorder %s2181_s16, 4   ;;  %s2822_s12 = smov %s2137_s13 }
 0x1be   : > { %s2823_s13 = smov %s2190_s19  ;;  %s2824_s14 = smov %s2181_s16 }
 0x1bf   :  { %12 = sbr.rel (!%p10_p9) target bundleno = 2 (0x2), region = 93 }

// kernel: net_forward.5
= control target key start
LH: loop header
LB: loop body
LE: loop exit
PB: predicated region body
PF: predicated region fallthrough
CT: control target
= control target key end

     0   :  { %vm1559_vm0 = vmmov 0   ;;  %vm885_vm1 = vcmask 261120   ;;  %vm1176_vm2 = vcmask 80896   ;;  %s1922_s1 = inlined_call_operand.vmem [shape: bf16[1568,10], index: 1, kind: input, shape index: {}]   ;;  %s1923_s0 = inlined_call_operand.vmem [shape: bf16[16,1568], index: 0, kind: input, shape index: {}]   ;;  %s1924_s2 = inlined_call_operand.vmem [shape: f32[1,10], index: 2, kind: input, shape index: {}]   ;;  %s1925_s3 = inlined_call_operand.vmem [shape: f32[16,10], index: 3, kind: output, shape index: {}]  }
   0x1   :  { %v1441_v0 = vld [vmem:[%s1922_s1 + $0x40] sm:$0xff]   ;;  %v1445_v4 = vld [vmem:[%s1922_s1 + $0x48] sm:$0xff]   ;;  %v1449_v8 = vld [vmem:[%s1922_s1 + $0x50] sm:$0xff]  }
   0x2   :  { %v1442_v1 = vld [vmem:[%s1922_s1] sm:$0xff]   ;;  %1296 = vmatprep.subr.bf16.mxu0 %v1441_v0  ;;  %v1446_v5 = vld [vmem:[%s1922_s1 + $0x8] sm:$0xff]   ;;  %v1450_v9 = vld [vmem:[%s1922_s1 + $0x10] sm:$0xff]  }
   0x3   :  { %v1443_v2 = vld [vmem:[%s1922_s1 + $0xc0] sm:$0xff]   ;;  %1297 = vmatpush3.bf16.msra.mxu0 %v1442_v1  ;;  %v1447_v6 = vld [vmem:[%s1922_s1 + $0xc8] sm:$0xff]   ;;  %v1451_v10 = vld [vmem:[%s1922_s1 + $0xd0] sm:$0xff]  }
   0x4   :  { %v1444_v3 = vld [vmem:[%s1922_s1 + $0x80] sm:$0xff]   ;;  %1318 = vmatprep.subr.bf16.mxu1 %v1443_v2  ;;  %1298 = vmatprep.subr.bf16.mxu0 %v1445_v4  ;;  %v1448_v7 = vld [vmem:[%s1922_s1 + $0x88] sm:$0xff]   ;;  %v1452_v11 = vld [vmem:[%s1922_s1 + $0x90] sm:$0xff]  }
   0x5   :  { %1319 = vmatpush3.bf16.msra.mxu1 %v1444_v3  ;;  %v1453_v12 = vld [vmem:[%s1922_s1 + $0x58] sm:$0xff]   ;;  %v1457_v16 = vld [vmem:[%s1922_s1 + $0x60] sm:$0xff]   ;;  %v1461_v20 = vld [vmem:[%s1922_s1 + $0x68] sm:$0xff]  }
   0x6   :  { %1320 = vmatprep.subr.bf16.mxu1 %v1447_v6  ;;  %v1454_v13 = vld [vmem:[%s1922_s1 + $0x18] sm:$0xff]   ;;  %v1458_v17 = vld [vmem:[%s1922_s1 + $0x20] sm:$0xff]   ;;  %v1462_v21 = vld [vmem:[%s1922_s1 + $0x28] sm:$0xff]  }
   0x7   :  { %1299 = vmatpush3.bf16.msra.mxu0 %v1446_v5  ;;  %v1455_v14 = vld [vmem:[%s1922_s1 + $0xd8] sm:$0xff]   ;;  %v1459_v18 = vld [vmem:[%s1922_s1 + $0xe0] sm:$0xff]   ;;  %v1463_v22 = vld [vmem:[%s1922_s1 + $0xe8] sm:$0xff]  }
   0x8   :  { %1300 = vmatprep.subr.bf16.mxu0 %v1449_v8  ;;  %v1456_v15 = vld [vmem:[%s1922_s1 + $0x98] sm:$0xff]   ;;  %v1460_v19 = vld [vmem:[%s1922_s1 + $0xa0] sm:$0xff]   ;;  %v1464_v23 = vld [vmem:[%s1922_s1 + $0xa8] sm:$0xff]  }
   0x9   :  { %1321 = vmatpush3.bf16.msra.mxu1 %v1448_v7  ;;  %v1465_v24 = vld [vmem:[%s1922_s1 + $0x70] sm:$0xff]   ;;  %v1469_v28 = vld [vmem:[%s1922_s1 + $0x78] sm:$0xff]   ;;  %v1476_v34 = vld [vmem:[%s1922_s1 + $0x140] sm:$0xff]  }
   0xa   :  { %1322 = vmatprep.subr.bf16.mxu1 %v1451_v10  ;;  %v1466_v25 = vld [vmem:[%s1922_s1 + $0x30] sm:$0xff]   ;;  %v1470_v29 = vld [vmem:[%s1922_s1 + $0x38] sm:$0xff]   ;;  %v1479_v36 = vld [vmem:[%s1923_s0 + $0xc] ss:$52 sps:$4 sm:$0xff]  }
   0xb   :  { %1301 = vmatpush3.bf16.msra.mxu0 %v1450_v9  ;;  %v1467_v26 = vld [vmem:[%s1922_s1 + $0xf0] sm:$0xff]   ;;  %v1471_v30 = vld [vmem:[%s1922_s1 + $0xf8] sm:$0xff]   ;;  %v1480_v37 = vld [vmem:[%s1922_s1 + $0x100] sm:$0xff]   ;;  %962 = vmatprep.mubr.bf16.mxu1 %v1479_v36 }
   0xc   :  { %1302 = vmatprep.subr.bf16.mxu0 %v1453_v12  ;;  %v1468_v27 = vld [vmem:[%s1922_s1 + $0xb0] sm:$0xff]   ;;  %v1472_v31 = vld [vmem:[%s1922_s1 + $0xb8] sm:$0xff]   ;;  %v1481_v38 = vld [vmem:[%s1922_s1 + $0x1c0] sm:$0xff]  }
   0xd   :  { %1323 = vmatpush3.bf16.msra.mxu1 %v1452_v11  ;;  %v1473_v32 = vld [vmem:[%s1923_s0] ss:$52 sps:$4 sm:$0xff]   ;;  %v1475_v33 = vld [vmem:[%s1923_s0 + $0x4] ss:$52 sps:$4 sm:$0xff]   ;;  %v1477_v35 = vld [vmem:[%s1923_s0 + $0x8] ss:$52 sps:$4 sm:$0xff]  }
   0xe   :  { %1324 = vmatprep.subr.bf16.mxu1 %v1455_v14  ;;  %921 = vmatprep.mubr.bf16.mxu0 %v1475_v33  ;;  %v1482_v39 = vld [vmem:[%s1922_s1 + $0x180] sm:$0xff]   ;;  %v1483_v40 = vld [vmem:[%s1922_s1 + $0x148] sm:$0xff]   ;;  %v1487_v44 = vld [vmem:[%s1922_s1 + $0x150] sm:$0xff]  }
   0xf   :  { %1303 = vmatpush3.bf16.msra.mxu0 %v1454_v13  ;;  %v1484_v41 = vld [vmem:[%s1922_s1 + $0x108] sm:$0xff]   ;;  %v1488_v45 = vld [vmem:[%s1922_s1 + $0x110] sm:$0xff]   ;;  %v1491_v48 = vld [vmem:[%s1922_s1 + $0x158] sm:$0xff]  }
  0x10   :  { %1304 = vmatprep.subr.bf16.mxu0 %v1457_v16  ;;  %v1485_v42 = vld [vmem:[%s1922_s1 + $0x1c8] sm:$0xff]   ;;  %v1489_v46 = vld [vmem:[%s1922_s1 + $0x1d0] sm:$0xff]   ;;  %v1492_v49 = vld [vmem:[%s1922_s1 + $0x118] sm:$0xff]  }
  0x11   :  { %1325 = vmatpush3.bf16.msra.mxu1 %v1456_v15  ;;  %v1486_v43 = vld [vmem:[%s1922_s1 + $0x188] sm:$0xff]   ;;  %v1490_v47 = vld [vmem:[%s1922_s1 + $0x190] sm:$0xff]   ;;  %v1493_v50 = vld [vmem:[%s1922_s1 + $0x1d8] sm:$0xff]  }
  0x12   :  { %1326 = vmatprep.subr.bf16.mxu1 %v1459_v18  ;;  %v1494_v51 = vld [vmem:[%s1922_s1 + $0x198] sm:$0xff]   ;;  %v1495_v52 = vld [vmem:[%s1922_s1 + $0x160] sm:$0xff]   ;;  %v1499_v56 = vld [vmem:[%s1922_s1 + $0x168] sm:$0xff]  }
  0x13   :  { %1305 = vmatpush3.bf16.msra.mxu0 %v1458_v17  ;;  %v1496_v53 = vld [vmem:[%s1922_s1 + $0x120] sm:$0xff]   ;;  %v1500_v57 = vld [vmem:[%s1922_s1 + $0x128] sm:$0xff]   ;;  %v1503_v60 = vld [vmem:[%s1922_s1 + $0x170] sm:$0xff]  }
  0x14   :  { %1306 = vmatprep.subr.bf16.mxu0 %v1461_v20  ;;  %v1497_v54 = vld [vmem:[%s1922_s1 + $0x1e0] sm:$0xff]   ;;  %v1501_v58 = vld [vmem:[%s1922_s1 + $0x1e8] sm:$0xff]   ;;  %v1504_v61 = vld [vmem:[%s1922_s1 + $0x130] sm:$0xff]  }
  0x15   :  { %1327 = vmatpush3.bf16.msra.mxu1 %v1460_v19  ;;  %v1498_v55 = vld [vmem:[%s1922_s1 + $0x1a0] sm:$0xff]   ;;  %v1502_v59 = vld [vmem:[%s1922_s1 + $0x1a8] sm:$0xff]   ;;  %v1505_v62 = vld [vmem:[%s1922_s1 + $0x1f0] sm:$0xff]  }
  0x16   :  { %1328 = vmatprep.subr.bf16.mxu1 %v1463_v22  ;;  %v1506_v63 = vld [vmem:[%s1922_s1 + $0x1b0] sm:$0xff]   ;;  %v1507_v0 = vld [vmem:[%s1922_s1 + $0x178] sm:$0xff]   ;;  %v1514_v6 = vld [vmem:[%s1922_s1 + $0x240] sm:$0xff]  }
  0x17   :  { %1307 = vmatpush3.bf16.msra.mxu0 %v1462_v21  ;;  %v1508_v1 = vld [vmem:[%s1922_s1 + $0x138] sm:$0xff]   ;;  %v1511_v4 = vld [vmem:[%s1923_s0 + $0x10] ss:$52 sps:$4 sm:$0xff]   ;;  %v1513_v5 = vld [vmem:[%s1923_s0 + $0x14] ss:$52 sps:$4 sm:$0xff]  }
  0x18   :  { %1308 = vmatprep.subr.bf16.mxu0 %v1465_v24  ;;  %v1509_v2 = vld [vmem:[%s1922_s1 + $0x1f8] sm:$0xff]   ;;  %v1518_v9 = vld [vmem:[%s1922_s1 + $0x200] sm:$0xff]   ;;  %v1521_v12 = vld [vmem:[%s1922_s1 + $0x248] sm:$0xff]  }
  0x19   :  { %1329 = vmatpush3.bf16.msra.mxu1 %v1464_v23  ;;  %v1510_v3 = vld [vmem:[%s1922_s1 + $0x1b8] sm:$0xff]   ;;  %v1519_v10 = vld [vmem:[%s1922_s1 + $0x2c0] sm:$0xff]   ;;  %v1522_v13 = vld [vmem:[%s1922_s1 + $0x208] sm:$0xff]  }
  0x1a   :  { %1330 = vmatprep.subr.bf16.mxu1 %v1467_v26  ;;  %v1515_v7 = vld [vmem:[%s1923_s0 + $0x18] ss:$52 sps:$4 sm:$0xff]   ;;  %v1517_v8 = vld [vmem:[%s1923_s0 + $0x1c] ss:$52 sps:$4 sm:$0xff]   ;;  %v1520_v11 = vld [vmem:[%s1922_s1 + $0x280] sm:$0xff]  }
  0x1b   :  { %1309 = vmatpush3.bf16.msra.mxu0 %v1466_v25  ;;  %v1523_v14 = vld [vmem:[%s1922_s1 + $0x2c8] sm:$0xff]   ;;  %v1525_v16 = vld [vmem:[%s1922_s1 + $0x250] sm:$0xff]   ;;  %v1529_v20 = vld [vmem:[%s1922_s1 + $0x258] sm:$0xff]  }
  0x1c   :  { %1310 = vmatprep.subr.bf16.mxu0 %v1469_v28  ;;  %v1524_v15 = vld [vmem:[%s1922_s1 + $0x288] sm:$0xff]   ;;  %v1526_v17 = vld [vmem:[%s1922_s1 + $0x210] sm:$0xff]   ;;  %v1530_v21 = vld [vmem:[%s1922_s1 + $0x218] sm:$0xff]  }
  0x1d   :  { %1331 = vmatpush3.bf16.msra.mxu1 %v1468_v27  ;;  %v1527_v18 = vld [vmem:[%s1922_s1 + $0x2d0] sm:$0xff]   ;;  %v1531_v22 = vld [vmem:[%s1922_s1 + $0x2d8] sm:$0xff]   ;;  %v1533_v24 = vld [vmem:[%s1922_s1 + $0x260] sm:$0xff]  }
  0x1e   :  { %1332 = vmatprep.subr.bf16.mxu1 %v1471_v30  ;;  %v1528_v19 = vld [vmem:[%s1922_s1 + $0x290] sm:$0xff]   ;;  %v1532_v23 = vld [vmem:[%s1922_s1 + $0x298] sm:$0xff]   ;;  %v1534_v25 = vld [vmem:[%s1922_s1 + $0x220] sm:$0xff]  }
  0x1f   :  { %1311 = vmatpush3.bf16.msra.mxu0 %v1470_v29  ;;  %v1535_v26 = vld [vmem:[%s1922_s1 + $0x2e0] sm:$0xff]   ;;  %v1537_v28 = vld [vmem:[%s1922_s1 + $0x268] sm:$0xff]   ;;  %v1542_v33 = vld [vmem:[%s1922_s1 + $0x230] sm:$0xff]  }
  0x20   :  { %1340 = vmatprep.subr.bf16.mxu0 %v1476_v34  ;;  %v1536_v27 = vld [vmem:[%s1922_s1 + $0x2a0] sm:$0xff]   ;;  %v1538_v29 = vld [vmem:[%s1922_s1 + $0x228] sm:$0xff]   ;;  %v1543_v34 = vld [vmem:[%s1922_s1 + $0x2f0] sm:$0xff]  }
  0x21   :  { %1333 = vmatpush3.bf16.msra.mxu1 %v1472_v31  ;;  %v1539_v30 = vld [vmem:[%s1922_s1 + $0x2e8] sm:$0xff]   ;;  %v1545_v36 = vld [vmem:[%s1922_s1 + $0x278] sm:$0xff]  }
  0x22   :  { %922 = vmatmul.mubr.bf16.vlgmr.msra.gmra.mrb[0].mxu0 %v1473_v32  ;;  %1362 = vmatprep.subr.bf16.mxu1 %v1481_v38  ;;  %v1540_v31 = vld [vmem:[%s1922_s1 + $0x2a8] sm:$0xff]   ;;  %v1541_v32 = vld [vmem:[%s1922_s1 + $0x270] sm:$0xff]   ;;  %v1547_v38 = vld [vmem:[%s1922_s1 + $0x2f8] sm:$0xff]  }
  0x23   :  { %1341 = vmatpush3.bf16.msra.mxu0 %v1480_v37  ;;  %1003 = vmatprep.mubr.bf16.mxu0 %v1513_v5  ;;  %v1546_v37 = vld [vmem:[%s1922_s1 + $0x238] sm:$0xff]  }
  0x24   :  { %963 = vmatmul.mubr.bf16.vlgmr.msra.gmra.mrb[0].mxu1 %v1477_v35  ;;  %1342 = vmatprep.subr.bf16.mxu0 %v1483_v40  ;;  %v1544_v35 = vld [vmem:[%s1922_s1 + $0x2b0] sm:$0xff]  }
  0x25   :  { %1363 = vmatpush3.bf16.msra.mxu1 %v1482_v39  ;;  %1044 = vmatprep.mubr.bf16.mxu1 %v1517_v8  ;;  %v1548_v39 = vld [vmem:[%s1922_s1 + $0x2b8] sm:$0xff]   ;;  %v1549_v40 = vld [vmem:[%s1923_s0 + $0x20] ss:$52 sps:$4 sm:$0xff]  }
  0x26   :  { %1364 = vmatprep.subr.bf16.mxu1 %v1485_v42  ;;  %v1558_v42 = vmov 0.0  }
  0x27   :  { %1343 = vmatpush3.bf16.msra.mxu0 %v1484_v41  ;;  %v1551_v41 = vld [vmem:[%s1923_s0 + $0x24] ss:$52 sps:$4 sm:$0xff]  }
  0x28   :  { %1344 = vmatprep.subr.bf16.mxu0 %v1487_v44  ;;  %v1554_v44 = vld [vmem:[%s1923_s0 + $0x2c] ss:$52 sps:$4 sm:$0xff]  }
  0x29   :  { %1365 = vmatpush3.bf16.msra.mxu1 %v1486_v43  ;;  %v1552_v43 = vld [vmem:[%s1923_s0 + $0x28] ss:$52 sps:$4 sm:$0xff]  }
  0x2a   :  { %1366 = vmatprep.subr.bf16.mxu1 %v1489_v46  ;;  %v1556_v46 = vld [vmem:[%s1922_s1 + $0x308] sm:$0xff]  }
  0x2b   :  { %1345 = vmatpush3.bf16.msra.mxu0 %v1488_v45  ;;  %v1555_v45 = vld [vmem:[%s1922_s1 + $0x300] sm:$0xff]  }
  0x2c   :  { %1346 = vmatprep.subr.bf16.mxu0 %v1491_v48 }
  0x2d   :  { %1367 = vmatpush3.bf16.msra.mxu1 %v1490_v47  ;;  %v1557_v47 = vld [vmem:[%s1923_s0 + $0x30] ss:$52 sps:$4 sm:$0xff]  }
  0x2e   :  { %1368 = vmatprep.subr.bf16.mxu1 %v1493_v50 }
  0x2f   :  { %1347 = vmatpush3.bf16.msra.mxu0 %v1492_v49  ;;  %v1183_v49 = vld [vmem:[%s1924_s2] ss:$0 sm:$0xff] }
  0x30   :  { %1348 = vmatprep.subr.bf16.mxu0 %v1495_v52 }
  0x31   :  { %1369 = vmatpush3.bf16.msra.mxu1 %v1494_v51 }
  0x32   :  { %1370 = vmatprep.subr.bf16.mxu1 %v1497_v54 }
  0x33   :  { %1349 = vmatpush3.bf16.msra.mxu0 %v1496_v53 }
  0x34   :  { %1350 = vmatprep.subr.bf16.mxu0 %v1499_v56 }
  0x35   :  { %1371 = vmatpush3.bf16.msra.mxu1 %v1498_v55 }
  0x36   :  { %1372 = vmatprep.subr.bf16.mxu1 %v1501_v58 }
  0x37   :  { %1351 = vmatpush3.bf16.msra.mxu0 %v1500_v57 }
  0x38   :  { %1352 = vmatprep.subr.bf16.mxu0 %v1503_v60 }
  0x39   :  { %1373 = vmatpush3.bf16.msra.mxu1 %v1502_v59 }
  0x3a   :  { %1374 = vmatprep.subr.bf16.mxu1 %v1505_v62 }
  0x3b   :  { %1353 = vmatpush3.bf16.msra.mxu0 %v1504_v61 }
  0x3c   :  { %1354 = vmatprep.subr.bf16.mxu0 %v1507_v0 }
  0x3d   :  { %1375 = vmatpush3.bf16.msra.mxu1 %v1506_v63 }
  0x3e   :  { %1376 = vmatprep.subr.bf16.mxu1 %v1509_v2 }
  0x3f   :  { %1355 = vmatpush3.bf16.msra.mxu0 %v1508_v1 }
  0x40   :  { %1384 = vmatprep.subr.bf16.mxu0 %v1514_v6 }
  0x41   :  { %1377 = vmatpush3.bf16.msra.mxu1 %v1510_v3 }
  0x42   :  { %1004 = vmatmul.mubr.bf16.vlgmr.msra.gmra.mrb[4].mxu0 %v1511_v4  ;;  %1406 = vmatprep.subr.bf16.mxu1 %v1519_v10 }
  0x43   :  { %1385 = vmatpush3.bf16.msra.mxu0 %v1518_v9  ;;  %1085 = vmatprep.mubr.bf16.mxu0 %v1551_v41 }
  0x44   :  { %1045 = vmatmul.mubr.bf16.vlgmr.msra.gmra.mrb[4].mxu1 %v1515_v7  ;;  %1386 = vmatprep.subr.bf16.mxu0 %v1521_v12 }
  0x45   :  { %1407 = vmatpush3.bf16.msra.mxu1 %v1520_v11  ;;  %1126 = vmatprep.mubr.bf16.mxu1 %v1554_v44 }
  0x46   :  { %1408 = vmatprep.subr.bf16.mxu1 %v1523_v14 }
  0x47   :  { %1387 = vmatpush3.bf16.msra.mxu0 %v1522_v13 }
  0x48   :  { %1388 = vmatprep.subr.bf16.mxu0 %v1525_v16 }
  0x49   :  { %1409 = vmatpush3.bf16.msra.mxu1 %v1524_v15 }
  0x4a   :  { %1410 = vmatprep.subr.bf16.mxu1 %v1527_v18 }
  0x4b   :  { %1389 = vmatpush3.bf16.msra.mxu0 %v1526_v17 }
  0x4c   :  { %1390 = vmatprep.subr.bf16.mxu0 %v1529_v20 }
  0x4d   :  { %1411 = vmatpush3.bf16.msra.mxu1 %v1528_v19 }
  0x4e   :  { %1412 = vmatprep.subr.bf16.mxu1 %v1531_v22 }
  0x4f   :  { %1391 = vmatpush3.bf16.msra.mxu0 %v1530_v21 }
  0x50   :  { %1392 = vmatprep.subr.bf16.mxu0 %v1533_v24 }
  0x51   :  { %1413 = vmatpush3.bf16.msra.mxu1 %v1532_v23 }
  0x52   :  { %1414 = vmatprep.subr.bf16.mxu1 %v1535_v26 }
  0x53   :  { %1393 = vmatpush3.bf16.msra.mxu0 %v1534_v25 }
  0x54   :  { %1394 = vmatprep.subr.bf16.mxu0 %v1537_v28 }
  0x55   :  { %1415 = vmatpush3.bf16.msra.mxu1 %v1536_v27 }
  0x56   :  { %1416 = vmatprep.subr.bf16.mxu1 %v1539_v30 }
  0x57   :  { %1395 = vmatpush3.bf16.msra.mxu0 %v1538_v29 }
  0x58   :  { %1396 = vmatprep.subr.bf16.mxu0 %v1541_v32 }
  0x59   :  { %1417 = vmatpush3.bf16.msra.mxu1 %v1540_v31 }
  0x5a   :  { %1418 = vmatprep.subr.bf16.mxu1 %v1543_v34 }
  0x5b   :  { %1397 = vmatpush3.bf16.msra.mxu0 %v1542_v33 }
  0x5c   :  { %1398 = vmatprep.subr.bf16.mxu0 %v1545_v36 }
  0x5d   :  { %1419 = vmatpush3.bf16.msra.mxu1 %v1544_v35 }
  0x5e   :  { %1420 = vmatprep.subr.bf16.mxu1 %v1547_v38 }
  0x5f   :  { %1399 = vmatpush3.bf16.msra.mxu0 %v1546_v37 }
  0x60   :  { %1431 = vmatprep.subr.bf16.mxu0 %v1558_v42 }
  0x61   :  { %1421 = vmatpush3.bf16.msra.mxu1 %v1548_v39 }
  0x62   :  { %1086 = vmatmul.mubr.bf16.vlgmr.msra.gmra.mrb[8].mxu0 %v1549_v40 }
  0x63   :  { %1432 = vmatpush3.bf16.msra.mxu0 %v1555_v45  ;;  %1435 = vmatprep.mubr.msk.bf16.mxu0 %vm1559_vm0, %v1558_v42 }
  0x64   :  { %1127 = vmatmul.mubr.bf16.vlgmr.msra.gmra.mrb[8].mxu1 %v1552_v43  ;;  %1433 = vmatprep.subr.bf16.mxu0 %v1558_v42 }
  0x67   :  { %1434 = vmatpush3.bf16.msra.mxu0 %v1556_v46 }
  0x6a   :  { %1436 = vmatmul.mubr.msk.bf16.vlgmr.msra.gmra.mrb[12].mxu0 %vm885_vm1, %v1557_v47 }
  0xf5   :  { %v1312_v48 = vpop.f32.mrb[0].mxu0 }
  0xf6   :  { %v1313_v50 = vpop.f32.mrb[1].mxu0 }
  0xf7   :  { %v1314_v51 = vadd.f32 %v1313_v50, %v1312_v48  ;;  %v1315_v52 = vpop.f32.mrb[2].mxu0  ;;  %v1334_v53 = vpop.f32.mrb[0].mxu1 }
  0xf8   :  { %v1316_v54 = vpop.f32.mrb[3].mxu0  ;;  %v1335_v55 = vpop.f32.mrb[1].mxu1 }
  0xf9   :  { %v924_v56 = vadd.f32 %v1314_v51, %v1183_v49  ;;  %v1317_v57 = vadd.f32 %v1316_v54, %v1315_v52  ;;  %v1336_v58 = vadd.f32 %v1335_v55, %v1334_v53  ;;  %v1337_v59 = vpop.f32.mrb[2].mxu1 }
  0xfa   :  { %v1338_v60 = vpop.f32.mrb[3].mxu1 }
  0xfb   :  { %v927_v61 = vadd.f32 %v1317_v57, %v1183_v49  ;;  %v965_v62 = vadd.f32 %v1336_v58, %v924_v56  ;;  %v1339_v63 = vadd.f32 %v1338_v60, %v1337_v59 }
  0xfd   :  { %v968_v0 = vadd.f32 %v1339_v63, %v927_v61 }
 0x115   :  { %v1356_v1 = vpop.f32.mrb[4].mxu0 }
 0x116   :  { %v1357_v2 = vpop.f32.mrb[5].mxu0 }
 0x117   :  { %v1358_v3 = vadd.f32 %v1357_v2, %v1356_v1  ;;  %v1359_v4 = vpop.f32.mrb[6].mxu0  ;;  %v1378_v5 = vpop.f32.mrb[4].mxu1 }
 0x118   :  { %v1360_v6 = vpop.f32.mrb[7].mxu0  ;;  %v1379_v9 = vpop.f32.mrb[5].mxu1 }
 0x119   :  { %v1006_v7 = vadd.f32 %v1358_v3, %v965_v62  ;;  %v1361_v8 = vadd.f32 %v1360_v6, %v1359_v4  ;;  %v1380_v10 = vadd.f32 %v1379_v9, %v1378_v5  ;;  %v1381_v11 = vpop.f32.mrb[6].mxu1 }
 0x11a   :  { %v1382_v13 = vpop.f32.mrb[7].mxu1 }
 0x11b   :  { %v1009_v12 = vadd.f32 %v1361_v8, %v968_v0  ;;  %v1047_v14 = vadd.f32 %v1380_v10, %v1006_v7  ;;  %v1383_v15 = vadd.f32 %v1382_v13, %v1381_v11 }
 0x11d   :  { %v1050_v16 = vadd.f32 %v1383_v15, %v1009_v12 }
 0x135   :  { %v1400_v17 = vpop.f32.mrb[8].mxu0 }
 0x136   :  { %v1401_v18 = vpop.f32.mrb[9].mxu0 }
 0x137   :  { %v1422_v19 = vpop.f32.mrb[8].mxu1  ;;  %v1402_v20 = vadd.f32 %v1401_v18, %v1400_v17  ;;  %v1403_v21 = vpop.f32.mrb[10].mxu0 }
 0x138   :  { %v1423_v22 = vpop.f32.mrb[9].mxu1  ;;  %v1404_v24 = vpop.f32.mrb[11].mxu0 }
 0x139   :  { %v1424_v23 = vadd.f32 %v1423_v22, %v1422_v19  ;;  %v1425_v25 = vpop.f32.mrb[10].mxu1  ;;  %v1088_v26 = vadd.f32 %v1402_v20, %v1047_v14  ;;  %v1405_v27 = vadd.f32 %v1404_v24, %v1403_v21 }
 0x13a   :  { %v1426_v28 = vpop.f32.mrb[11].mxu1 }
 0x13b   :  { %v1427_v29 = vadd.f32 %v1426_v28, %v1425_v25  ;;  %v1091_v30 = vadd.f32 %v1405_v27, %v1050_v16  ;;  %v1129_v31 = vadd.f32 %v1424_v23, %v1088_v26 }
 0x13d   :  { %v1169_v32 = vpop.f32.mrb[12].mxu0  ;;  %v1132_v33 = vadd.f32 %v1427_v29, %v1091_v30 }
 0x13e   :  { %v1170_v34 = vadd.f32 %v1169_v32, %v1129_v31  ;;  %v1437_v35 = vpop.f32.mrb[13].mxu0 }
 0x13f   :  { %v1172_v36 = vpop.f32.mrb[14].mxu0 }
 0x140   :  { %1177 = vst.msk [vmem:[%s1925_s3] sm:$0xff] %vm1176_vm2, %v1170_v34  ;;  %v1173_v37 = vadd.f32 %v1172_v36, %v1132_v33  ;;  %v1438_v38 = vpop.f32.mrb[15].mxu0 }
 0x142   :  { %1178 = vst.msk [vmem:[%s1925_s3 + $0x8] sm:$0xff] %vm1176_vm2, %v1173_v37 }

</bundles_post_ra>
